<compile_context>
chip_gen: v7x
topology: tpu7x:2x2x1
jax: 0.10.0
libtpu: 0.0.40
codegen_flags: <defaults>
</compile_context>

<pallas_src>
import functools

import jax
import jax.numpy as jnp
from jax import lax
from jax.experimental import pallas as pl
from jax.experimental.pallas import tpu as pltpu


def _round_up(x, m):
    return (x + m - 1) // m * m


def _convlstm_kernel(z_ref, w_ref, b_ref, c_ref, out_ref, acc_ref, *,
                     cout, wp, guard, pc):
    """One batch element (whole padded image) per grid step.

    z_ref  : (1, Zr, Cz)      f32  raw [x||h] padded-pixel rows + guard rows
    w_ref  : (9, Cz, 4*cout)  bf16 per-tap, gate-packed conv weights [i|f|o|c~]
    b_ref  : (Pc, 4*cout)     f32  per-pixel biases (conv biases folded in);
                                   constant index_map -> resident across batch
    c_ref  : (1, Pc, cout)    f32  previous cell state (padded-pixel rows)
    out_ref: (1, Pc, 2*cout)  f32  [c_new | h_new]
    acc_ref: (Pc, 4*cout)     f32  VMEM scratch accumulator
    """
    # Gate pre-activations: bias + sum over the 9 conv taps.  Each tap is a
    # constant sublane-offset window of the raw slab (no HBM im2col).
    acc_ref[...] = b_ref[...]
    t = 0
    for dy in range(3):
        for dx in range(3):
            off = guard + (dy - 1) * wp + (dx - 1)          # static int
            tap = z_ref[0, off:off + pc, :].astype(jnp.bfloat16)
            acc_ref[...] += jnp.dot(tap, w_ref[t],
                                    preferred_element_type=jnp.float32)
            t += 1
    pre = acc_ref[...]

    # sigmoid on i|f|o lanes only, tanh on c~ lanes only (no double EUP work).
    sig = jax.nn.sigmoid(pre[:, :3 * cout])
    g_g = jnp.tanh(pre[:, 3 * cout:])
    i_g = sig[:, 0 * cout:1 * cout]
    f_g = sig[:, 1 * cout:2 * cout]
    o_g = sig[:, 2 * cout:3 * cout]

    c_new = f_g * c_ref[0] + i_g * g_g
    h_new = o_g * jnp.tanh(c_new)

    # Two static slice stores (no lane-concat temporary).
    out_ref[0, :, :cout] = c_new
    out_ref[0, :, cout:] = h_new


def conv_lstm_unit(F_in, H_in, C_in, params):
    """F_in: (N, Cin, H, W); H_in/C_in: (N, Cout, H, W) — PyTorch NCHW.

    Returns (C, H) in NCHW, matching the PyTorch module.
    """
    N, Cin, H, W = F_in.shape
    Cout = H_in.shape[1]
    Cz = Cin + Cout
    Hp, Wp = H + 2, W + 2
    Pp = Hp * Wp                              # padded pixels per image
    Pc = _round_up(Pp, 8)                     # computed rows per image
    # Guard rows so every tap read (offset up to +-(Wp+1), including the
    # Pc - Pp trailing junk rows) stays inside the per-image slab.
    guard = _round_up(Wp + 1 + (Pc - Pp), 8)
    Zr = _round_up(guard + Pp + guard, 8)

    # -------- wrapper-side layout plumbing (runs once, in XLA) --------
    x = jnp.transpose(F_in, (0, 2, 3, 1)).astype(jnp.float32)      # NHWC
    h = jnp.transpose(H_in, (0, 2, 3, 1)).astype(jnp.float32)
    z = jnp.concatenate([x, h], axis=-1)                           # (N,H,W,Cz)
    zp = jnp.pad(z, ((0, 0), (1, 1), (1, 1), (0, 0)))              # (N,Hp,Wp,Cz)
    z_flat = zp.reshape(N, Pp, Cz)
    z_flat = jnp.pad(z_flat, ((0, 0), (guard, Zr - guard - Pp), (0, 0)))
    # z stays f32 in HBM (exact, robust unaligned sublane slices); the MXU
    # cast to bf16 happens in-kernel.
    # TODO(synk): store z as bf16 to shave a further ~7% HBM traffic once the
    # packed-dtype unaligned-slice path is validated on the target toolchain.

    # Per-tap, gate-packed weights: (9, Cz, 4*Cout), bf16.
    gates = [("Wfi", "Whi"), ("Wff", "Whf"), ("Wfo", "Who"), ("Wfc", "Whc")]

    def tap_w(dy, dx):
        cols = []
        for gx, gh in gates:
            wx = params[gx + "_w"][:, :, dy, dx].T      # (Cin, Cout)
            wh = params[gh + "_w"][:, :, dy, dx].T      # (Cout, Cout)
            cols.append(jnp.concatenate([wx, wh], axis=0))    # (Cz, Cout)
        return jnp.concatenate(cols, axis=-1)           # (Cz, 4*Cout)

    w_taps = jnp.stack([tap_w(dy, dx) for dy in range(3) for dx in range(3)],
                       axis=0).astype(jnp.bfloat16)     # (9, Cz, 4*Cout)

    # Per-pixel biases (gate-packed, conv biases folded in), padded-pixel rows.
    # NOTE: like the PyTorch module's broadcast, this assumes square images
    # for the (1, C, width, height) parameter vs. the (H, W) activation order.
    def per_pixel(b):   # (1, Cout, H, W) -> (H, W, Cout)
        return jnp.transpose(b[0], (1, 2, 0))

    b_conv = jnp.concatenate([params[gx + "_b"] + params[gh + "_b"]
                              for gx, gh in gates], axis=0)        # (4*Cout,)
    b_hw = jnp.concatenate([per_pixel(params[n])
                            for n in ("bi", "bf", "bo", "bc")], axis=-1)
    b_hw = b_hw + b_conv.reshape(1, 1, 4 * Cout)                   # (H,W,4C)
    b_big = jnp.pad(b_hw, ((1, 1), (1, 1), (0, 0))).reshape(Pp, 4 * Cout)
    b_big = jnp.pad(b_big, ((0, Pc - Pp), (0, 0))).astype(jnp.float32)

    # Previous cell state in padded-pixel rows.
    c_nhwc = jnp.transpose(C_in, (0, 2, 3, 1)).astype(jnp.float32)
    c_pad = jnp.pad(c_nhwc, ((0, 0), (1, 1), (1, 1), (0, 0))).reshape(N, Pp, Cout)
    c_pad = jnp.pad(c_pad, ((0, 0), (0, Pc - Pp), (0, 0)))

    kernel = functools.partial(_convlstm_kernel, cout=Cout, wp=Wp,
                               guard=guard, pc=Pc)

    # VMEM budget: double-buffered blocks + scratch + headroom, capped for
    # v7x's 64 MiB physical VMEM.
    blk = (Zr * Cz * 4 + 9 * Cz * 4 * Cout * 2 + Pc * 4 * Cout * 4
           + Pc * Cout * 4 + Pc * 2 * Cout * 4)
    vmem_limit = int(min(64 * 2 ** 20, max(32 * 2 ** 20, 3 * blk)))
    # TODO(synk): for very large images (e.g. 128x128+) add intra-image halo
    # tiling (manual make_async_copy) so the per-step VMEM stays bounded.

    flops = 2 * N * Pc * 9 * Cz * 4 * Cout
    transc = 5 * N * Pc * Cout
    bytes_acc = (z_flat.size * 4 + w_taps.size * 2 + b_big.size * 4
                 + c_pad.size * 4 + N * Pc * 2 * Cout * 4)

    ch = pl.pallas_call(
        kernel,
        out_shape=jax.ShapeDtypeStruct((N, Pc, 2 * Cout), jnp.float32),
        grid_spec=pltpu.PrefetchScalarGridSpec(
            num_scalar_prefetch=0,
            grid=(N,),
            in_specs=[
                pl.BlockSpec((1, Zr, Cz), lambda n: (n, 0, 0)),
                pl.BlockSpec((9, Cz, 4 * Cout), lambda n: (0, 0, 0)),
                pl.BlockSpec((Pc, 4 * Cout), lambda n: (0, 0)),   # resident
                pl.BlockSpec((1, Pc, Cout), lambda n: (n, 0, 0)),
            ],
            out_specs=pl.BlockSpec((1, Pc, 2 * Cout), lambda n: (n, 0, 0)),
            scratch_shapes=[pltpu.VMEM((Pc, 4 * Cout), jnp.float32)],
        ),
        compiler_params=pltpu.CompilerParams(
            dimension_semantics=("parallel",),
            vmem_limit_bytes=vmem_limit),
        cost_estimate=pl.CostEstimate(flops=flops, transcendentals=transc,
                                      bytes_accessed=bytes_acc),
    )(z_flat, w_taps, b_big, c_pad)

    # Drop guard/junk rows, split packed [c | h], back to NCHW.
    ch = ch[:, :Pp, :].reshape(N, Hp, Wp, 2 * Cout)
    c_new = ch[:, 1:H + 1, 1:W + 1, :Cout]
    h_new = ch[:, 1:H + 1, 1:W + 1, Cout:]
    return (jnp.transpose(c_new, (0, 3, 1, 2)),
            jnp.transpose(h_new, (0, 3, 1, 2)))


def _reference(F_in, H_in, C_in, params):
    """Pure-JAX reference (NCHW, module semantics) for the correctness check."""
    dn = ("NCHW", "OIHW", "NCHW")

    def conv(x, w, b):
        y = lax.conv_general_dilated(x, w, window_strides=(1, 1),
                                     padding="SAME", dimension_numbers=dn)
        return y + b.reshape(1, -1, 1, 1)

    i = jax.nn.sigmoid(conv(F_in, params["Wfi_w"], params["Wfi_b"]) +
                       conv(H_in, params["Whi_w"], params["Whi_b"]) + params["bi"])
    f = jax.nn.sigmoid(conv(F_in, params["Wff_w"], params["Wff_b"]) +
                       conv(H_in, params["Whf_w"], params["Whf_b"]) + params["bf"])
    o = jax.nn.sigmoid(conv(F_in, params["Wfo_w"], params["Wfo_b"]) +
                       conv(H_in, params["Who_w"], params["Who_b"]) + params["bo"])
    g = jnp.tanh(conv(F_in, params["Wfc_w"], params["Wfc_b"]) +
                 conv(H_in, params["Whc_w"], params["Whc_b"]) + params["bc"])
    C = f * C_in + i * g
    H = o * jnp.tanh(C)
    return C, H


def make_params(key, in_filters, out_filters, image_shape):
    width, height = image_shape
    names_x = ["Wfi", "Wff", "Wfo", "Wfc"]
    names_h = ["Whi", "Whf", "Who", "Whc"]
    params = {}
    keys = jax.random.split(key, 2 * len(names_x) * 2 + 4)
    k_iter = iter(keys)
    for n in names_x:
        params[n + "_w"] = 0.1 * jax.random.normal(
            next(k_iter), (out_filters, in_filters, 3, 3), jnp.float32)
        params[n + "_b"] = 0.1 * jax.random.normal(
            next(k_iter), (out_filters,), jnp.float32)
    for n in names_h:
        params[n + "_w"] = 0.1 * jax.random.normal(
            next(k_iter), (out_filters, out_filters, 3, 3), jnp.float32)
        params[n + "_b"] = 0.1 * jax.random.normal(
            next(k_iter), (out_filters,), jnp.float32)
    for n in ["bi", "bf", "bo", "bc"]:
        params[n] = jax.random.normal(
            next(k_iter), (1, out_filters, width, height), jnp.float32)
    return params


if __name__ == "__main__":
    batch, in_filters, out_filters = 2, 4, 32
    img = 16  # square image so the (1, C, width, height) bias broadcast is well-defined

    key = jax.random.PRNGKey(0)
    kp, kx, kh, kc = jax.random.split(key, 4)
    params = make_params(kp, in_filters, out_filters, (img, img))

    F_in = jax.random.normal(kx, (batch, in_filters, img, img), jnp.float32)
    H_in = jax.random.normal(kh, (batch, out_filters, img, img), jnp.float32)
    C_in = jax.random.normal(kc, (batch, out_filters, img, img), jnp.float32)

    # The kernel feeds the MXU in bf16; round test activations/weights to
    # bf16-representable values so the in-kernel cast is lossless and the f32
    # reference can be compared with a tight tolerance.
    rnd = lambda a: a.astype(jnp.bfloat16).astype(jnp.float32)
    F_in, H_in = rnd(F_in), rnd(H_in)
    params = {k: (rnd(v) if k.endswith("_w") else v) for k, v in params.items()}

    C_k, H_k = jax.jit(conv_lstm_unit)(F_in, H_in, C_in, params)
    jax.block_until_ready((C_k, H_k))

    C_r, H_r = _reference(F_in, H_in, C_in, params)
    assert jnp.allclose(C_k, C_r, atol=2e-3, rtol=2e-3), "C mismatch vs reference"
    assert jnp.allclose(H_k, H_r, atol=2e-3, rtol=2e-3), "H mismatch vs reference"

    print("KERNEL_OK")
</pallas_src>

<mosaic_0001>
module attributes {stable_mosaic.version = 11 : i64} {
  func.func @_convlstm_kernel(%arg0: i32, %arg1: memref<1x376x36xf32, #tpu.memory_space<vmem>>, %arg2: memref<9x36x128xbf16, #tpu.memory_space<vmem>>, %arg3: memref<328x128xf32, #tpu.memory_space<vmem>>, %arg4: memref<1x328x32xf32, #tpu.memory_space<vmem>>, %arg5: memref<1x328x64xf32, #tpu.memory_space<vmem>>, %arg6: memref<328x128xf32, #tpu.memory_space<vmem>>) attributes {dimension_semantics = [#tpu.dimension_semantics<parallel>], iteration_bounds = array<i64: 2>, scalar_prefetch = 0 : i64, scratch_operands = 1 : i64, tpu.core_type = #tpu.core_type<tc>, window_params = [{transform_indices = @transform_0, window_bounds = array<i64: 1, 376, 36>}, {pipeline_mode = #tpu.pipeline_mode<synchronous>, transform_indices = @transform_1, window_bounds = array<i64: 9, 36, 128>}, {pipeline_mode = #tpu.pipeline_mode<synchronous>, transform_indices = @transform_2, window_bounds = array<i64: 328, 128>}, {transform_indices = @transform_3, window_bounds = array<i64: 1, 328, 32>}, {transform_indices = @transform_4, window_bounds = array<i64: 1, 328, 64>}]} {
    %c0 = arith.constant 0 : index
    %c0_0 = arith.constant 0 : index
    %0 = vector.load %arg3[%c0, %c0_0] : memref<328x128xf32, #tpu.memory_space<vmem>>, vector<328x128xf32>
    %c0_1 = arith.constant 0 : index
    %c0_2 = arith.constant 0 : index
    %1 = vector.load %arg6[%c0_1, %c0_2] : memref<328x128xf32, #tpu.memory_space<vmem>>, vector<328x128xf32>
    tpu.vector_store %arg6[%c0_1, %c0_2], %0 {strides = array<i32>} : memref<328x128xf32, #tpu.memory_space<vmem>>, vector<328x128xf32>,
    %c0_3 = arith.constant 0 : index
    %c5 = arith.constant 5 : index
    %c0_4 = arith.constant 0 : index
    %2 = vector.load %arg1[%c0_3, %c5, %c0_4] : memref<1x376x36xf32, #tpu.memory_space<vmem>>, vector<1x328x36xf32>
    %3 = vector.shape_cast %2 : vector<1x328x36xf32> to vector<328x36xf32>
    %4 = arith.truncf %3 : vector<328x36xf32> to vector<328x36xbf16>
    %c0_5 = arith.constant 0 : index
    %c0_6 = arith.constant 0 : index
    %5 = vector.load %arg6[%c0_5, %c0_6] : memref<328x128xf32, #tpu.memory_space<vmem>>, vector<328x128xf32>
    %c0_7 = arith.constant 0 : index
    %c0_8 = arith.constant 0 : index
    %c0_9 = arith.constant 0 : index
    %6 = vector.load %arg2[%c0_7, %c0_8, %c0_9] : memref<9x36x128xbf16, #tpu.memory_space<vmem>>, vector<1x36x128xbf16>
    %7 = vector.shape_cast %6 : vector<1x36x128xbf16> to vector<36x128xbf16>
    %cst = arith.constant dense<0.000000e+00> : vector<328x128xf32>
    %8 = tpu.matmul %4, %7, %cst {dimension_numbers = #tpu.dot_dimension_numbers<[1], [0], [0], [1], [0, 0, 1, 1], [], []>} : vector<328x36xbf16>, vector<36x128xbf16>, vector<328x128xf32> -> vector<328x128xf32>
    %9 = arith.addf %5, %8 : vector<328x128xf32>
    %c0_10 = arith.constant 0 : index
    %c0_11 = arith.constant 0 : index
    %10 = vector.load %arg6[%c0_10, %c0_11] : memref<328x128xf32, #tpu.memory_space<vmem>>, vector<328x128xf32>
    tpu.vector_store %arg6[%c0_10, %c0_11], %9 {strides = array<i32>} : memref<328x128xf32, #tpu.memory_space<vmem>>, vector<328x128xf32>,
    %c0_12 = arith.constant 0 : index
    %c6 = arith.constant 6 : index
    %c0_13 = arith.constant 0 : index
    %11 = vector.load %arg1[%c0_12, %c6, %c0_13] : memref<1x376x36xf32, #tpu.memory_space<vmem>>, vector<1x328x36xf32>
    %12 = vector.shape_cast %11 : vector<1x328x36xf32> to vector<328x36xf32>
    %13 = arith.truncf %12 : vector<328x36xf32> to vector<328x36xbf16>
    %c0_14 = arith.constant 0 : index
    %c0_15 = arith.constant 0 : index
    %14 = vector.load %arg6[%c0_14, %c0_15] : memref<328x128xf32, #tpu.memory_space<vmem>>, vector<328x128xf32>
    %c1 = arith.constant 1 : index
    %c0_16 = arith.constant 0 : index
    %c0_17 = arith.constant 0 : index
    %15 = vector.load %arg2[%c1, %c0_16, %c0_17] : memref<9x36x128xbf16, #tpu.memory_space<vmem>>, vector<1x36x128xbf16>
    %16 = vector.shape_cast %15 : vector<1x36x128xbf16> to vector<36x128xbf16>
    %cst_18 = arith.constant dense<0.000000e+00> : vector<328x128xf32>
    %17 = tpu.matmul %13, %16, %cst_18 {dimension_numbers = #tpu.dot_dimension_numbers<[1], [0], [0], [1], [0, 0, 1, 1], [], []>} : vector<328x36xbf16>, vector<36x128xbf16>, vector<328x128xf32> -> vector<328x128xf32>
    %18 = arith.addf %14, %17 : vector<328x128xf32>
    %c0_19 = arith.constant 0 : index
    %c0_20 = arith.constant 0 : index
    %19 = vector.load %arg6[%c0_19, %c0_20] : memref<328x128xf32, #tpu.memory_space<vmem>>, vector<328x128xf32>
    tpu.vector_store %arg6[%c0_19, %c0_20], %18 {strides = array<i32>} : memref<328x128xf32, #tpu.memory_space<vmem>>, vector<328x128xf32>,
    %c0_21 = arith.constant 0 : index
    %c7 = arith.constant 7 : index
    %c0_22 = arith.constant 0 : index
    %20 = vector.load %arg1[%c0_21, %c7, %c0_22] : memref<1x376x36xf32, #tpu.memory_space<vmem>>, vector<1x328x36xf32>
    %21 = vector.shape_cast %20 : vector<1x328x36xf32> to vector<328x36xf32>
    %22 = arith.truncf %21 : vector<328x36xf32> to vector<328x36xbf16>
    %c0_23 = arith.constant 0 : index
    %c0_24 = arith.constant 0 : index
    %23 = vector.load %arg6[%c0_23, %c0_24] : memref<328x128xf32, #tpu.memory_space<vmem>>, vector<328x128xf32>
    %c2 = arith.constant 2 : index
    %c0_25 = arith.constant 0 : index
    %c0_26 = arith.constant 0 : index
    %24 = vector.load %arg2[%c2, %c0_25, %c0_26] : memref<9x36x128xbf16, #tpu.memory_space<vmem>>, vector<1x36x128xbf16>
    %25 = vector.shape_cast %24 : vector<1x36x128xbf16> to vector<36x128xbf16>
    %cst_27 = arith.constant dense<0.000000e+00> : vector<328x128xf32>
    %26 = tpu.matmul %22, %25, %cst_27 {dimension_numbers = #tpu.dot_dimension_numbers<[1], [0], [0], [1], [0, 0, 1, 1], [], []>} : vector<328x36xbf16>, vector<36x128xbf16>, vector<328x128xf32> -> vector<328x128xf32>
    %27 = arith.addf %23, %26 : vector<328x128xf32>
    %c0_28 = arith.constant 0 : index
    %c0_29 = arith.constant 0 : index
    %28 = vector.load %arg6[%c0_28, %c0_29] : memref<328x128xf32, #tpu.memory_space<vmem>>, vector<328x128xf32>
    tpu.vector_store %arg6[%c0_28, %c0_29], %27 {strides = array<i32>} : memref<328x128xf32, #tpu.memory_space<vmem>>, vector<328x128xf32>,
    %c0_30 = arith.constant 0 : index
    %c23 = arith.constant 23 : index
    %c0_31 = arith.constant 0 : index
    %29 = vector.load %arg1[%c0_30, %c23, %c0_31] : memref<1x376x36xf32, #tpu.memory_space<vmem>>, vector<1x328x36xf32>
    %30 = vector.shape_cast %29 : vector<1x328x36xf32> to vector<328x36xf32>
    %31 = arith.truncf %30 : vector<328x36xf32> to vector<328x36xbf16>
    %c0_32 = arith.constant 0 : index
    %c0_33 = arith.constant 0 : index
    %32 = vector.load %arg6[%c0_32, %c0_33] : memref<328x128xf32, #tpu.memory_space<vmem>>, vector<328x128xf32>
    %c3 = arith.constant 3 : index
    %c0_34 = arith.constant 0 : index
    %c0_35 = arith.constant 0 : index
    %33 = vector.load %arg2[%c3, %c0_34, %c0_35] : memref<9x36x128xbf16, #tpu.memory_space<vmem>>, vector<1x36x128xbf16>
    %34 = vector.shape_cast %33 : vector<1x36x128xbf16> to vector<36x128xbf16>
    %cst_36 = arith.constant dense<0.000000e+00> : vector<328x128xf32>
    %35 = tpu.matmul %31, %34, %cst_36 {dimension_numbers = #tpu.dot_dimension_numbers<[1], [0], [0], [1], [0, 0, 1, 1], [], []>} : vector<328x36xbf16>, vector<36x128xbf16>, vector<328x128xf32> -> vector<328x128xf32>
    %36 = arith.addf %32, %35 : vector<328x128xf32>
    %c0_37 = arith.constant 0 : index
    %c0_38 = arith.constant 0 : index
    %37 = vector.load %arg6[%c0_37, %c0_38] : memref<328x128xf32, #tpu.memory_space<vmem>>, vector<328x128xf32>
    tpu.vector_store %arg6[%c0_37, %c0_38], %36 {strides = array<i32>} : memref<328x128xf32, #tpu.memory_space<vmem>>, vector<328x128xf32>,
    %c0_39 = arith.constant 0 : index
    %c24 = arith.constant 24 : index
    %c0_40 = arith.constant 0 : index
    %38 = vector.load %arg1[%c0_39, %c24, %c0_40] : memref<1x376x36xf32, #tpu.memory_space<vmem>>, vector<1x328x36xf32>
    %39 = vector.shape_cast %38 : vector<1x328x36xf32> to vector<328x36xf32>
    %40 = arith.truncf %39 : vector<328x36xf32> to vector<328x36xbf16>
    %c0_41 = arith.constant 0 : index
    %c0_42 = arith.constant 0 : index
    %41 = vector.load %arg6[%c0_41, %c0_42] : memref<328x128xf32, #tpu.memory_space<vmem>>, vector<328x128xf32>
    %c4 = arith.constant 4 : index
    %c0_43 = arith.constant 0 : index
    %c0_44 = arith.constant 0 : index
    %42 = vector.load %arg2[%c4, %c0_43, %c0_44] : memref<9x36x128xbf16, #tpu.memory_space<vmem>>, vector<1x36x128xbf16>
    %43 = vector.shape_cast %42 : vector<1x36x128xbf16> to vector<36x128xbf16>
    %cst_45 = arith.constant dense<0.000000e+00> : vector<328x128xf32>
    %44 = tpu.matmul %40, %43, %cst_45 {dimension_numbers = #tpu.dot_dimension_numbers<[1], [0], [0], [1], [0, 0, 1, 1], [], []>} : vector<328x36xbf16>, vector<36x128xbf16>, vector<328x128xf32> -> vector<328x128xf32>
    %45 = arith.addf %41, %44 : vector<328x128xf32>
    %c0_46 = arith.constant 0 : index
    %c0_47 = arith.constant 0 : index
    %46 = vector.load %arg6[%c0_46, %c0_47] : memref<328x128xf32, #tpu.memory_space<vmem>>, vector<328x128xf32>
    tpu.vector_store %arg6[%c0_46, %c0_47], %45 {strides = array<i32>} : memref<328x128xf32, #tpu.memory_space<vmem>>, vector<328x128xf32>,
    %c0_48 = arith.constant 0 : index
    %c25 = arith.constant 25 : index
    %c0_49 = arith.constant 0 : index
    %47 = vector.load %arg1[%c0_48, %c25, %c0_49] : memref<1x376x36xf32, #tpu.memory_space<vmem>>, vector<1x328x36xf32>
    %48 = vector.shape_cast %47 : vector<1x328x36xf32> to vector<328x36xf32>
    %49 = arith.truncf %48 : vector<328x36xf32> to vector<328x36xbf16>
    %c0_50 = arith.constant 0 : index
    %c0_51 = arith.constant 0 : index
    %50 = vector.load %arg6[%c0_50, %c0_51] : memref<328x128xf32, #tpu.memory_space<vmem>>, vector<328x128xf32>
    %c5_52 = arith.constant 5 : index
    %c0_53 = arith.constant 0 : index
    %c0_54 = arith.constant 0 : index
    %51 = vector.load %arg2[%c5_52, %c0_53, %c0_54] : memref<9x36x128xbf16, #tpu.memory_space<vmem>>, vector<1x36x128xbf16>
    %52 = vector.shape_cast %51 : vector<1x36x128xbf16> to vector<36x128xbf16>
    %cst_55 = arith.constant dense<0.000000e+00> : vector<328x128xf32>
    %53 = tpu.matmul %49, %52, %cst_55 {dimension_numbers = #tpu.dot_dimension_numbers<[1], [0], [0], [1], [0, 0, 1, 1], [], []>} : vector<328x36xbf16>, vector<36x128xbf16>, vector<328x128xf32> -> vector<328x128xf32>
    %54 = arith.addf %50, %53 : vector<328x128xf32>
    %c0_56 = arith.constant 0 : index
    %c0_57 = arith.constant 0 : index
    %55 = vector.load %arg6[%c0_56, %c0_57] : memref<328x128xf32, #tpu.memory_space<vmem>>, vector<328x128xf32>
    tpu.vector_store %arg6[%c0_56, %c0_57], %54 {strides = array<i32>} : memref<328x128xf32, #tpu.memory_space<vmem>>, vector<328x128xf32>,
    %c0_58 = arith.constant 0 : index
    %c41 = arith.constant 41 : index
    %c0_59 = arith.constant 0 : index
    %56 = vector.load %arg1[%c0_58, %c41, %c0_59] : memref<1x376x36xf32, #tpu.memory_space<vmem>>, vector<1x328x36xf32>
    %57 = vector.shape_cast %56 : vector<1x328x36xf32> to vector<328x36xf32>
    %58 = arith.truncf %57 : vector<328x36xf32> to vector<328x36xbf16>
    %c0_60 = arith.constant 0 : index
    %c0_61 = arith.constant 0 : index
    %59 = vector.load %arg6[%c0_60, %c0_61] : memref<328x128xf32, #tpu.memory_space<vmem>>, vector<328x128xf32>
    %c6_62 = arith.constant 6 : index
    %c0_63 = arith.constant 0 : index
    %c0_64 = arith.constant 0 : index
    %60 = vector.load %arg2[%c6_62, %c0_63, %c0_64] : memref<9x36x128xbf16, #tpu.memory_space<vmem>>, vector<1x36x128xbf16>
    %61 = vector.shape_cast %60 : vector<1x36x128xbf16> to vector<36x128xbf16>
    %cst_65 = arith.constant dense<0.000000e+00> : vector<328x128xf32>
    %62 = tpu.matmul %58, %61, %cst_65 {dimension_numbers = #tpu.dot_dimension_numbers<[1], [0], [0], [1], [0, 0, 1, 1], [], []>} : vector<328x36xbf16>, vector<36x128xbf16>, vector<328x128xf32> -> vector<328x128xf32>
    %63 = arith.addf %59, %62 : vector<328x128xf32>
    %c0_66 = arith.constant 0 : index
    %c0_67 = arith.constant 0 : index
    %64 = vector.load %arg6[%c0_66, %c0_67] : memref<328x128xf32, #tpu.memory_space<vmem>>, vector<328x128xf32>
    tpu.vector_store %arg6[%c0_66, %c0_67], %63 {strides = array<i32>} : memref<328x128xf32, #tpu.memory_space<vmem>>, vector<328x128xf32>,
    %c0_68 = arith.constant 0 : index
    %c42 = arith.constant 42 : index
    %c0_69 = arith.constant 0 : index
    %65 = vector.load %arg1[%c0_68, %c42, %c0_69] : memref<1x376x36xf32, #tpu.memory_space<vmem>>, vector<1x328x36xf32>
    %66 = vector.shape_cast %65 : vector<1x328x36xf32> to vector<328x36xf32>
    %67 = arith.truncf %66 : vector<328x36xf32> to vector<328x36xbf16>
    %c0_70 = arith.constant 0 : index
    %c0_71 = arith.constant 0 : index
    %68 = vector.load %arg6[%c0_70, %c0_71] : memref<328x128xf32, #tpu.memory_space<vmem>>, vector<328x128xf32>
    %c7_72 = arith.constant 7 : index
    %c0_73 = arith.constant 0 : index
    %c0_74 = arith.constant 0 : index
    %69 = vector.load %arg2[%c7_72, %c0_73, %c0_74] : memref<9x36x128xbf16, #tpu.memory_space<vmem>>, vector<1x36x128xbf16>
    %70 = vector.shape_cast %69 : vector<1x36x128xbf16> to vector<36x128xbf16>
    %cst_75 = arith.constant dense<0.000000e+00> : vector<328x128xf32>
    %71 = tpu.matmul %67, %70, %cst_75 {dimension_numbers = #tpu.dot_dimension_numbers<[1], [0], [0], [1], [0, 0, 1, 1], [], []>} : vector<328x36xbf16>, vector<36x128xbf16>, vector<328x128xf32> -> vector<328x128xf32>
    %72 = arith.addf %68, %71 : vector<328x128xf32>
    %c0_76 = arith.constant 0 : index
    %c0_77 = arith.constant 0 : index
    %73 = vector.load %arg6[%c0_76, %c0_77] : memref<328x128xf32, #tpu.memory_space<vmem>>, vector<328x128xf32>
    tpu.vector_store %arg6[%c0_76, %c0_77], %72 {strides = array<i32>} : memref<328x128xf32, #tpu.memory_space<vmem>>, vector<328x128xf32>,
    %c0_78 = arith.constant 0 : index
    %c43 = arith.constant 43 : index
    %c0_79 = arith.constant 0 : index
    %74 = vector.load %arg1[%c0_78, %c43, %c0_79] : memref<1x376x36xf32, #tpu.memory_space<vmem>>, vector<1x328x36xf32>
    %75 = vector.shape_cast %74 : vector<1x328x36xf32> to vector<328x36xf32>
    %76 = arith.truncf %75 : vector<328x36xf32> to vector<328x36xbf16>
    %c0_80 = arith.constant 0 : index
    %c0_81 = arith.constant 0 : index
    %77 = vector.load %arg6[%c0_80, %c0_81] : memref<328x128xf32, #tpu.memory_space<vmem>>, vector<328x128xf32>
    %c8 = arith.constant 8 : index
    %c0_82 = arith.constant 0 : index
    %c0_83 = arith.constant 0 : index
    %78 = vector.load %arg2[%c8, %c0_82, %c0_83] : memref<9x36x128xbf16, #tpu.memory_space<vmem>>, vector<1x36x128xbf16>
    %79 = vector.shape_cast %78 : vector<1x36x128xbf16> to vector<36x128xbf16>
    %cst_84 = arith.constant dense<0.000000e+00> : vector<328x128xf32>
    %80 = tpu.matmul %76, %79, %cst_84 {dimension_numbers = #tpu.dot_dimension_numbers<[1], [0], [0], [1], [0, 0, 1, 1], [], []>} : vector<328x36xbf16>, vector<36x128xbf16>, vector<328x128xf32> -> vector<328x128xf32>
    %81 = arith.addf %77, %80 : vector<328x128xf32>
    %c0_85 = arith.constant 0 : index
    %c0_86 = arith.constant 0 : index
    %82 = vector.load %arg6[%c0_85, %c0_86] : memref<328x128xf32, #tpu.memory_space<vmem>>, vector<328x128xf32>
    tpu.vector_store %arg6[%c0_85, %c0_86], %81 {strides = array<i32>} : memref<328x128xf32, #tpu.memory_space<vmem>>, vector<328x128xf32>,
    %c0_87 = arith.constant 0 : index
    %c0_88 = arith.constant 0 : index
    %83 = vector.load %arg6[%c0_87, %c0_88] : memref<328x128xf32, #tpu.memory_space<vmem>>, vector<328x128xf32>
    %84 = vector.extract_strided_slice %83 {offsets = [0, 0], sizes = [328, 96], strides = [1, 1]} : vector<328x128xf32> to vector<328x96xf32>
    %85 = arith.negf %84 : vector<328x96xf32>
    %86 = math.exp %85 : vector<328x96xf32>
    %cst_89 = arith.constant 1.000000e+00 : f32
    %87 = vector.broadcast %cst_89 : f32 to vector<328x96xf32>
    %88 = arith.addf %87, %86 : vector<328x96xf32>
    %89 = arith.divf %87, %88 : vector<328x96xf32>
    %90 = vector.extract_strided_slice %83 {offsets = [0, 96], sizes = [328, 32], strides = [1, 1]} : vector<328x128xf32> to vector<328x32xf32>
    %91 = math.tanh %90 : vector<328x32xf32>
    %92 = vector.extract_strided_slice %89 {offsets = [0, 0], sizes = [328, 32], strides = [1, 1]} : vector<328x96xf32> to vector<328x32xf32>
    %93 = vector.extract_strided_slice %89 {offsets = [0, 32], sizes = [328, 32], strides = [1, 1]} : vector<328x96xf32> to vector<328x32xf32>
    %94 = vector.extract_strided_slice %89 {offsets = [0, 64], sizes = [328, 32], strides = [1, 1]} : vector<328x96xf32> to vector<328x32xf32>
    %c0_90 = arith.constant 0 : index
    %c0_91 = arith.constant 0 : index
    %c0_92 = arith.constant 0 : index
    %95 = vector.load %arg4[%c0_90, %c0_91, %c0_92] : memref<1x328x32xf32, #tpu.memory_space<vmem>>, vector<1x328x32xf32>
    %96 = vector.shape_cast %95 : vector<1x328x32xf32> to vector<328x32xf32>
    %97 = arith.mulf %93, %96 : vector<328x32xf32>
    %98 = arith.mulf %92, %91 : vector<328x32xf32>
    %99 = arith.addf %97, %98 : vector<328x32xf32>
    %100 = math.tanh %99 : vector<328x32xf32>
    %101 = arith.mulf %94, %100 : vector<328x32xf32>
    %c0_93 = arith.constant 0 : index
    %c0_94 = arith.constant 0 : index
    %c0_95 = arith.constant 0 : index
    %102 = vector.load %arg5[%c0_93, %c0_94, %c0_95] : memref<1x328x64xf32, #tpu.memory_space<vmem>>, vector<1x328x32xf32>
    %103 = vector.shape_cast %102 : vector<1x328x32xf32> to vector<328x32xf32>
    %104 = vector.shape_cast %99 : vector<328x32xf32> to vector<1x328x32xf32>
    tpu.vector_store %arg5[%c0_93, %c0_94, %c0_95], %104 {strides = array<i32>} : memref<1x328x64xf32, #tpu.memory_space<vmem>>, vector<1x328x32xf32>,
    %c0_96 = arith.constant 0 : index
    %c0_97 = arith.constant 0 : index
    %c32 = arith.constant 32 : index
    %105 = vector.load %arg5[%c0_96, %c0_97, %c32] : memref<1x328x64xf32, #tpu.memory_space<vmem>>, vector<1x328x32xf32>
    %106 = vector.shape_cast %105 : vector<1x328x32xf32> to vector<328x32xf32>
    %107 = vector.shape_cast %101 : vector<328x32xf32> to vector<1x328x32xf32>
    tpu.vector_store %arg5[%c0_96, %c0_97, %c32], %107 {strides = array<i32>} : memref<1x328x64xf32, #tpu.memory_space<vmem>>, vector<1x328x32xf32>,
    return
  }
  func.func @transform_0(%arg0: i32) -> (i32, i32, i32) {
    %c0_i32 = arith.constant 0 : i32
    %c0_i32_0 = arith.constant 0 : i32
    %c0_i32_1 = arith.constant 0 : i32
    return %arg0, %c0_i32, %c0_i32_0 : i32, i32, i32
  }
  func.func @transform_1(%arg0: i32) -> (i32, i32, i32) {
    %c0_i32 = arith.constant 0 : i32
    %c0_i32_0 = arith.constant 0 : i32
    %c0_i32_1 = arith.constant 0 : i32
    %c0_i32_2 = arith.constant 0 : i32
    return %c0_i32, %c0_i32_0, %c0_i32_1 : i32, i32, i32
  }
  func.func @transform_2(%arg0: i32) -> (i32, i32) {
    %c0_i32 = arith.constant 0 : i32
    %c0_i32_0 = arith.constant 0 : i32
    %c0_i32_1 = arith.constant 0 : i32
    return %c0_i32, %c0_i32_0 : i32, i32
  }
  func.func @transform_3(%arg0: i32) -> (i32, i32, i32) {
    %c0_i32 = arith.constant 0 : i32
    %c0_i32_0 = arith.constant 0 : i32
    %c0_i32_1 = arith.constant 0 : i32
    return %arg0, %c0_i32, %c0_i32_0 : i32, i32, i32
  }
  func.func @transform_4(%arg0: i32) -> (i32, i32, i32) {
    %c0_i32 = arith.constant 0 : i32
    %c0_i32_0 = arith.constant 0 : i32
    %c0_i32_1 = arith.constant 0 : i32
    return %arg0, %c0_i32, %c0_i32_0 : i32, i32, i32
  }
}

</mosaic_0001>

<bundles_post_ra>
// kernel: conv_lstm_unit.1
= control target key start
LH: loop header
LB: loop body
LE: loop exit
PB: predicated region body
PF: predicated region fallthrough
CT: control target
= control target key end

     0   :  { %s8676_s15 = smov 0   ;;  %s10992_s0 = inlined_call_operand.vmem [shape: f32[2,376,36], index: 0, kind: input, shape index: {}]   ;;  %s10993_s1 = inlined_call_operand.vmem [shape: bf16[9,36,128], index: 1, kind: input, shape index: {}]   ;;  %s10994_s2 = inlined_call_operand.vmem [shape: f32[328,128], index: 2, kind: input, shape index: {}]   ;;  %s10995_s3 = inlined_call_operand.vmem [shape: f32[2,328,32], index: 3, kind: input, shape index: {}]   ;;  %s10996_s4 = inlined_call_operand.vmem [shape: f32[2,328,64], index: 4, kind: output, shape index: {}]  }
   0x1 LB: > { %s6259_s16 = sadd.s32 4294967295, %s8645_s15   ;;  %p6263_p0 = scmp.ge.s32.totalorder %s8645_s15, 1  ;;  %s8645_s15 = sphi %s8676_s15, %s14_s15  }
   0x2   : > { %p172_p1 = scmp.lt.s32.totalorder %s8645_s15, 3 }
   0x4   : > { %p173_p2 = pnand %p6263_p0, %p172_p1 }
   0x6   : > { %176 = sbr.rel (%p173_p2) target bundleno = 1519 (0x5ef), region = 36 }
   0xd   : > { %v8282_v0 = vld [vmem:[%s10993_s1] sm:$0xff]   ;;  %v8647_v1 = vmov 0.0   ;;  %v8283_v2 = vld [vmem:[%s10993_s1 + $0x50] sm:$0xff]   ;;  %v8284_v3 = vld [vmem:[%s10993_s1 + $0x8] sm:$0xff]   ;;  %p203_p3 = scmp.lt.s32.totalorder %s6259_s16, 1  ;;  %vm488_vm0 = vcmask 1041408  }
   0xe   : > { %6782 = vmatprep.subr.bf16.mxu1 %v8647_v1  ;;  %7142 = vmatprep.subr.bf16.mxu0 %v8647_v1  ;;  %v8285_v4 = vld [vmem:[%s10993_s1 + $0x58] sm:$0xff]   ;;  %v8286_v5 = vld [vmem:[%s10993_s1 + $0x10] ss:$0 sps:$4 sm:$0x33]   ;;  %vm8648_vm1 = vmmov 0   ;;  %vm424_vm2 = vcmask 293888  }
   0xf   : > { %6783 = vmatpush3.bf16.msra.mxu1 %v8282_v0  ;;  %7143 = vmatpush3.bf16.msra.mxu0 %v8283_v2  ;;  %v8287_v6 = vld [vmem:[%s10993_s1 + $0x60] ss:$0 sps:$4 sm:$0x33]   ;;  %s11058_s16 = smov (!%p203_p3, %s6259_s16), 1  ;;  %v490_v7 = vsel %vm488_vm0, %v8286_v5, 0  ;;  %v8288_v14 = vld [vmem:[%s10993_s1 + $0x64] sm:$0xff]  }
  0x10   : > { %6784 = vmatprep.subr.bf16.mxu1 %v8647_v1  ;;  %7144 = vmatprep.subr.bf16.mxu0 %v8647_v1  ;;  %s8268_s29 = smul.u32 376, %s11058_s16  ;;  %v8717_v8 = vsel %vm488_vm0, %v8287_v6, 0  ;;  %v8289_v16 = vld [vmem:[%s10993_s1 + $0x14] sm:$0xff]   ;;  %v8290_v21 = vld [vmem:[%s10993_s1 + $0x6c] sm:$0xff]   ;;  %v8292_v28 = vld [vmem:[%s10993_s1 + $0x1c] sm:$0xff]   ;;  %s8649_s11 = smov 32  }
  0x11   : > { %6788 = vmatprep.mubr.msk.bf16.mxu1 %vm8648_vm1, %v8647_v1  ;;  %7148 = vmatprep.mubr.msk.bf16.mxu0 %vm8648_vm1, %v8647_v1  ;;  %v8291_v22 = vld [vmem:[%s10993_s1 + $0x74] ss:$0 sps:$4 sm:$0x33]   ;;  %v8294_v38 = vld [vmem:[%s10993_s1 + $0x24] ss:$0 sps:$4 sm:$0x33]  }
  0x12   : > { %s8722_s6 = scalar_lea.vmem %s10992_s0, %s8268_s29  ;;  %v2850_v25 = vsel %vm488_vm0, %v8291_v22, 0  ;;  %v962_v40 = vsel %vm488_vm0, %v8294_v38, 0  ;;  %s8269_s7 = smul.u32 328, %s11058_s16  ;;  %vm5944_vm3 = vcmask 261120   ;;  %vm6150_vm4 = vcmask 523520  }
  0x13   : > { %6785 = vmatpush3.bf16.msra.mxu1 %v8284_v3  ;;  %7145 = vmatpush3.bf16.msra.mxu0 %v8285_v4  ;;  %v301_v9 = vld [vmem:[%s8722_s6 + $0x5] sm:$0xff]  ;;  %v302_v10 = vld [vmem:[%s8722_s6 + $0xd] sm:$0xff]  ;;  %v2190_v11 = vld [vmem:[%s8722_s6 + $0x18] sm:$0xff]  ;;  %s8650_s29 = smov 96  }
  0x14   : > { %6786 = vmatprep.subr.bf16.mxu1 %v8647_v1  ;;  %7146 = vmatprep.subr.bf16.mxu0 %v8647_v1  ;;  %v342_v12 = vpack.c.bf16 %v302_v10, %v301_v9  ;;  %v2191_v13 = vld [vmem:[%s8722_s6 + $0x20] sm:$0xff]  ;;  %v303_v17 = vld [vmem:[%s8722_s6 + $0x15] sm:$0xff]  ;;  %v2192_v19 = vld [vmem:[%s8722_s6 + $0x28] sm:$0xff]  ;;  %s9660_s10 = scalar_lea.vmem %s10995_s3, %s8269_s7  ;;  %s10674_s8 = scalar_lea.vmem %s10996_s4, %s8269_s7 }
  0x15   : > { %v2231_v15 = vpack.c.bf16 %v2191_v13, %v2190_v11  ;;  %v304_v18 = vld [vmem:[%s8722_s6 + $0x1d] sm:$0xff]  ;;  %v2193_v20 = vld [vmem:[%s8722_s6 + $0x30] sm:$0xff]  ;;  %v305_v26 = vld [vmem:[%s8722_s6 + $0x25] sm:$0xff] }
  0x16   : > { %v343_v23 = vpack.c.bf16 %v304_v18, %v303_v17  ;;  %v2232_v24 = vpack.c.bf16 %v2193_v20, %v2192_v19  ;;  %v306_v27 = vld [vmem:[%s8722_s6 + $0x2d] sm:$0xff]  ;;  %v2194_v29 = vld [vmem:[%s8722_s6 + $0x38] sm:$0xff]  ;;  %v2195_v30 = vld [vmem:[%s8722_s6 + $0x40] sm:$0xff] }
  0x17   : > { %6787 = vmatpush3.bf16.msra.mxu1 %v490_v7  ;;  %7147 = vmatpush3.bf16.msra.mxu0 %v8717_v8  ;;  %v344_v31 = vpack.c.bf16 %v306_v27, %v305_v26  ;;  %v2233_v32 = vpack.c.bf16 %v2195_v30, %v2194_v29  ;;  %v307_v33 = vld [vmem:[%s8722_s6 + $0x35] sm:$0xff]  ;;  %v308_v34 = vld [vmem:[%s8722_s6 + $0x3d] sm:$0xff]  ;;  %v2196_v35 = vld [vmem:[%s8722_s6 + $0x48] sm:$0xff] }
  0x18   : > { %6872 = vmatprep.subr.bf16.mxu1 %v8647_v1  ;;  %7232 = vmatprep.subr.bf16.mxu0 %v8647_v1  ;;  %v2197_v36 = vld [vmem:[%s8722_s6 + $0x50] sm:$0xff]  ;;  %v345_v37 = vpack.c.bf16 %v308_v34, %v307_v33  ;;  %v309_v41 = vld [vmem:[%s8722_s6 + $0x45] sm:$0xff]  ;;  %v2198_v43 = vld [vmem:[%s8722_s6 + $0x58] sm:$0xff] }
  0x19   : > { %v2234_v39 = vpack.c.bf16 %v2197_v36, %v2196_v35  ;;  %v310_v42 = vld [vmem:[%s8722_s6 + $0x4d] sm:$0xff]  ;;  %v2199_v44 = vld [vmem:[%s8722_s6 + $0x60] sm:$0xff]  ;;  %v311_v47 = vld [vmem:[%s8722_s6 + $0x55] sm:$0xff] }
  0x1a   : > { %6789 = vmatmul.mubr.msk.bf16.vlgmr.msra.gmra.mrb[0].mxu1 %vm424_vm2, %v342_v12  ;;  %7149 = vmatmul.mubr.msk.bf16.vlgmr.msra.gmra.mrb[0].mxu0 %vm424_vm2, %v2231_v15  ;;  %v346_v45 = vpack.c.bf16 %v310_v42, %v309_v41  ;;  %v2235_v46 = vpack.c.bf16 %v2199_v44, %v2198_v43  ;;  %v312_v48 = vld [vmem:[%s8722_s6 + $0x5d] sm:$0xff]  ;;  %v2200_v49 = vld [vmem:[%s8722_s6 + $0x68] sm:$0xff]  ;;  %v2201_v50 = vld [vmem:[%s8722_s6 + $0x70] sm:$0xff] }
  0x1b   : > { %6792 = vmatprep.mubr.msk.bf16.mxu1 %vm8648_vm1, %v8647_v1  ;;  %7233 = vmatpush3.bf16.msra.mxu0 %v8288_v14  ;;  %v347_v51 = vpack.c.bf16 %v312_v48, %v311_v47  ;;  %v2236_v52 = vpack.c.bf16 %v2201_v50, %v2200_v49  ;;  %v313_v53 = vld [vmem:[%s8722_s6 + $0x65] sm:$0xff]  ;;  %v314_v54 = vld [vmem:[%s8722_s6 + $0x6d] sm:$0xff]  ;;  %v2202_v55 = vld [vmem:[%s8722_s6 + $0x78] sm:$0xff] }
  0x1c   : > { %7152 = vmatprep.mubr.msk.bf16.mxu0 %vm8648_vm1, %v8647_v1  ;;  %6873 = vmatpush3.bf16.msra.mxu1 %v8289_v16  ;;  %v2203_v56 = vld [vmem:[%s8722_s6 + $0x80] sm:$0xff]  ;;  %v348_v57 = vpack.c.bf16 %v314_v54, %v313_v53  ;;  %v315_v59 = vld [vmem:[%s8722_s6 + $0x75] sm:$0xff]  ;;  %v2204_v61 = vld [vmem:[%s8722_s6 + $0x88] sm:$0xff] }
  0x1d   : > { %7234 = vmatprep.subr.bf16.mxu0 %v8647_v1  ;;  %6874 = vmatprep.subr.bf16.mxu1 %v8647_v1  ;;  %v2237_v58 = vpack.c.bf16 %v2203_v56, %v2202_v55  ;;  %v316_v60 = vld [vmem:[%s8722_s6 + $0x7d] sm:$0xff]  ;;  %v2205_v62 = vld [vmem:[%s8722_s6 + $0x90] sm:$0xff]  ;;  %v317_v2 = vld [vmem:[%s8722_s6 + $0x85] sm:$0xff] }
  0x1e   : > { %v349_v63 = vpack.c.bf16 %v316_v60, %v315_v59  ;;  %v2238_v0 = vpack.c.bf16 %v2205_v62, %v2204_v61  ;;  %v318_v3 = vld [vmem:[%s8722_s6 + $0x8d] sm:$0xff]  ;;  %v2206_v4 = vld [vmem:[%s8722_s6 + $0x98] sm:$0xff]  ;;  %v2207_v5 = vld [vmem:[%s8722_s6 + $0xa0] sm:$0xff] }
  0x1f   : > { %7235 = vmatpush3.bf16.msra.mxu0 %v8290_v21  ;;  %v350_v6 = vpack.c.bf16 %v318_v3, %v317_v2  ;;  %v2239_v7 = vpack.c.bf16 %v2207_v5, %v2206_v4  ;;  %v319_v9 = vld [vmem:[%s8722_s6 + $0x95] sm:$0xff]  ;;  %v320_v10 = vld [vmem:[%s8722_s6 + $0x9d] sm:$0xff]  ;;  %v2208_v11 = vld [vmem:[%s8722_s6 + $0xa8] sm:$0xff] }
  0x20   : > { %7236 = vmatprep.subr.bf16.mxu0 %v8647_v1  ;;  %6875 = vmatpush3.bf16.msra.mxu1 %v8292_v28  ;;  %v2209_v12 = vld [vmem:[%s8722_s6 + $0xb0] sm:$0xff]  ;;  %v351_v13 = vpack.c.bf16 %v320_v10, %v319_v9  ;;  %v321_v15 = vld [vmem:[%s8722_s6 + $0xa5] sm:$0xff]  ;;  %v2210_v17 = vld [vmem:[%s8722_s6 + $0xb8] sm:$0xff] }
  0x21   : > { %6876 = vmatprep.subr.bf16.mxu1 %v8647_v1  ;;  %v2240_v14 = vpack.c.bf16 %v2209_v12, %v2208_v11  ;;  %v322_v16 = vld [vmem:[%s8722_s6 + $0xad] sm:$0xff]  ;;  %v2211_v18 = vld [vmem:[%s8722_s6 + $0xc0] sm:$0xff]  ;;  %v323_v21 = vld [vmem:[%s8722_s6 + $0xb5] sm:$0xff] }
  0x22   : > { %6793 = vmatmul.mubr.msk.bf16.gmra.mrb[4].mxu1 %vm424_vm2, %v343_v23  ;;  %7153 = vmatmul.mubr.msk.bf16.gmra.mrb[4].mxu0 %vm424_vm2, %v2232_v24  ;;  %v352_v19 = vpack.c.bf16 %v322_v16, %v321_v15  ;;  %v2241_v20 = vpack.c.bf16 %v2211_v18, %v2210_v17  ;;  %v324_v22 = vld [vmem:[%s8722_s6 + $0xbd] sm:$0xff]  ;;  %v325_v28 = vld [vmem:[%s8722_s6 + $0xc5] sm:$0xff]  ;;  %v326_v29 = vld [vmem:[%s8722_s6 + $0xcd] sm:$0xff] }
  0x23   : > { %6796 = vmatprep.mubr.msk.bf16.mxu1 %vm8648_vm1, %v8647_v1  ;;  %7156 = vmatprep.mubr.msk.bf16.mxu0 %vm8648_vm1, %v8647_v1  ;;  %v2662_v23 = vld [vmem:[%s8722_s6 + $0x19] sm:$0xff]  ;;  %v2663_v24 = vld [vmem:[%s8722_s6 + $0x21] sm:$0xff]  ;;  %v2664_v30 = vld [vmem:[%s8722_s6 + $0x29] sm:$0xff]  ;;  %v354_v34 = vpack.c.bf16 %v326_v29, %v325_v28 }
  0x24   : > { %7237 = vmatpush3.bf16.msra.mxu0 %v2850_v25  ;;  %6877 = vmatpush3.bf16.msra.mxu1 %v962_v40  ;;  %v353_v25 = vpack.c.bf16 %v324_v22, %v323_v21  ;;  %v2703_v26 = vpack.c.bf16 %v2663_v24, %v2662_v23  ;;  %v8293_v27 = vld [vmem:[%s10993_s1 + $0x78] sm:$0xff]   ;;  %v8297_v33 = vld [vmem:[%s10993_s1 + $0x88] ss:$0 sps:$4 sm:$0x33]   ;;  %v330_v44 = vld [vmem:[%s8722_s6 + $0xed] sm:$0xff] }
  0x25   : > { %7322 = vmatprep.subr.bf16.mxu0 %v8647_v1  ;;  %6962 = vmatprep.subr.bf16.mxu1 %v8647_v1  ;;  %v3322_v36 = vsel %vm488_vm0, %v8297_v33, 0  ;;  %v328_v38 = vld [vmem:[%s8722_s6 + $0xdd] sm:$0xff]  ;;  %v329_v43 = vld [vmem:[%s8722_s6 + $0xe5] sm:$0xff]  ;;  %v331_v49 = vld [vmem:[%s8722_s6 + $0xf5] sm:$0xff] }
  0x26   : > { %v2667_v40 = vld [vmem:[%s8722_s6 + $0x41] sm:$0xff]  ;;  %v356_v47 = vpack.c.bf16 %v330_v44, %v329_v43  ;;  %v334_v56 = vld [vmem:[%s8722_s6 + $0x10d] sm:$0xff]  ;;  %v335_v61 = vld [vmem:[%s8722_s6 + $0x115] sm:$0xff] }
  0x27   : > { %v332_v50 = vld [vmem:[%s8722_s6 + $0xfd] sm:$0xff]  ;;  %v333_v55 = vld [vmem:[%s8722_s6 + $0x105] sm:$0xff]  ;;  %v338_v5 = vld [vmem:[%s8722_s6 + $0x12d] sm:$0xff] }
  0x28   : > { %v357_v53 = vpack.c.bf16 %v332_v50, %v331_v49  ;;  %v358_v59 = vpack.c.bf16 %v334_v56, %v333_v55  ;;  %v336_v62 = vld [vmem:[%s8722_s6 + $0x11d] sm:$0xff]  ;;  %v337_v4 = vld [vmem:[%s8722_s6 + $0x125] sm:$0xff]  ;;  %v339_v11 = vld [vmem:[%s8722_s6 + $0x135] sm:$0xff] }
  0x29   : > { %v359_v2 = vpack.c.bf16 %v336_v62, %v335_v61  ;;  %v360_v9 = vpack.c.bf16 %v338_v5, %v337_v4  ;;  %v340_v12 = vld [vmem:[%s8722_s6 + $0x13d] sm:$0xff]  ;;  %v341_v17 = vld [vmem:[%s8722_s6 + $0x145] sm:$0xff]  ;;  %v775_v23 = vld [vmem:[%s8722_s6 + $0xe] sm:$0xff] }
  0x2a   : > { %6797 = vmatmul.mubr.msk.bf16.gmra.mrb[8].mxu1 %vm424_vm2, %v344_v31  ;;  %7157 = vmatmul.mubr.msk.bf16.gmra.mrb[8].mxu0 %vm424_vm2, %v2233_v32  ;;  %v2665_v31 = vld [vmem:[%s8722_s6 + $0x31] sm:$0xff]  ;;  %v8295_v32 = vld [vmem:[%s10993_s1 + $0x80] sm:$0xff]   ;;  %v361_v15 = vpack.c.bf16 %v340_v12, %v339_v11  ;;  %v2680_v18 = vld [vmem:[%s8722_s6 + $0xa9] sm:$0xff] }
  0x2b   : > { %6800 = vmatprep.mubr.msk.bf16.mxu1 %vm8648_vm1, %v8647_v1  ;;  %7160 = vmatprep.mubr.msk.bf16.mxu0 %vm8648_vm1, %v8647_v1  ;;  %v8887_v35 = vpack.c.bf16 %v2665_v31, %v2664_v30  ;;  %v774_v22 = vld [vmem:[%s8722_s6 + $0x6] sm:$0xff]  ;;  %v2682_v24 = vld [vmem:[%s8722_s6 + $0xb9] sm:$0xff]  ;;  %v8298_v33 = vld [vmem:[%s10993_s1 + $0x30] sm:$0xff]  }
  0x2c   : > { %v8296_v28 = vld [vmem:[%s10993_s1 + $0x28] sm:$0xff]   ;;  %v776_v29 = vld [vmem:[%s8722_s6 + $0x16] sm:$0xff]  ;;  %v777_v30 = vld [vmem:[%s8722_s6 + $0x1e] sm:$0xff] }
  0x2d   : > { %v2684_v31 = vld [vmem:[%s8722_s6 + $0xc9] sm:$0xff]  ;;  %v2687_v43 = vld [vmem:[%s8722_s6 + $0xe1] sm:$0xff]  ;;  %v2689_v50 = vld [vmem:[%s8722_s6 + $0xf1] sm:$0xff] }
  0x2e   : > { %v2688_v49 = vld [vmem:[%s8722_s6 + $0xe9] sm:$0xff]  ;;  %v2690_v56 = vld [vmem:[%s8722_s6 + $0xf9] sm:$0xff] }
  0x2f   : > { %v783_v55 = vld [vmem:[%s8722_s6 + $0x4e] sm:$0xff]  ;;  %v784_v61 = vld [vmem:[%s8722_s6 + $0x56] sm:$0xff]  ;;  %v785_v62 = vld [vmem:[%s8722_s6 + $0x5e] sm:$0xff] }
  0x30   : > { %v786_v5 = vld [vmem:[%s8722_s6 + $0x66] sm:$0xff] }
  0x32   : > { %6801 = vmatmul.mubr.msk.bf16.gmra.mrb[12].mxu1 %vm424_vm2, %v345_v37  ;;  %7161 = vmatmul.mubr.msk.bf16.gmra.mrb[12].mxu0 %vm424_vm2, %v2234_v39  ;;  %v327_v37 = vld [vmem:[%s8722_s6 + $0xd5] sm:$0xff] }
  0x33   : > { %6804 = vmatprep.mubr.msk.bf16.mxu1 %vm8648_vm1, %v8647_v1  ;;  %7164 = vmatprep.mubr.msk.bf16.mxu0 %vm8648_vm1, %v8647_v1  ;;  %v2666_v39 = vld [vmem:[%s8722_s6 + $0x39] sm:$0xff]  ;;  %v355_v41 = vpack.c.bf16 %v328_v38, %v327_v37 }
  0x34   : > { %v8903_v42 = vpack.c.bf16 %v2667_v40, %v2666_v39  ;;  %v778_v39 = vld [vmem:[%s8722_s6 + $0x26] sm:$0xff]  ;;  %v779_v40 = vld [vmem:[%s8722_s6 + $0x2e] sm:$0xff] }
  0x35   : > { %v817_v44 = vpack.c.bf16 %v779_v40, %v778_v39 }
  0x3a   : > { %6805 = vmatmul.mubr.msk.bf16.gmra.mrb[16].mxu1 %vm424_vm2, %v346_v45  ;;  %7165 = vmatmul.mubr.msk.bf16.gmra.mrb[16].mxu0 %vm424_vm2, %v2235_v46  ;;  %v2668_v45 = vld [vmem:[%s8722_s6 + $0x49] sm:$0xff]  ;;  %v2669_v46 = vld [vmem:[%s8722_s6 + $0x51] sm:$0xff] }
  0x3b   : > { %6808 = vmatprep.mubr.msk.bf16.mxu1 %vm8648_vm1, %v8647_v1  ;;  %7168 = vmatprep.mubr.msk.bf16.mxu0 %vm8648_vm1, %v8647_v1  ;;  %v8916_v48 = vpack.c.bf16 %v2669_v46, %v2668_v45  ;;  %v780_v46 = vld [vmem:[%s8722_s6 + $0x36] sm:$0xff] }
  0x42   : > { %6809 = vmatmul.mubr.msk.bf16.gmra.mrb[20].mxu1 %vm424_vm2, %v347_v51  ;;  %7169 = vmatmul.mubr.msk.bf16.gmra.mrb[20].mxu0 %vm424_vm2, %v2236_v52  ;;  %v2670_v51 = vld [vmem:[%s8722_s6 + $0x59] sm:$0xff]  ;;  %v2671_v52 = vld [vmem:[%s8722_s6 + $0x61] sm:$0xff] }
  0x43   : > { %6812 = vmatprep.mubr.msk.bf16.mxu1 %vm8648_vm1, %v8647_v1  ;;  %7172 = vmatprep.mubr.msk.bf16.mxu0 %vm8648_vm1, %v8647_v1  ;;  %v8929_v54 = vpack.c.bf16 %v2671_v52, %v2670_v51  ;;  %v9058_v52 = vpack.c.bf16 %v2689_v50, %v2688_v49  ;;  %v799_v49 = vld [vmem:[%s8722_s6 + $0xce] sm:$0xff] }
  0x44   : > { %v8301_v50 = vld [vmem:[%s10993_s1 + $0x94] sm:$0xff]  }
  0x4a   : > { %6813 = vmatmul.mubr.msk.bf16.gmra.mrb[24].mxu1 %vm424_vm2, %v348_v57  ;;  %7173 = vmatmul.mubr.msk.bf16.gmra.mrb[24].mxu0 %vm424_vm2, %v2237_v58  ;;  %v2672_v57 = vld [vmem:[%s8722_s6 + $0x69] sm:$0xff]  ;;  %v2673_v58 = vld [vmem:[%s8722_s6 + $0x71] sm:$0xff] }
  0x4b   : > { %6816 = vmatprep.mubr.msk.bf16.mxu1 %vm8648_vm1, %v8647_v1  ;;  %7176 = vmatprep.mubr.msk.bf16.mxu0 %vm8648_vm1, %v8647_v1  ;;  %v8942_v60 = vpack.c.bf16 %v2673_v58, %v2672_v57  ;;  %v2691_v57 = vld [vmem:[%s8722_s6 + $0x101] sm:$0xff] }
  0x52   : > { %6817 = vmatmul.mubr.msk.bf16.gmra.mrb[28].mxu1 %vm424_vm2, %v349_v63  ;;  %7177 = vmatmul.mubr.msk.bf16.gmra.mrb[28].mxu0 %vm424_vm2, %v2238_v0  ;;  %v2674_v63 = vld [vmem:[%s8722_s6 + $0x79] sm:$0xff]  ;;  %v2675_v0 = vld [vmem:[%s8722_s6 + $0x81] sm:$0xff] }
  0x53   : > { %6820 = vmatprep.mubr.msk.bf16.mxu1 %vm8648_vm1, %v8647_v1  ;;  %7180 = vmatprep.mubr.msk.bf16.mxu0 %vm8648_vm1, %v8647_v1  ;;  %v8955_v3 = vpack.c.bf16 %v2675_v0, %v2674_v63  ;;  %v2692_v63 = vld [vmem:[%s8722_s6 + $0x109] sm:$0xff]  ;;  %v2693_v0 = vld [vmem:[%s8722_s6 + $0x111] sm:$0xff] }
  0x54   : > { %v9084_v4 = vpack.c.bf16 %v2693_v0, %v2692_v63  ;;  %v807_v0 = vld [vmem:[%s8722_s6 + $0x10e] sm:$0xff] }
  0x5a   : > { %6821 = vmatmul.mubr.msk.bf16.gmra.mrb[32].mxu1 %vm424_vm2, %v350_v6  ;;  %7181 = vmatmul.mubr.msk.bf16.gmra.mrb[32].mxu0 %vm424_vm2, %v2239_v7  ;;  %v2676_v6 = vld [vmem:[%s8722_s6 + $0x89] sm:$0xff]  ;;  %v2677_v7 = vld [vmem:[%s8722_s6 + $0x91] sm:$0xff] }
  0x5b   : > { %6824 = vmatprep.mubr.msk.bf16.mxu1 %vm8648_vm1, %v8647_v1  ;;  %7184 = vmatprep.mubr.msk.bf16.mxu0 %vm8648_vm1, %v8647_v1  ;;  %v8968_v10 = vpack.c.bf16 %v2677_v7, %v2676_v6  ;;  %v787_v6 = vld [vmem:[%s8722_s6 + $0x6e] sm:$0xff]  ;;  %v2694_v7 = vld [vmem:[%s8722_s6 + $0x119] sm:$0xff] }
  0x5c   : > { %v821_v11 = vpack.c.bf16 %v787_v6, %v786_v5  ;;  %v809_v5 = vld [vmem:[%s8722_s6 + $0x11e] sm:$0xff] }
  0x62   : > { %6825 = vmatmul.mubr.msk.bf16.gmra.mrb[36].mxu1 %vm424_vm2, %v351_v13  ;;  %7185 = vmatmul.mubr.msk.bf16.gmra.mrb[36].mxu0 %vm424_vm2, %v2240_v14  ;;  %v2678_v13 = vld [vmem:[%s8722_s6 + $0x99] sm:$0xff]  ;;  %v2679_v14 = vld [vmem:[%s8722_s6 + $0xa1] sm:$0xff] }
  0x63   : > { %6828 = vmatprep.mubr.msk.bf16.mxu1 %vm8648_vm1, %v8647_v1  ;;  %7188 = vmatprep.mubr.msk.bf16.mxu0 %vm8648_vm1, %v8647_v1  ;;  %v8981_v16 = vpack.c.bf16 %v2679_v14, %v2678_v13  ;;  %v788_v13 = vld [vmem:[%s8722_s6 + $0x76] sm:$0xff]  ;;  %v789_v14 = vld [vmem:[%s8722_s6 + $0x7e] sm:$0xff] }
  0x6a   : > { %6829 = vmatmul.mubr.msk.bf16.gmra.mrb[40].mxu1 %vm424_vm2, %v352_v19  ;;  %7189 = vmatmul.mubr.msk.bf16.gmra.mrb[40].mxu0 %vm424_vm2, %v2241_v20  ;;  %v2681_v19 = vld [vmem:[%s8722_s6 + $0xb1] sm:$0xff]  ;;  %v362_v20 = vpack.c.bf16 %v341_v17, %v341_v17 }
  0x6b   : > { %6832 = vmatprep.mubr.msk.bf16.mxu1 %vm8648_vm1, %v8647_v1  ;;  %7238 = vmatprep.mubr.msk.bf16.mxu0 %vm8648_vm1, %v8647_v1  ;;  %v8993_v21 = vpack.c.bf16 %v2681_v19, %v2680_v18  ;;  %v2697_v17 = vld [vmem:[%s8722_s6 + $0x131] sm:$0xff]  ;;  %v822_v18 = vpack.c.bf16 %v789_v14, %v788_v13 }
  0x72   : > { %6833 = vmatmul.mubr.msk.bf16.gmra.mrb[44].mxu1 %vm424_vm2, %v353_v25  ;;  %7239 = vmatmul.mubr.msk.bf16.vlgmr.msra.gmra.mrb[0].mxu0 %vm424_vm2, %v2703_v26  ;;  %v2683_v25 = vld [vmem:[%s8722_s6 + $0xc1] sm:$0xff]  ;;  %v815_v26 = vpack.c.bf16 %v775_v23, %v774_v22  ;;  %v791_v22 = vld [vmem:[%s8722_s6 + $0x8e] sm:$0xff]  ;;  %v2698_v23 = vld [vmem:[%s8722_s6 + $0x139] sm:$0xff] }
  0x73   : > { %6836 = vmatprep.mubr.msk.bf16.mxu1 %vm8648_vm1, %v8647_v1  ;;  %7323 = vmatpush3.bf16.msra.mxu0 %v8293_v27  ;;  %v9006_v27 = vpack.c.bf16 %v2683_v25, %v2682_v24  ;;  %v2699_v24 = vld [vmem:[%s8722_s6 + $0x141] sm:$0xff] }
  0x74   : > { %7242 = vmatprep.mubr.msk.bf16.mxu0 %vm8648_vm1, %v8647_v1  ;;  %7324 = vmatprep.subr.bf16.mxu0 %v8647_v1 }
  0x77   : > { %7325 = vmatpush3.bf16.msra.mxu0 %v8295_v32  ;;  %v2685_v32 = vld [vmem:[%s8722_s6 + $0xd1] sm:$0xff] }
  0x78   : > { %7326 = vmatprep.subr.bf16.mxu0 %v8647_v1  ;;  %v9029_v37 = vpack.c.bf16 %v2685_v32, %v2684_v31  ;;  %v2701_v31 = vld [vmem:[%s8722_s6 + $0x151] sm:$0xff] }
  0x7a   : > { %6837 = vmatmul.mubr.msk.bf16.gmra.mrb[48].mxu1 %vm424_vm2, %v354_v34  ;;  %7243 = vmatmul.mubr.msk.bf16.gmra.mrb[4].mxu0 %vm424_vm2, %v8887_v35  ;;  %v8300_v34 = vld [vmem:[%s10993_s1 + $0x38] ss:$0 sps:$4 sm:$0x33]  }
  0x7b   : > { %6840 = vmatprep.mubr.msk.bf16.mxu1 %vm8648_vm1, %v8647_v1  ;;  %7246 = vmatprep.mubr.msk.bf16.mxu0 %vm8648_vm1, %v8647_v1  ;;  %v1434_v38 = vsel %vm488_vm0, %v8300_v34, 0  ;;  %v794_v34 = vld [vmem:[%s8722_s6 + $0xa6] sm:$0xff] }
  0x7c   : > { %7327 = vmatpush3.bf16.msra.mxu0 %v3322_v36  ;;  %v816_v36 = vpack.c.bf16 %v777_v30, %v776_v29  ;;  %v793_v29 = vld [vmem:[%s8722_s6 + $0x9e] sm:$0xff]  ;;  %v2700_v30 = vld [vmem:[%s8722_s6 + $0x149] sm:$0xff] }
  0x7d   : > { %7412 = vmatprep.subr.bf16.mxu0 %v8647_v1 }
  0x82   : > { %6841 = vmatmul.mubr.msk.bf16.gmra.mrb[52].mxu1 %vm424_vm2, %v355_v41  ;;  %7247 = vmatmul.mubr.msk.bf16.gmra.mrb[8].mxu0 %vm424_vm2, %v8903_v42  ;;  %v2686_v41 = vld [vmem:[%s8722_s6 + $0xd9] sm:$0xff] }
  0x83   : > { %6844 = vmatprep.mubr.msk.bf16.mxu1 %vm8648_vm1, %v8647_v1  ;;  %7250 = vmatprep.mubr.msk.bf16.mxu0 %vm8648_vm1, %v8647_v1  ;;  %v9045_v45 = vpack.c.bf16 %v2687_v43, %v2686_v41  ;;  %v796_v41 = vld [vmem:[%s8722_s6 + $0xb6] sm:$0xff]  ;;  %v797_v43 = vld [vmem:[%s8722_s6 + $0xbe] sm:$0xff] }
  0x8a   : > { %6845 = vmatmul.mubr.msk.bf16.gmra.mrb[56].mxu1 %vm424_vm2, %v356_v47  ;;  %7251 = vmatmul.mubr.msk.bf16.gmra.mrb[12].mxu0 %vm424_vm2, %v8916_v48  ;;  %v781_v47 = vld [vmem:[%s8722_s6 + $0x3e] sm:$0xff] }
  0x8b   : > { %6848 = vmatprep.mubr.msk.bf16.mxu1 %vm8648_vm1, %v8647_v1  ;;  %7254 = vmatprep.mubr.msk.bf16.mxu0 %vm8648_vm1, %v8647_v1  ;;  %v818_v51 = vpack.c.bf16 %v781_v47, %v780_v46  ;;  %v8299_v46 = vld [vmem:[%s10993_s1 + $0x8c] sm:$0xff]  }
  0x8c   : > { %v798_v47 = vld [vmem:[%s8722_s6 + $0xc6] sm:$0xff] }
  0x92   : > { %6849 = vmatmul.mubr.msk.bf16.gmra.mrb[60].mxu1 %vm424_vm2, %v357_v53  ;;  %7255 = vmatmul.mubr.msk.bf16.gmra.mrb[16].mxu0 %vm424_vm2, %v8929_v54  ;;  %v782_v53 = vld [vmem:[%s8722_s6 + $0x46] sm:$0xff] }
  0x93   : > { %6852 = vmatprep.mubr.msk.bf16.mxu1 %vm8648_vm1, %v8647_v1  ;;  %7258 = vmatprep.mubr.msk.bf16.mxu0 %vm8648_vm1, %v8647_v1  ;;  %v819_v58 = vpack.c.bf16 %v783_v55, %v782_v53  ;;  %v800_v55 = vld [vmem:[%s8722_s6 + $0xd6] sm:$0xff] }
  0x9a   : > { %6853 = vmatmul.mubr.msk.bf16.gmra.mrb[64].mxu1 %vm424_vm2, %v358_v59  ;;  %7259 = vmatmul.mubr.msk.bf16.gmra.mrb[20].mxu0 %vm424_vm2, %v8942_v60  ;;  %v9071_v59 = vpack.c.bf16 %v2691_v57, %v2690_v56  ;;  %v801_v56 = vld [vmem:[%s8722_s6 + $0xde] sm:$0xff] }
  0x9b   : > { %6856 = vmatprep.mubr.msk.bf16.mxu1 %vm8648_vm1, %v8647_v1  ;;  %7262 = vmatprep.mubr.msk.bf16.mxu0 %vm8648_vm1, %v8647_v1  ;;  %v828_v57 = vpack.c.bf16 %v801_v56, %v800_v55  ;;  %v3174_v55 = vld [vmem:[%s8722_s6 + $0x169] sm:$0xff] }
  0xa2   : > { %6857 = vmatmul.mubr.msk.bf16.gmra.mrb[68].mxu1 %vm424_vm2, %v359_v2  ;;  %7263 = vmatmul.mubr.msk.bf16.gmra.mrb[24].mxu0 %vm424_vm2, %v8955_v3  ;;  %v820_v2 = vpack.c.bf16 %v785_v62, %v784_v61  ;;  %v805_v62 = vld [vmem:[%s8722_s6 + $0xfe] sm:$0xff] }
  0xa3   : > { %6860 = vmatprep.mubr.msk.bf16.mxu1 %vm8648_vm1, %v8647_v1  ;;  %7266 = vmatprep.mubr.msk.bf16.mxu0 %vm8648_vm1, %v8647_v1 }
  0xaa   : > { %6861 = vmatmul.mubr.msk.bf16.gmra.mrb[72].mxu1 %vm424_vm2, %v360_v9  ;;  %7267 = vmatmul.mubr.msk.bf16.gmra.mrb[28].mxu0 %vm424_vm2, %v8968_v10  ;;  %v2695_v9 = vld [vmem:[%s8722_s6 + $0x121] sm:$0xff] }
  0xab   : > { %6864 = vmatprep.mubr.msk.bf16.mxu1 %vm8648_vm1, %v8647_v1  ;;  %7270 = vmatprep.mubr.msk.bf16.mxu0 %vm8648_vm1, %v8647_v1  ;;  %v9097_v12 = vpack.c.bf16 %v2695_v9, %v2694_v7  ;;  %v811_v7 = vld [vmem:[%s8722_s6 + $0x12e] sm:$0xff] }
  0xb2   : > { %6865 = vmatmul.mubr.msk.bf16.gmra.mrb[76].mxu1 %vm424_vm2, %v361_v15  ;;  %7271 = vmatmul.mubr.msk.bf16.gmra.mrb[32].mxu0 %vm424_vm2, %v8981_v16  ;;  %v2696_v15 = vld [vmem:[%s8722_s6 + $0x129] sm:$0xff] }
  0xb3   : > { %6868 = vmatprep.mubr.msk.bf16.mxu1 %vm8648_vm1, %v8647_v1  ;;  %7274 = vmatprep.mubr.msk.bf16.mxu0 %vm8648_vm1, %v8647_v1  ;;  %v9110_v19 = vpack.c.bf16 %v2697_v17, %v2696_v15  ;;  %v1246_v15 = vld [vmem:[%s8722_s6 + $0x7] sm:$0xff] }
  0xba   : > { %6869 = vmatmul.mubr.msk.bf16.gmra.mrb[80].mxu1 %vm424_vm2, %v362_v20  ;;  %7275 = vmatmul.mubr.msk.bf16.gmra.mrb[36].mxu0 %vm424_vm2, %v8993_v21  ;;  %v790_v20 = vld [vmem:[%s8722_s6 + $0x86] sm:$0xff] }
  0xbb   : > { %6878 = vmatprep.mubr.msk.bf16.mxu1 %vm8648_vm1, %v8647_v1  ;;  %7278 = vmatprep.mubr.msk.bf16.mxu0 %vm8648_vm1, %v8647_v1  ;;  %v823_v25 = vpack.c.bf16 %v791_v22, %v790_v20  ;;  %v1249_v20 = vld [vmem:[%s8722_s6 + $0x1f] sm:$0xff] }
  0xbc   : > { %v8304_v22 = vld [vmem:[%s10993_s1 + $0x44] sm:$0xff]  }
  0xc2   : > { %6879 = vmatmul.mubr.msk.bf16.vlgmr.msra.gmra.mrb[0].mxu1 %vm424_vm2, %v815_v26  ;;  %7279 = vmatmul.mubr.msk.bf16.gmra.mrb[40].mxu0 %vm424_vm2, %v9006_v27  ;;  %v9123_v26 = vpack.c.bf16 %v2699_v24, %v2698_v23 }
  0xc3   : > { %6882 = vmatprep.mubr.msk.bf16.mxu1 %vm8648_vm1, %v8647_v1  ;;  %7282 = vmatprep.mubr.msk.bf16.mxu0 %vm8648_vm1, %v8647_v1 }
  0xc4   : > { %6963 = vmatpush3.bf16.msra.mxu1 %v8296_v28  ;;  %v792_v28 = vld [vmem:[%s8722_s6 + $0x96] sm:$0xff] }
  0xc5   : > { %6964 = vmatprep.subr.bf16.mxu1 %v8647_v1  ;;  %v824_v32 = vpack.c.bf16 %v793_v29, %v792_v28  ;;  %v1251_v28 = vld [vmem:[%s8722_s6 + $0x2f] sm:$0xff] }
  0xc8   : > { %6965 = vmatpush3.bf16.msra.mxu1 %v8298_v33  ;;  %v9136_v33 = vpack.c.bf16 %v2701_v31, %v2700_v30  ;;  %v1253_v30 = vld [vmem:[%s8722_s6 + $0x3f] sm:$0xff] }
  0xc9   : > { %6966 = vmatprep.subr.bf16.mxu1 %v8647_v1 }
  0xca   : > { %6883 = vmatmul.mubr.msk.bf16.gmra.mrb[4].mxu1 %vm424_vm2, %v816_v36  ;;  %7283 = vmatmul.mubr.msk.bf16.gmra.mrb[44].mxu0 %vm424_vm2, %v9029_v37  ;;  %v795_v36 = vld [vmem:[%s8722_s6 + $0xae] sm:$0xff] }
  0xcb   : > { %6886 = vmatprep.mubr.msk.bf16.mxu1 %vm8648_vm1, %v8647_v1  ;;  %7286 = vmatprep.mubr.msk.bf16.mxu0 %vm8648_vm1, %v8647_v1  ;;  %v825_v39 = vpack.c.bf16 %v795_v36, %v794_v34  ;;  %v1257_v36 = vld [vmem:[%s8722_s6 + $0x5f] sm:$0xff] }
  0xcc   : > { %6967 = vmatpush3.bf16.msra.mxu1 %v1434_v38  ;;  %v9148_v38 = vld [vmem:[%s8722_s6 + $0x159] sm:$0xff] }
  0xcd   : > { %7052 = vmatprep.subr.bf16.mxu1 %v8647_v1  ;;  %v2723_v40 = vpack.c.bf16 %v9148_v38, %v9148_v38 }
  0xd2   : > { %6887 = vmatmul.mubr.msk.bf16.gmra.mrb[8].mxu1 %vm424_vm2, %v817_v44  ;;  %7287 = vmatmul.mubr.msk.bf16.gmra.mrb[48].mxu0 %vm424_vm2, %v9045_v45  ;;  %v826_v44 = vpack.c.bf16 %v797_v43, %v796_v41  ;;  %v1261_v43 = vld [vmem:[%s8722_s6 + $0x7f] sm:$0xff] }
  0xd3   : > { %6890 = vmatprep.mubr.msk.bf16.mxu1 %vm8648_vm1, %v8647_v1  ;;  %7290 = vmatprep.mubr.msk.bf16.mxu0 %vm8648_vm1, %v8647_v1 }
  0xda   : > { %6891 = vmatmul.mubr.msk.bf16.gmra.mrb[12].mxu1 %vm424_vm2, %v818_v51  ;;  %7291 = vmatmul.mubr.msk.bf16.gmra.mrb[52].mxu0 %vm424_vm2, %v9058_v52  ;;  %v827_v51 = vpack.c.bf16 %v799_v49, %v798_v47  ;;  %v1265_v49 = vld [vmem:[%s8722_s6 + $0x9f] sm:$0xff] }
  0xdb   : > { %6894 = vmatprep.mubr.msk.bf16.mxu1 %vm8648_vm1, %v8647_v1  ;;  %7294 = vmatprep.mubr.msk.bf16.mxu0 %vm8648_vm1, %v8647_v1 }
  0xe2   : > { %6895 = vmatmul.mubr.msk.bf16.gmra.mrb[16].mxu1 %vm424_vm2, %v819_v58  ;;  %7295 = vmatmul.mubr.msk.bf16.gmra.mrb[56].mxu0 %vm424_vm2, %v9071_v59  ;;  %v803_v58 = vld [vmem:[%s8722_s6 + $0xee] sm:$0xff] }
  0xe3   : > { %6898 = vmatprep.mubr.msk.bf16.mxu1 %vm8648_vm1, %v8647_v1  ;;  %7298 = vmatprep.mubr.msk.bf16.mxu0 %vm8648_vm1, %v8647_v1 }
  0xea   : > { %6899 = vmatmul.mubr.msk.bf16.gmra.mrb[20].mxu1 %vm424_vm2, %v820_v2  ;;  %7299 = vmatmul.mubr.msk.bf16.gmra.mrb[60].mxu0 %vm424_vm2, %v9084_v4 }
  0xeb   : > { %6902 = vmatprep.mubr.msk.bf16.mxu1 %vm8648_vm1, %v8647_v1  ;;  %7302 = vmatprep.mubr.msk.bf16.mxu0 %vm8648_vm1, %v8647_v1 }
  0xf2   : > { %6903 = vmatmul.mubr.msk.bf16.gmra.mrb[24].mxu1 %vm424_vm2, %v821_v11  ;;  %7303 = vmatmul.mubr.msk.bf16.gmra.mrb[64].mxu0 %vm424_vm2, %v9097_v12  ;;  %v813_v11 = vld [vmem:[%s8722_s6 + $0x13e] sm:$0xff] }
  0xf3   : > { %6906 = vmatprep.mubr.msk.bf16.mxu1 %vm8648_vm1, %v8647_v1  ;;  %7306 = vmatprep.mubr.msk.bf16.mxu0 %vm8648_vm1, %v8647_v1 }
  0xfa   : > { %6907 = vmatmul.mubr.msk.bf16.gmra.mrb[28].mxu1 %vm424_vm2, %v822_v18  ;;  %7307 = vmatmul.mubr.msk.bf16.gmra.mrb[68].mxu0 %vm424_vm2, %v9110_v19  ;;  %v8302_v18 = vld [vmem:[%s10993_s1 + $0x3c] sm:$0xff]  }
  0xfb   : > { %6910 = vmatprep.mubr.msk.bf16.mxu1 %vm8648_vm1, %v8647_v1  ;;  %7310 = vmatprep.mubr.msk.bf16.mxu0 %vm8648_vm1, %v8647_v1 }
 0x102   : > { %6911 = vmatmul.mubr.msk.bf16.gmra.mrb[32].mxu1 %vm424_vm2, %v823_v25  ;;  %7311 = vmatmul.mubr.msk.bf16.gmra.mrb[72].mxu0 %vm424_vm2, %v9123_v26  ;;  %v1250_v25 = vld [vmem:[%s8722_s6 + $0x27] sm:$0xff] }
 0x103   : > { %6914 = vmatprep.mubr.msk.bf16.mxu1 %vm8648_vm1, %v8647_v1  ;;  %7314 = vmatprep.mubr.msk.bf16.mxu0 %vm8648_vm1, %v8647_v1  ;;  %v9296_v29 = vpack.c.bf16 %v1251_v28, %v1250_v25  ;;  %v3614_v25 = vld [vmem:[%s8722_s6 + $0x6a] sm:$0xff]  ;;  %v3615_v28 = vld [vmem:[%s8722_s6 + $0x72] sm:$0xff] }
 0x10a   : > { %6915 = vmatmul.mubr.msk.bf16.gmra.mrb[36].mxu1 %vm424_vm2, %v824_v32  ;;  %7315 = vmatmul.mubr.msk.bf16.gmra.mrb[76].mxu0 %vm424_vm2, %v9136_v33  ;;  %v1255_v32 = vld [vmem:[%s8722_s6 + $0x4f] sm:$0xff] }
 0x10b   : > { %6918 = vmatprep.mubr.msk.bf16.mxu1 %vm8648_vm1, %v8647_v1  ;;  %7318 = vmatprep.mubr.msk.bf16.mxu0 %vm8648_vm1, %v8647_v1 }
 0x112   : > { %6919 = vmatmul.mubr.msk.bf16.gmra.mrb[40].mxu1 %vm424_vm2, %v825_v39  ;;  %7319 = vmatmul.mubr.msk.bf16.gmra.mrb[80].mxu0 %vm424_vm2, %v2723_v40  ;;  %v1259_v40 = vld [vmem:[%s8722_s6 + $0x6f] sm:$0xff] }
 0x113   : > { %6922 = vmatprep.mubr.msk.bf16.mxu1 %vm8648_vm1, %v8647_v1  ;;  %7328 = vmatprep.mubr.msk.bf16.mxu0 %vm8648_vm1, %v8647_v1 }
 0x11a   : > { %6923 = vmatmul.mubr.msk.bf16.gmra.mrb[44].mxu1 %vm424_vm2, %v826_v44  ;;  %7329 = vmatmul.mubr.msk.bf16.vlgmr.msra.gmra.mrb[0].mxu0 %vm424_vm2, %v8887_v35  ;;  %v8303_v35 = vld [vmem:[%s10993_s1 + $0x9c] ss:$0 sps:$4 sm:$0x33]  }
 0x11b   : > { %6926 = vmatprep.mubr.msk.bf16.mxu1 %vm8648_vm1, %v8647_v1  ;;  %7413 = vmatpush3.bf16.msra.mxu0 %v8299_v46  ;;  %v3794_v53 = vsel %vm488_vm0, %v8303_v35, 0  ;;  %v1263_v46 = vld [vmem:[%s8722_s6 + $0x8f] sm:$0xff] }
 0x11c   : > { %7332 = vmatprep.mubr.msk.bf16.mxu0 %vm8648_vm1, %v8647_v1  ;;  %7414 = vmatprep.subr.bf16.mxu0 %v8647_v1 }
 0x11f   : > { %7415 = vmatpush3.bf16.msra.mxu0 %v8301_v50  ;;  %v3173_v50 = vld [vmem:[%s8722_s6 + $0x161] sm:$0xff] }
 0x120   : > { %7416 = vmatprep.subr.bf16.mxu0 %v8647_v1 }
 0x122   : > { %6927 = vmatmul.mubr.msk.bf16.gmra.mrb[48].mxu1 %vm424_vm2, %v827_v51  ;;  %7333 = vmatmul.mubr.msk.bf16.gmra.mrb[4].mxu0 %vm424_vm2, %v8903_v42  ;;  %v802_v42 = vld [vmem:[%s8722_s6 + $0xe6] sm:$0xff]  ;;  %v3194_v51 = vpack.c.bf16 %v3173_v50, %v9148_v38  ;;  %v3195_v38 = vpack.c.bf16 %v3174_v55, %v3174_v55 }
 0x123   : > { %6930 = vmatprep.mubr.msk.bf16.mxu1 %vm8648_vm1, %v8647_v1  ;;  %7336 = vmatprep.mubr.msk.bf16.mxu0 %vm8648_vm1, %v8647_v1  ;;  %v829_v61 = vpack.c.bf16 %v803_v58, %v802_v42  ;;  %v1269_v42 = vld [vmem:[%s8722_s6 + $0xbf] sm:$0xff]  ;;  %v3606_v58 = vld [vmem:[%s8722_s6 + $0x2a] sm:$0xff] }
 0x124   : > { %7417 = vmatpush3.bf16.msra.mxu0 %v3794_v53  ;;  %v1267_v53 = vld [vmem:[%s8722_s6 + $0xaf] sm:$0xff]  ;;  %v1282_v50 = vld [vmem:[%s8722_s6 + $0x127] sm:$0xff] }
 0x125   : > { %7502 = vmatprep.subr.bf16.mxu0 %v8647_v1 }
 0x12a   : > { %6931 = vmatmul.mubr.msk.bf16.gmra.mrb[52].mxu1 %vm424_vm2, %v828_v57  ;;  %7337 = vmatmul.mubr.msk.bf16.gmra.mrb[8].mxu0 %vm424_vm2, %v8916_v48  ;;  %v804_v48 = vld [vmem:[%s8722_s6 + $0xf6] sm:$0xff] }
 0x12b   : > { %6934 = vmatprep.mubr.msk.bf16.mxu1 %vm8648_vm1, %v8647_v1  ;;  %7340 = vmatprep.mubr.msk.bf16.mxu0 %vm8648_vm1, %v8647_v1  ;;  %v830_v63 = vpack.c.bf16 %v805_v62, %v804_v48  ;;  %v1268_v57 = vld [vmem:[%s8722_s6 + $0xb7] sm:$0xff] }
 0x12c   : > { %v9407_v48 = vpack.c.bf16 %v1269_v42, %v1268_v57  ;;  %v1284_v57 = vld [vmem:[%s8722_s6 + $0x137] sm:$0xff]  ;;  %v1285_v42 = vld [vmem:[%s8722_s6 + $0x13f] sm:$0xff] }
 0x132   : > { %6935 = vmatmul.mubr.msk.bf16.gmra.mrb[56].mxu1 %vm424_vm2, %v829_v61  ;;  %7341 = vmatmul.mubr.msk.bf16.gmra.mrb[12].mxu0 %vm424_vm2, %v8929_v54  ;;  %v806_v54 = vld [vmem:[%s8722_s6 + $0x106] sm:$0xff]  ;;  %v3607_v61 = vld [vmem:[%s8722_s6 + $0x32] sm:$0xff] }
 0x133   : > { %6938 = vmatprep.mubr.msk.bf16.mxu1 %vm8648_vm1, %v8647_v1  ;;  %7344 = vmatprep.mubr.msk.bf16.mxu0 %vm8648_vm1, %v8647_v1  ;;  %v831_v2 = vpack.c.bf16 %v807_v0, %v806_v54  ;;  %v3647_v62 = vpack.c.bf16 %v3607_v61, %v3606_v58  ;;  %v1270_v54 = vld [vmem:[%s8722_s6 + $0xc7] sm:$0xff]  ;;  %v1271_v0 = vld [vmem:[%s8722_s6 + $0xcf] sm:$0xff] }
 0x134   : > { %v3622_v58 = vld [vmem:[%s8722_s6 + $0xaa] sm:$0xff]  ;;  %v3623_v61 = vld [vmem:[%s8722_s6 + $0xb2] sm:$0xff] }
 0x13a   : > { %6939 = vmatmul.mubr.msk.bf16.gmra.mrb[60].mxu1 %vm424_vm2, %v830_v63  ;;  %7345 = vmatmul.mubr.msk.bf16.gmra.mrb[16].mxu0 %vm424_vm2, %v8942_v60  ;;  %v808_v60 = vld [vmem:[%s8722_s6 + $0x116] sm:$0xff]  ;;  %v8305_v63 = vld [vmem:[%s10993_s1 + $0xa0] sm:$0xff]  }
 0x13b   : > { %6942 = vmatprep.mubr.msk.bf16.mxu1 %vm8648_vm1, %v8647_v1  ;;  %7348 = vmatprep.mubr.msk.bf16.mxu0 %vm8648_vm1, %v8647_v1  ;;  %v832_v6 = vpack.c.bf16 %v809_v5, %v808_v60  ;;  %v3609_v60 = vld [vmem:[%s8722_s6 + $0x42] sm:$0xff] }
 0x13c   : > { %v8307_v5 = vld [vmem:[%s10993_s1 + $0xa8] sm:$0xff]  }
 0x142   : > { %6943 = vmatmul.mubr.msk.bf16.gmra.mrb[64].mxu1 %vm424_vm2, %v831_v2  ;;  %7349 = vmatmul.mubr.msk.bf16.gmra.mrb[20].mxu0 %vm424_vm2, %v8955_v3  ;;  %v810_v3 = vld [vmem:[%s8722_s6 + $0x126] sm:$0xff]  ;;  %v3608_v2 = vld [vmem:[%s8722_s6 + $0x3a] sm:$0xff] }
 0x143   : > { %6946 = vmatprep.mubr.msk.bf16.mxu1 %vm8648_vm1, %v8647_v1  ;;  %7352 = vmatprep.mubr.msk.bf16.mxu0 %vm8648_vm1, %v8647_v1  ;;  %v833_v9 = vpack.c.bf16 %v811_v7, %v810_v3  ;;  %v9430_v3 = vpack.c.bf16 %v1271_v0, %v1270_v54  ;;  %v3648_v7 = vpack.c.bf16 %v3609_v60, %v3608_v2  ;;  %v9531_v54 = vld [vmem:[%s8722_s6 + $0x147] sm:$0xff]  ;;  %v3624_v0 = vld [vmem:[%s8722_s6 + $0xba] sm:$0xff] }
 0x144   : > { %v3625_v2 = vld [vmem:[%s8722_s6 + $0xc2] sm:$0xff]  ;;  %v1307_v60 = vpack.c.bf16 %v9531_v54, %v9531_v54 }
 0x14a   : > { %6947 = vmatmul.mubr.msk.bf16.gmra.mrb[68].mxu1 %vm424_vm2, %v832_v6  ;;  %7353 = vmatmul.mubr.msk.bf16.gmra.mrb[24].mxu0 %vm424_vm2, %v8968_v10  ;;  %v812_v10 = vld [vmem:[%s8722_s6 + $0x136] sm:$0xff]  ;;  %v8308_v6 = vld [vmem:[%s10993_s1 + $0xb0] ss:$0 sps:$4 sm:$0x33]  }
 0x14b   : > { %6950 = vmatprep.mubr.msk.bf16.mxu1 %vm8648_vm1, %v8647_v1  ;;  %7356 = vmatprep.mubr.msk.bf16.mxu0 %vm8648_vm1, %v8647_v1  ;;  %v834_v13 = vpack.c.bf16 %v813_v11, %v812_v10  ;;  %v1272_v10 = vld [vmem:[%s8722_s6 + $0xd7] sm:$0xff]  ;;  %v1273_v11 = vld [vmem:[%s8722_s6 + $0xdf] sm:$0xff] }
 0x152   : > { %6951 = vmatmul.mubr.msk.bf16.gmra.mrb[72].mxu1 %vm424_vm2, %v833_v9  ;;  %7357 = vmatmul.mubr.msk.bf16.gmra.mrb[28].mxu0 %vm424_vm2, %v8981_v16  ;;  %v814_v16 = vld [vmem:[%s8722_s6 + $0x146] sm:$0xff]  ;;  %v4266_v9 = vsel %vm488_vm0, %v8308_v6, 0 }
 0x153   : > { %6954 = vmatprep.mubr.msk.bf16.mxu1 %vm8648_vm1, %v8647_v1  ;;  %7360 = vmatprep.mubr.msk.bf16.mxu0 %vm8648_vm1, %v8647_v1  ;;  %v835_v14 = vpack.c.bf16 %v814_v16, %v814_v16  ;;  %v3611_v16 = vld [vmem:[%s8722_s6 + $0x52] sm:$0xff]  ;;  %v3626_v6 = vld [vmem:[%s8722_s6 + $0xca] sm:$0xff] }
 0x15a   : > { %6955 = vmatmul.mubr.msk.bf16.gmra.mrb[76].mxu1 %vm424_vm2, %v834_v13  ;;  %7361 = vmatmul.mubr.msk.bf16.gmra.mrb[32].mxu0 %vm424_vm2, %v8993_v21  ;;  %v1247_v21 = vld [vmem:[%s8722_s6 + $0xf] sm:$0xff] }
 0x15b   : > { %6958 = vmatprep.mubr.msk.bf16.mxu1 %vm8648_vm1, %v8647_v1  ;;  %7364 = vmatprep.mubr.msk.bf16.mxu0 %vm8648_vm1, %v8647_v1  ;;  %v1287_v17 = vpack.c.bf16 %v1247_v21, %v1246_v15  ;;  %v3610_v13 = vld [vmem:[%s8722_s6 + $0x4a] sm:$0xff] }
 0x15c   : > { %v3649_v15 = vpack.c.bf16 %v3611_v16, %v3610_v13  ;;  %v1274_v21 = vld [vmem:[%s8722_s6 + $0xe7] sm:$0xff]  ;;  %v8638_v16 = vld [vmem:[%s10993_s1 + $0x58] sm:$0xff]  }
 0x15d   : > { %v3629_v13 = vld [vmem:[%s8722_s6 + $0xe2] sm:$0xff] }
 0x162   : > { %6959 = vmatmul.mubr.msk.bf16.gmra.mrb[80].mxu1 %vm424_vm2, %v835_v14  ;;  %7365 = vmatmul.mubr.msk.bf16.gmra.mrb[36].mxu0 %vm424_vm2, %v9006_v27  ;;  %v1248_v27 = vld [vmem:[%s8722_s6 + $0x17] sm:$0xff]  ;;  %v9445_v14 = vpack.c.bf16 %v1273_v11, %v1272_v10 }
 0x163   : > { %6968 = vmatprep.mubr.msk.bf16.mxu1 %vm8648_vm1, %v8647_v1  ;;  %7368 = vmatprep.mubr.msk.bf16.mxu0 %vm8648_vm1, %v8647_v1  ;;  %v9281_v23 = vpack.c.bf16 %v1249_v20, %v1248_v27  ;;  %v3613_v27 = vld [vmem:[%s8722_s6 + $0x62] sm:$0xff]  ;;  %v8637_v10 = vld [vmem:[%s10993_s1 + $0x50] sm:$0xff]   ;;  %v3628_v11 = vld [vmem:[%s8722_s6 + $0xda] sm:$0xff] }
 0x16a   : > { %6969 = vmatmul.mubr.msk.bf16.vlgmr.msra.gmra.mrb[0].mxu1 %vm424_vm2, %v1287_v17  ;;  %7369 = vmatmul.mubr.msk.bf16.gmra.mrb[40].mxu0 %vm424_vm2, %v9029_v37  ;;  %v8306_v37 = vld [vmem:[%s10993_s1 + $0x4c] ss:$0 sps:$4 sm:$0x33]   ;;  %v1275_v17 = vld [vmem:[%s8722_s6 + $0xef] sm:$0xff] }
 0x16b   : > { %6972 = vmatprep.mubr.msk.bf16.mxu1 %vm8648_vm1, %v8647_v1  ;;  %7372 = vmatprep.mubr.msk.bf16.mxu0 %vm8648_vm1, %v8647_v1  ;;  %v1906_v24 = vsel %vm488_vm0, %v8306_v37, 0  ;;  %v9458_v20 = vpack.c.bf16 %v1275_v17, %v1274_v21  ;;  %v1276_v37 = vld [vmem:[%s8722_s6 + $0xf7] sm:$0xff] }
 0x16c   : > { %7053 = vmatpush3.bf16.msra.mxu1 %v8302_v18  ;;  %v3612_v18 = vld [vmem:[%s8722_s6 + $0x5a] sm:$0xff]  ;;  %v3631_v21 = vld [vmem:[%s8722_s6 + $0xf2] sm:$0xff] }
 0x16d   : > { %7054 = vmatprep.subr.bf16.mxu1 %v8647_v1 }
 0x170   : > { %7055 = vmatpush3.bf16.msra.mxu1 %v8304_v22  ;;  %v3650_v22 = vpack.c.bf16 %v3613_v27, %v3612_v18  ;;  %v3633_v18 = vld [vmem:[%s8722_s6 + $0x102] sm:$0xff] }
 0x171   : > { %7056 = vmatprep.subr.bf16.mxu1 %v8647_v1 }
 0x172   : > { %6973 = vmatmul.mubr.msk.bf16.gmra.mrb[4].mxu1 %vm424_vm2, %v9281_v23  ;;  %7373 = vmatmul.mubr.msk.bf16.gmra.mrb[44].mxu0 %vm424_vm2, %v9045_v45  ;;  %v1252_v45 = vld [vmem:[%s8722_s6 + $0x37] sm:$0xff] }
 0x173   : > { %6976 = vmatprep.mubr.msk.bf16.mxu1 %vm8648_vm1, %v8647_v1  ;;  %7376 = vmatprep.mubr.msk.bf16.mxu0 %vm8648_vm1, %v8647_v1  ;;  %v9308_v31 = vpack.c.bf16 %v1253_v30, %v1252_v45  ;;  %v3651_v30 = vpack.c.bf16 %v3615_v28, %v3614_v25  ;;  %v3639_v25 = vld [vmem:[%s8722_s6 + $0x132] sm:$0xff] }
 0x174   : > { %7057 = vmatpush3.bf16.msra.mxu1 %v1906_v24  ;;  %v1277_v24 = vld [vmem:[%s8722_s6 + $0xff] sm:$0xff] }
 0x175   : > { %7592 = vmatprep.subr.bf16.mxu1 %v8647_v1  ;;  %v9471_v45 = vpack.c.bf16 %v1277_v24, %v1276_v37  ;;  %v3637_v37 = vld [vmem:[%s8722_s6 + $0x122] sm:$0xff] }
 0x17a   : > { %6977 = vmatmul.mubr.msk.bf16.gmra.mrb[8].mxu1 %vm424_vm2, %v9296_v29  ;;  %7377 = vmatmul.mubr.msk.bf16.gmra.mrb[48].mxu0 %vm424_vm2, %v9058_v52  ;;  %v1254_v52 = vld [vmem:[%s8722_s6 + $0x47] sm:$0xff] }
 0x17b   : > { %6980 = vmatprep.mubr.msk.bf16.mxu1 %vm8648_vm1, %v8647_v1  ;;  %7380 = vmatprep.mubr.msk.bf16.mxu0 %vm8648_vm1, %v8647_v1  ;;  %v9320_v34 = vpack.c.bf16 %v1255_v32, %v1254_v52  ;;  %v1278_v52 = vld [vmem:[%s8722_s6 + $0x107] sm:$0xff]  ;;  %v1279_v32 = vld [vmem:[%s8722_s6 + $0x10f] sm:$0xff] }
 0x182   : > { %6981 = vmatmul.mubr.msk.bf16.gmra.mrb[12].mxu1 %vm424_vm2, %v9308_v31  ;;  %7381 = vmatmul.mubr.msk.bf16.gmra.mrb[52].mxu0 %vm424_vm2, %v9071_v59  ;;  %v1256_v59 = vld [vmem:[%s8722_s6 + $0x57] sm:$0xff] }
 0x183   : > { %6984 = vmatprep.mubr.msk.bf16.mxu1 %vm8648_vm1, %v8647_v1  ;;  %7384 = vmatprep.mubr.msk.bf16.mxu0 %vm8648_vm1, %v8647_v1  ;;  %v9332_v39 = vpack.c.bf16 %v1257_v36, %v1256_v59  ;;  %v3616_v59 = vld [vmem:[%s8722_s6 + $0x7a] sm:$0xff]  ;;  %v3617_v36 = vld [vmem:[%s8722_s6 + $0x82] sm:$0xff] }
 0x18a   : > { %6985 = vmatmul.mubr.msk.bf16.gmra.mrb[16].mxu1 %vm424_vm2, %v9320_v34  ;;  %7385 = vmatmul.mubr.msk.bf16.gmra.mrb[56].mxu0 %vm424_vm2, %v9084_v4  ;;  %v1258_v4 = vld [vmem:[%s8722_s6 + $0x67] sm:$0xff] }
 0x18b   : > { %6988 = vmatprep.mubr.msk.bf16.mxu1 %vm8648_vm1, %v8647_v1  ;;  %7388 = vmatprep.mubr.msk.bf16.mxu0 %vm8648_vm1, %v8647_v1  ;;  %v9344_v41 = vpack.c.bf16 %v1259_v40, %v1258_v4  ;;  %v9484_v4 = vpack.c.bf16 %v1279_v32, %v1278_v52  ;;  %v3652_v40 = vpack.c.bf16 %v3617_v36, %v3616_v59  ;;  %v3643_v32 = vld [vmem:[%s8722_s6 + $0x152] sm:$0xff]  ;;  %v3645_v36 = vld [vmem:[%s8722_s6 + $0x162] sm:$0xff] }
 0x192   : > { %6989 = vmatmul.mubr.msk.bf16.gmra.mrb[20].mxu1 %vm424_vm2, %v9332_v39  ;;  %7389 = vmatmul.mubr.msk.bf16.gmra.mrb[60].mxu0 %vm424_vm2, %v9097_v12  ;;  %v1260_v12 = vld [vmem:[%s8722_s6 + $0x77] sm:$0xff] }
 0x193   : > { %6992 = vmatprep.mubr.msk.bf16.mxu1 %vm8648_vm1, %v8647_v1  ;;  %7392 = vmatprep.mubr.msk.bf16.mxu0 %vm8648_vm1, %v8647_v1  ;;  %v9356_v44 = vpack.c.bf16 %v1261_v43, %v1260_v12  ;;  %v1280_v12 = vld [vmem:[%s8722_s6 + $0x117] sm:$0xff]  ;;  %v1281_v43 = vld [vmem:[%s8722_s6 + $0x11f] sm:$0xff] }
 0x19a   : > { %6993 = vmatmul.mubr.msk.bf16.gmra.mrb[24].mxu1 %vm424_vm2, %v9344_v41  ;;  %7393 = vmatmul.mubr.msk.bf16.gmra.mrb[64].mxu0 %vm424_vm2, %v9110_v19  ;;  %v1262_v19 = vld [vmem:[%s8722_s6 + $0x87] sm:$0xff] }
 0x19b   : > { %6996 = vmatprep.mubr.msk.bf16.mxu1 %vm8648_vm1, %v8647_v1  ;;  %7396 = vmatprep.mubr.msk.bf16.mxu0 %vm8648_vm1, %v8647_v1  ;;  %v9368_v47 = vpack.c.bf16 %v1263_v46, %v1262_v19  ;;  %v3618_v19 = vld [vmem:[%s8722_s6 + $0x8a] sm:$0xff]  ;;  %v3619_v46 = vld [vmem:[%s8722_s6 + $0x92] sm:$0xff] }
 0x1a2   : > { %6997 = vmatmul.mubr.msk.bf16.gmra.mrb[28].mxu1 %vm424_vm2, %v9356_v44  ;;  %7397 = vmatmul.mubr.msk.bf16.gmra.mrb[68].mxu0 %vm424_vm2, %v9123_v26  ;;  %v1264_v26 = vld [vmem:[%s8722_s6 + $0x97] sm:$0xff] }
 0x1a3   : > { %7000 = vmatprep.mubr.msk.bf16.mxu1 %vm8648_vm1, %v8647_v1  ;;  %7400 = vmatprep.mubr.msk.bf16.mxu0 %vm8648_vm1, %v8647_v1  ;;  %v9381_v35 = vpack.c.bf16 %v1265_v49, %v1264_v26  ;;  %v9497_v26 = vpack.c.bf16 %v1281_v43, %v1280_v12  ;;  %v3653_v49 = vpack.c.bf16 %v3619_v46, %v3618_v19  ;;  %v4079_v43 = vld [vmem:[%s8722_s6 + $0x33] sm:$0xff]  ;;  %v4879_v46 = vld [vmem:[%s9660_s10 + $0x8] sm:$0xff] }
 0x1aa   : > { %7001 = vmatmul.mubr.msk.bf16.gmra.mrb[32].mxu1 %vm424_vm2, %v9368_v47  ;;  %7401 = vmatmul.mubr.msk.bf16.gmra.mrb[72].mxu0 %vm424_vm2, %v9136_v33  ;;  %v1266_v33 = vld [vmem:[%s8722_s6 + $0xa7] sm:$0xff] }
 0x1ab   : > { %7004 = vmatprep.mubr.msk.bf16.mxu1 %vm8648_vm1, %v8647_v1  ;;  %7404 = vmatprep.mubr.msk.bf16.mxu0 %vm8648_vm1, %v8647_v1  ;;  %v9394_v56 = vpack.c.bf16 %v1267_v53, %v1266_v33  ;;  %v3620_v33 = vld [vmem:[%s8722_s6 + $0x9a] sm:$0xff]  ;;  %v3621_v53 = vld [vmem:[%s8722_s6 + $0xa2] sm:$0xff] }
 0x1b2   : > { %7005 = vmatmul.mubr.msk.bf16.gmra.mrb[36].mxu1 %vm424_vm2, %v9381_v35  ;;  %7405 = vmatmul.mubr.msk.bf16.gmra.mrb[76].mxu0 %vm424_vm2, %v3194_v51  ;;  %v1283_v51 = vld [vmem:[%s8722_s6 + $0x12f] sm:$0xff] }
 0x1b3   : > { %7008 = vmatprep.mubr.msk.bf16.mxu1 %vm8648_vm1, %v8647_v1  ;;  %7408 = vmatprep.mubr.msk.bf16.mxu0 %vm8648_vm1, %v8647_v1  ;;  %v9510_v55 = vpack.c.bf16 %v1283_v51, %v1282_v50  ;;  %v4080_v50 = vld [vmem:[%s8722_s6 + $0x3b] sm:$0xff]  ;;  %v4081_v51 = vld [vmem:[%s8722_s6 + $0x43] sm:$0xff] }
 0x1ba   : > { %7009 = vmatmul.mubr.msk.bf16.gmra.mrb[40].mxu1 %vm424_vm2, %v9394_v56  ;;  %7409 = vmatmul.mubr.msk.bf16.gmra.mrb[80].mxu0 %vm424_vm2, %v3195_v38  ;;  %v3654_v38 = vpack.c.bf16 %v3621_v53, %v3620_v33  ;;  %v4881_v33 = vld [vmem:[%s9660_s10 + $0x18] sm:$0xff]  ;;  %v4082_v53 = vld [vmem:[%s8722_s6 + $0x4b] sm:$0xff] }
 0x1bb   : > { %7012 = vmatprep.mubr.msk.bf16.mxu1 %vm8648_vm1, %v8647_v1  ;;  %7418 = vmatprep.mubr.msk.bf16.mxu0 %vm8648_vm1, %v8647_v1 }
 0x1c2   : > { %7013 = vmatmul.mubr.msk.bf16.gmra.mrb[44].mxu1 %vm424_vm2, %v9407_v48  ;;  %7419 = vmatmul.mubr.msk.bf16.vlgmr.msra.gmra.mrb[0].mxu0 %vm424_vm2, %v3647_v62  ;;  %v9523_v62 = vpack.c.bf16 %v1285_v42, %v1284_v57  ;;  %v4882_v57 = vld [vmem:[%s9660_s10 + $0x20] sm:$0xff] }
 0x1c3   : > { %7016 = vmatprep.mubr.msk.bf16.mxu1 %vm8648_vm1, %v8647_v1  ;;  %7503 = vmatpush3.bf16.msra.mxu0 %v8305_v63  ;;  %v3655_v63 = vpack.c.bf16 %v3623_v61, %v3622_v58  ;;  %v4883_v58 = vld [vmem:[%s9660_s10 + $0x28] sm:$0xff] }
 0x1c4   : > { %7422 = vmatprep.mubr.msk.bf16.mxu0 %vm8648_vm1, %v8647_v1  ;;  %7504 = vmatprep.subr.bf16.mxu0 %v8647_v1  ;;  %v4085_v61 = vld [vmem:[%s8722_s6 + $0x63] sm:$0xff] }
 0x1c7   : > { %7505 = vmatpush3.bf16.msra.mxu0 %v8307_v5  ;;  %v3656_v5 = vpack.c.bf16 %v3625_v2, %v3624_v0  ;;  %v4885_v2 = vld [vmem:[%s9660_s10 + $0x38] sm:$0xff] }
 0x1c8   : > { %7506 = vmatprep.subr.bf16.mxu0 %v8647_v1 }
 0x1ca   : > { %7017 = vmatmul.mubr.msk.bf16.gmra.mrb[48].mxu1 %vm424_vm2, %v9430_v3  ;;  %7423 = vmatmul.mubr.msk.bf16.gmra.mrb[4].mxu0 %vm424_vm2, %v3648_v7  ;;  %v3627_v7 = vld [vmem:[%s8722_s6 + $0xd2] sm:$0xff] }
 0x1cb   : > { %7020 = vmatprep.mubr.msk.bf16.mxu1 %vm8648_vm1, %v8647_v1  ;;  %7426 = vmatprep.mubr.msk.bf16.mxu0 %vm8648_vm1, %v8647_v1 }
 0x1cc   : > { %7507 = vmatpush3.bf16.msra.mxu0 %v4266_v9  ;;  %v3657_v9 = vpack.c.bf16 %v3627_v7, %v3626_v6  ;;  %v4888_v7 = vld [vmem:[%s9660_s10 + $0x50] sm:$0xff] }
 0x1d2   : > { %7021 = vmatmul.mubr.msk.bf16.gmra.mrb[52].mxu1 %vm424_vm2, %v9445_v14  ;;  %7427 = vmatmul.mubr.msk.bf16.gmra.mrb[8].mxu0 %vm424_vm2, %v3649_v15  ;;  %v3630_v15 = vld [vmem:[%s8722_s6 + $0xea] sm:$0xff] }
 0x1d3   : > { %7024 = vmatprep.mubr.msk.bf16.mxu1 %vm8648_vm1, %v8647_v1  ;;  %7430 = vmatprep.mubr.msk.bf16.mxu0 %vm8648_vm1, %v8647_v1  ;;  %v3659_v17 = vpack.c.bf16 %v3631_v21, %v3630_v15  ;;  %v4090_v15 = vld [vmem:[%s8722_s6 + $0x8b] sm:$0xff]  ;;  %v4091_v21 = vld [vmem:[%s8722_s6 + $0x93] sm:$0xff] }
 0x1da   : > { %7025 = vmatmul.mubr.msk.bf16.gmra.mrb[56].mxu1 %vm424_vm2, %v9458_v20  ;;  %7431 = vmatmul.mubr.msk.bf16.gmra.mrb[12].mxu0 %vm424_vm2, %v3650_v22 }
 0x1db   : > { %7028 = vmatprep.mubr.msk.bf16.mxu1 %vm8648_vm1, %v8647_v1  ;;  %7434 = vmatprep.mubr.msk.bf16.mxu0 %vm8648_vm1, %v8647_v1 }
 0x1e2   : > { %7029 = vmatmul.mubr.msk.bf16.gmra.mrb[60].mxu1 %vm424_vm2, %v9471_v45  ;;  %7435 = vmatmul.mubr.msk.bf16.gmra.mrb[16].mxu0 %vm424_vm2, %v3651_v30  ;;  %v3641_v30 = vld [vmem:[%s8722_s6 + $0x142] sm:$0xff] }
 0x1e3   : > { %7032 = vmatprep.mubr.msk.bf16.mxu1 %vm8648_vm1, %v8647_v1  ;;  %7438 = vmatprep.mubr.msk.bf16.mxu0 %vm8648_vm1, %v8647_v1 }
 0x1ea   : > { %7033 = vmatmul.mubr.msk.bf16.gmra.mrb[64].mxu1 %vm424_vm2, %v9484_v4  ;;  %7439 = vmatmul.mubr.msk.bf16.gmra.mrb[20].mxu0 %vm424_vm2, %v3652_v40 }
 0x1eb   : > { %7036 = vmatprep.mubr.msk.bf16.mxu1 %vm8648_vm1, %v8647_v1  ;;  %7442 = vmatprep.mubr.msk.bf16.mxu0 %vm8648_vm1, %v8647_v1 }
 0x1f2   : > { %7037 = vmatmul.mubr.msk.bf16.gmra.mrb[68].mxu1 %vm424_vm2, %v9497_v26  ;;  %7443 = vmatmul.mubr.msk.bf16.gmra.mrb[24].mxu0 %vm424_vm2, %v3653_v49  ;;  %v4880_v49 = vld [vmem:[%s9660_s10 + $0x10] sm:$0xff] }
 0x1f3   : > { %7040 = vmatprep.mubr.msk.bf16.mxu1 %vm8648_vm1, %v8647_v1  ;;  %7446 = vmatprep.mubr.msk.bf16.mxu0 %vm8648_vm1, %v8647_v1 }
 0x1f4   : > { %4964 = vrot.lane.b32.xlu1 %v4880_v49, %s8649_s11  ;;  %v4099_v49 = vld [vmem:[%s8722_s6 + $0xd3] sm:$0xff] }
 0x1f8   : > { %4966 = vrot.lane.b32.xlu1 %v4881_v33, %s8649_s11  ;;  %v4910_v33 = vld [vmem:[%s9660_s10 + $0x100] sm:$0xff] }
 0x1fa   : > { %7041 = vmatmul.mubr.msk.bf16.gmra.mrb[72].mxu1 %vm424_vm2, %v9510_v55  ;;  %7447 = vmatmul.mubr.msk.bf16.gmra.mrb[28].mxu0 %vm424_vm2, %v3654_v38  ;;  %v4083_v38 = vld [vmem:[%s8722_s6 + $0x53] sm:$0xff] }
 0x1fb   : > { %7044 = vmatprep.mubr.msk.bf16.mxu1 %vm8648_vm1, %v8647_v1  ;;  %7450 = vmatprep.mubr.msk.bf16.mxu0 %vm8648_vm1, %v8647_v1  ;;  %v4121_v42 = vpack.c.bf16 %v4083_v38, %v4082_v53  ;;  %v4911_v53 = vld [vmem:[%s9660_s10 + $0x108] sm:$0xff]  ;;  %v4912_v38 = vld [vmem:[%s9660_s10 + $0x110] sm:$0xff] }
 0x1fc   : > { %4970 = vrot.lane.b32.xlu1 %v4883_v58, %s8649_s11  ;;  %v4100_v58 = vld [vmem:[%s8722_s6 + $0xdb] sm:$0xff] }
 0x200   : > { %4974 = vrot.lane.b32.xlu1 %v4885_v2, %s8649_s11  ;;  %v4914_v2 = vld [vmem:[%s9660_s10 + $0x120] sm:$0xff] }
 0x202   : > { %7045 = vmatmul.mubr.msk.bf16.gmra.mrb[76].mxu1 %vm424_vm2, %v9523_v62  ;;  %7451 = vmatmul.mubr.msk.bf16.gmra.mrb[32].mxu0 %vm424_vm2, %v3655_v63  ;;  %v4884_v63 = vld [vmem:[%s9660_s10 + $0x30] sm:$0xff] }
 0x203   : > { %7048 = vmatprep.mubr.msk.bf16.mxu1 %vm8648_vm1, %v8647_v1  ;;  %7454 = vmatprep.mubr.msk.bf16.mxu0 %vm8648_vm1, %v8647_v1 }
 0x20a   : > { %7049 = vmatmul.mubr.msk.bf16.gmra.mrb[80].mxu1 %vm424_vm2, %v1307_v60  ;;  %7455 = vmatmul.mubr.msk.bf16.gmra.mrb[36].mxu0 %vm424_vm2, %v3656_v5  ;;  %v4087_v60 = vld [vmem:[%s8722_s6 + $0x73] sm:$0xff]  ;;  %v4886_v5 = vld [vmem:[%s9660_s10 + $0x40] sm:$0xff] }
 0x20b   : > { %7058 = vmatprep.mubr.msk.bf16.mxu1 %vm8648_vm1, %v8647_v1  ;;  %7458 = vmatprep.mubr.msk.bf16.mxu0 %vm8648_vm1, %v8647_v1 }
 0x212   : > { %7059 = vmatmul.mubr.msk.bf16.vlgmr.msra.gmra.mrb[0].mxu1 %vm424_vm2, %v9281_v23  ;;  %7459 = vmatmul.mubr.msk.bf16.gmra.mrb[40].mxu0 %vm424_vm2, %v3657_v9  ;;  %v3658_v23 = vpack.c.bf16 %v3629_v13, %v3628_v11  ;;  %v4088_v9 = vld [vmem:[%s8722_s6 + $0x7b] sm:$0xff] }
 0x213   : > { %7062 = vmatprep.mubr.msk.bf16.mxu1 %vm8648_vm1, %v8647_v1  ;;  %7462 = vmatprep.mubr.msk.bf16.mxu0 %vm8648_vm1, %v8647_v1  ;;  %v4889_v11 = vld [vmem:[%s9660_s10 + $0x58] sm:$0xff] }
 0x214   : > { %7595 = vmatpush3.bf16.msra.mxu1 %v8637_v10  ;;  %v4089_v10 = vld [vmem:[%s8722_s6 + $0x83] sm:$0xff] }
 0x215   : > { %7593 = vmatprep.subr.bf16.mxu1 %v8647_v1  ;;  %v4124_v13 = vpack.c.bf16 %v4089_v10, %v4088_v9  ;;  %v4916_v9 = vld [vmem:[%s9660_s10 + $0x130] sm:$0xff] }
 0x218   : > { %7596 = vmatpush3.bf16.msra.mxu1 %v8638_v16  ;;  %v4892_v16 = vld [vmem:[%s9660_s10 + $0x70] sm:$0xff] }
 0x219   : > { %7594 = vmatprep.subr.bf16.mxu1 %v8647_v1 }
 0x21a   : > { %7063 = vmatmul.mubr.msk.bf16.gmra.mrb[4].mxu1 %vm424_vm2, %v9296_v29  ;;  %7463 = vmatmul.mubr.msk.bf16.gmra.mrb[44].mxu0 %vm424_vm2, %v3658_v23  ;;  %v3632_v29 = vld [vmem:[%s8722_s6 + $0xfa] sm:$0xff]  ;;  %v4891_v23 = vld [vmem:[%s9660_s10 + $0x68] sm:$0xff] }
 0x21b   : > { %7066 = vmatprep.mubr.msk.bf16.mxu1 %vm8648_vm1, %v8647_v1  ;;  %7466 = vmatprep.mubr.msk.bf16.mxu0 %vm8648_vm1, %v8647_v1  ;;  %v3660_v27 = vpack.c.bf16 %v3633_v18, %v3632_v29  ;;  %v4894_v29 = vld [vmem:[%s9660_s10 + $0x80] sm:$0xff]  ;;  %v4895_v18 = vld [vmem:[%s9660_s10 + $0x88] sm:$0xff] }
 0x21c   : > { %7597 = vmatpush3.bf16.msra.mxu1 %v8717_v8  ;;  %v3634_v8 = vld [vmem:[%s8722_s6 + $0x10a] sm:$0xff] }
 0x222   : > { %7067 = vmatmul.mubr.msk.bf16.gmra.mrb[8].mxu1 %vm424_vm2, %v9308_v31  ;;  %7467 = vmatmul.mubr.msk.bf16.gmra.mrb[48].mxu0 %vm424_vm2, %v3659_v17  ;;  %v3635_v31 = vld [vmem:[%s8722_s6 + $0x112] sm:$0xff]  ;;  %v4125_v17 = vpack.c.bf16 %v4091_v21, %v4090_v15  ;;  %v4105_v15 = vld [vmem:[%s8722_s6 + $0x103] sm:$0xff] }
 0x223   : > { %7070 = vmatprep.mubr.msk.bf16.mxu1 %vm8648_vm1, %v8647_v1  ;;  %7470 = vmatprep.mubr.msk.bf16.mxu0 %vm8648_vm1, %v8647_v1  ;;  %v3661_v22 = vpack.c.bf16 %v3635_v31, %v3634_v8  ;;  %v4092_v8 = vld [vmem:[%s8722_s6 + $0x9b] sm:$0xff]  ;;  %v4093_v31 = vld [vmem:[%s8722_s6 + $0xa3] sm:$0xff] }
 0x22a   : > { %7071 = vmatmul.mubr.msk.bf16.gmra.mrb[12].mxu1 %vm424_vm2, %v9320_v34  ;;  %7471 = vmatmul.mubr.msk.bf16.gmra.mrb[52].mxu0 %vm424_vm2, %v3660_v27  ;;  %v3636_v34 = vld [vmem:[%s8722_s6 + $0x11a] sm:$0xff]  ;;  %v4896_v27 = vld [vmem:[%s9660_s10 + $0x90] sm:$0xff] }
 0x22b   : > { %7074 = vmatprep.mubr.msk.bf16.mxu1 %vm8648_vm1, %v8647_v1  ;;  %7474 = vmatprep.mubr.msk.bf16.mxu0 %vm8648_vm1, %v8647_v1  ;;  %v3662_v24 = vpack.c.bf16 %v3637_v37, %v3636_v34  ;;  %v4898_v34 = vld [vmem:[%s9660_s10 + $0xa0] sm:$0xff]  ;;  %v4899_v37 = vld [vmem:[%s9660_s10 + $0xa8] sm:$0xff] }
 0x232   : > { %7075 = vmatmul.mubr.msk.bf16.gmra.mrb[16].mxu1 %vm424_vm2, %v9332_v39  ;;  %7475 = vmatmul.mubr.msk.bf16.gmra.mrb[56].mxu0 %vm424_vm2, %v3661_v22  ;;  %v3638_v39 = vld [vmem:[%s8722_s6 + $0x12a] sm:$0xff]  ;;  %v4126_v22 = vpack.c.bf16 %v4093_v31, %v4092_v8 }
 0x233   : > { %7078 = vmatprep.mubr.msk.bf16.mxu1 %vm8648_vm1, %v8647_v1  ;;  %7478 = vmatprep.mubr.msk.bf16.mxu0 %vm8648_vm1, %v8647_v1  ;;  %v3663_v28 = vpack.c.bf16 %v3639_v25, %v3638_v39  ;;  %v1757_v39 = vld [vmem:[%s8722_s6 + $0x14f] sm:$0xff] }
 0x234   : > { %v4094_v25 = vld [vmem:[%s8722_s6 + $0xab] sm:$0xff] }
 0x23a   : > { %7079 = vmatmul.mubr.msk.bf16.gmra.mrb[20].mxu1 %vm424_vm2, %v9344_v41  ;;  %7479 = vmatmul.mubr.msk.bf16.gmra.mrb[60].mxu0 %vm424_vm2, %v3662_v24  ;;  %v3640_v41 = vld [vmem:[%s8722_s6 + $0x13a] sm:$0xff]  ;;  %v4900_v24 = vld [vmem:[%s9660_s10 + $0xb0] sm:$0xff] }
 0x23b   : > { %7082 = vmatprep.mubr.msk.bf16.mxu1 %vm8648_vm1, %v8647_v1  ;;  %7482 = vmatprep.mubr.msk.bf16.mxu0 %vm8648_vm1, %v8647_v1  ;;  %v3664_v52 = vpack.c.bf16 %v3641_v30, %v3640_v41  ;;  %v4901_v41 = vld [vmem:[%s9660_s10 + $0xb8] sm:$0xff] }
 0x242   : > { %7083 = vmatmul.mubr.msk.bf16.gmra.mrb[24].mxu1 %vm424_vm2, %v9356_v44  ;;  %7483 = vmatmul.mubr.msk.bf16.gmra.mrb[64].mxu0 %vm424_vm2, %v3663_v28  ;;  %v3642_v44 = vld [vmem:[%s8722_s6 + $0x14a] sm:$0xff]  ;;  %v4095_v28 = vld [vmem:[%s8722_s6 + $0xb3] sm:$0xff] }
 0x243   : > { %7086 = vmatprep.mubr.msk.bf16.mxu1 %vm8648_vm1, %v8647_v1  ;;  %7486 = vmatprep.mubr.msk.bf16.mxu0 %vm8648_vm1, %v8647_v1  ;;  %v3665_v59 = vpack.c.bf16 %v3643_v32, %v3642_v44  ;;  %v4127_v30 = vpack.c.bf16 %v4095_v28, %v4094_v25  ;;  %v4903_v44 = vld [vmem:[%s9660_s10 + $0xc8] sm:$0xff]  ;;  %v4904_v32 = vld [vmem:[%s9660_s10 + $0xd0] sm:$0xff] }
 0x244   : > { %v2224_v25 = vld [vmem:[%s8722_s6 + $0x128] sm:$0xff]  ;;  %v2225_v28 = vld [vmem:[%s8722_s6 + $0x130] sm:$0xff] }
 0x24a   : > { %7087 = vmatmul.mubr.msk.bf16.gmra.mrb[28].mxu1 %vm424_vm2, %v9368_v47  ;;  %7487 = vmatmul.mubr.msk.bf16.gmra.mrb[68].mxu0 %vm424_vm2, %v3664_v52  ;;  %v3644_v47 = vld [vmem:[%s8722_s6 + $0x15a] sm:$0xff] }
 0x24b   : > { %7090 = vmatprep.mubr.msk.bf16.mxu1 %vm8648_vm1, %v8647_v1  ;;  %7490 = vmatprep.mubr.msk.bf16.mxu0 %vm8648_vm1, %v8647_v1  ;;  %v3666_v40 = vpack.c.bf16 %v3645_v36, %v3644_v47  ;;  %v4902_v52 = vld [vmem:[%s9660_s10 + $0xc0] sm:$0xff] }
 0x24c   : > { %v4097_v47 = vld [vmem:[%s8722_s6 + $0xc3] sm:$0xff] }
 0x252   : > { %7091 = vmatmul.mubr.msk.bf16.gmra.mrb[32].mxu1 %vm424_vm2, %v9381_v35  ;;  %7491 = vmatmul.mubr.msk.bf16.gmra.mrb[72].mxu0 %vm424_vm2, %v3665_v59  ;;  %v3646_v35 = vld [vmem:[%s8722_s6 + $0x16a] sm:$0xff]  ;;  %v4096_v59 = vld [vmem:[%s8722_s6 + $0xbb] sm:$0xff] }
 0x253   : > { %7094 = vmatprep.mubr.msk.bf16.mxu1 %vm8648_vm1, %v8647_v1  ;;  %7494 = vmatprep.mubr.msk.bf16.mxu0 %vm8648_vm1, %v8647_v1  ;;  %v3667_v12 = vpack.c.bf16 %v3646_v35, %v3646_v35  ;;  %v4128_v35 = vpack.c.bf16 %v4097_v47, %v4096_v59  ;;  %v2226_v47 = vld [vmem:[%s8722_s6 + $0x138] sm:$0xff] }
 0x25a   : > { %7095 = vmatmul.mubr.msk.bf16.gmra.mrb[36].mxu1 %vm424_vm2, %v9394_v56  ;;  %7495 = vmatmul.mubr.msk.bf16.gmra.mrb[76].mxu0 %vm424_vm2, %v3666_v40  ;;  %v4078_v56 = vld [vmem:[%s8722_s6 + $0x2b] sm:$0xff]  ;;  %v4905_v40 = vld [vmem:[%s9660_s10 + $0xd8] sm:$0xff] }
 0x25b   : > { %7098 = vmatprep.mubr.msk.bf16.mxu1 %vm8648_vm1, %v8647_v1  ;;  %7498 = vmatprep.mubr.msk.bf16.mxu0 %vm8648_vm1, %v8647_v1  ;;  %v4119_v19 = vpack.c.bf16 %v4079_v43, %v4078_v56  ;;  %v4907_v56 = vld [vmem:[%s9660_s10 + $0xe8] sm:$0xff]  ;;  %v4908_v43 = vld [vmem:[%s9660_s10 + $0xf0] sm:$0xff] }
 0x262   : > { %7099 = vmatmul.mubr.msk.bf16.gmra.mrb[40].mxu1 %vm424_vm2, %v9407_v48  ;;  %7499 = vmatmul.mubr.msk.bf16.gmra.mrb[80].mxu0 %vm424_vm2, %v3667_v12  ;;  %v4878_v48 = vld [vmem:[%s9660_s10] sm:$0xff] }
 0x263   : > { %7102 = vmatprep.mubr.msk.bf16.mxu1 %vm8648_vm1, %v8647_v1  ;;  %7508 = vmatprep.mubr.msk.bf16.mxu0 %vm8648_vm1, %v8647_v1  ;;  %v4906_v12 = vld [vmem:[%s9660_s10 + $0xe0] sm:$0xff] }
 0x264   : > { %4960 = vrot.lane.b32.xlu0 %v4878_v48, %s8649_s11  ;;  %v2212_v48 = vld [vmem:[%s8722_s6 + $0xc8] sm:$0xff] }
 0x268   : > { %4962 = vrot.lane.b32.xlu0 %v4879_v46, %s8649_s11  ;;  %v4098_v46 = vld [vmem:[%s8722_s6 + $0xcb] sm:$0xff] }
 0x26a   : > { %7103 = vmatmul.mubr.msk.bf16.gmra.mrb[44].mxu1 %vm424_vm2, %v9430_v3  ;;  %7509 = vmatmul.mubr.msk.bf16.vlgmr.msra.gmra.mrb[0].mxu0 %vm424_vm2, %v4119_v19  ;;  %v4120_v3 = vpack.c.bf16 %v4081_v51, %v4080_v50  ;;  %v2213_v19 = vld [vmem:[%s8722_s6 + $0xd0] sm:$0xff]  ;;  %v4909_v51 = vld [vmem:[%s9660_s10 + $0xf8] sm:$0xff] }
 0x26b   : > { %7106 = vmatprep.mubr.msk.bf16.mxu1 %vm8648_vm1, %v8647_v1  ;;  %7512 = vmatprep.mubr.msk.bf16.mxu0 %vm8648_vm1, %v8647_v1  ;;  %v2242_v50 = vpack.c.bf16 %v2213_v19, %v2212_v48 }
 0x26c   : > { %4968 = vrot.lane.b32.xlu0 %v4882_v57, %s8649_s11  ;;  %v2214_v57 = vld [vmem:[%s8722_s6 + $0xd8] sm:$0xff] }
 0x270   : > { %4972 = vrot.lane.b32.xlu0 %v4884_v63, %s8649_s11 }
 0x272   : > { %7107 = vmatmul.mubr.msk.bf16.gmra.mrb[48].mxu1 %vm424_vm2, %v9445_v14  ;;  %7513 = vmatmul.mubr.msk.bf16.gmra.mrb[4].mxu0 %vm424_vm2, %v4120_v3  ;;  %v4084_v14 = vld [vmem:[%s8722_s6 + $0x5b] sm:$0xff]  ;;  %v4129_v3 = vpack.c.bf16 %v4099_v49, %v4098_v46  ;;  %v2228_v49 = vld [vmem:[%s8722_s6 + $0x148] sm:$0xff] }
 0x273   : > { %7110 = vmatprep.mubr.msk.bf16.mxu1 %vm8648_vm1, %v8647_v1  ;;  %7516 = vmatprep.mubr.msk.bf16.mxu0 %vm8648_vm1, %v8647_v1  ;;  %v4122_v0 = vpack.c.bf16 %v4085_v61, %v4084_v14  ;;  %v4101_v14 = vld [vmem:[%s8722_s6 + $0xe3] sm:$0xff] }
 0x274   : > { %4976 = vrot.lane.b32.xlu0 %v4886_v5, %s8649_s11  ;;  %v4130_v63 = vpack.c.bf16 %v4101_v14, %v4100_v58  ;;  %v4102_v5 = vld [vmem:[%s8722_s6 + $0xeb] sm:$0xff]  ;;  %v2230_v14 = vld [vmem:[%s8722_s6 + $0x158] sm:$0xff] }
 0x278   : > { %4980 = vrot.lane.b32.xlu0 %v4888_v7, %s8649_s11 }
 0x27a   : > { %7111 = vmatmul.mubr.msk.bf16.gmra.mrb[52].mxu1 %vm424_vm2, %v9458_v20  ;;  %7517 = vmatmul.mubr.msk.bf16.gmra.mrb[8].mxu0 %vm424_vm2, %v4121_v42  ;;  %v4086_v20 = vld [vmem:[%s8722_s6 + $0x6b] sm:$0xff]  ;;  %v2215_v42 = vld [vmem:[%s8722_s6 + $0xe0] sm:$0xff] }
 0x27b   : > { %7114 = vmatprep.mubr.msk.bf16.mxu1 %vm8648_vm1, %v8647_v1  ;;  %7520 = vmatprep.mubr.msk.bf16.mxu0 %vm8648_vm1, %v8647_v1  ;;  %v4123_v6 = vpack.c.bf16 %v4087_v60, %v4086_v20  ;;  %v2243_v61 = vpack.c.bf16 %v2215_v42, %v2214_v57  ;;  %v2216_v20 = vld [vmem:[%s8722_s6 + $0xe8] sm:$0xff]  ;;  %v2217_v60 = vld [vmem:[%s8722_s6 + $0xf0] sm:$0xff] }
 0x27c   : > { %v2244_v7 = vpack.c.bf16 %v2217_v60, %v2216_v20  ;;  %v2251_v20 = vpack.c.bf16 %v2230_v14, %v2230_v14 }
 0x282   : > { %7115 = vmatmul.mubr.msk.bf16.gmra.mrb[56].mxu1 %vm424_vm2, %v9471_v45  ;;  %7521 = vmatmul.mubr.msk.bf16.gmra.mrb[12].mxu0 %vm424_vm2, %v4122_v0  ;;  %v4887_v45 = vld [vmem:[%s9660_s10 + $0x48] sm:$0xff]  ;;  %v4913_v0 = vld [vmem:[%s9660_s10 + $0x118] sm:$0xff] }
 0x283   : > { %7118 = vmatprep.mubr.msk.bf16.mxu1 %vm8648_vm1, %v8647_v1  ;;  %7524 = vmatprep.mubr.msk.bf16.mxu0 %vm8648_vm1, %v8647_v1 }
 0x284   : > { %4978 = vrot.lane.b32.xlu1 %v4887_v45, %s8649_s11  ;;  %v4915_v45 = vld [vmem:[%s9660_s10 + $0x128] sm:$0xff] }
 0x288   : > { %4982 = vrot.lane.b32.xlu1 %v4889_v11, %s8649_s11  ;;  %v4917_v11 = vld [vmem:[%s9660_s10 + $0x138] sm:$0xff] }
 0x28a   : > { %7119 = vmatmul.mubr.msk.bf16.gmra.mrb[60].mxu1 %vm424_vm2, %v9484_v4  ;;  %7525 = vmatmul.mubr.msk.bf16.gmra.mrb[16].mxu0 %vm424_vm2, %v4123_v6  ;;  %v4890_v4 = vld [vmem:[%s9660_s10 + $0x60] sm:$0xff]  ;;  %v4103_v6 = vld [vmem:[%s8722_s6 + $0xf3] sm:$0xff] }
 0x28b   : > { %7122 = vmatprep.mubr.msk.bf16.mxu1 %vm8648_vm1, %v8647_v1  ;;  %7528 = vmatprep.mubr.msk.bf16.mxu0 %vm8648_vm1, %v8647_v1  ;;  %v4131_v10 = vpack.c.bf16 %v4103_v6, %v4102_v5 }
 0x28c   : > { %4984 = vrot.lane.b32.xlu0 %v4890_v4, %s8649_s11  ;;  %4986 = vrot.lane.b32.xlu1 %v4891_v23, %s8649_s11  ;;  %v2218_v4 = vld [vmem:[%s8722_s6 + $0xf8] sm:$0xff]  ;;  %v2219_v23 = vld [vmem:[%s8722_s6 + $0x100] sm:$0xff] }
 0x28d   : > { %v2245_v21 = vpack.c.bf16 %v2219_v23, %v2218_v4 }
 0x290   : > { %4988 = vrot.lane.b32.xlu0 %v4892_v16, %s8649_s11  ;;  %v4104_v16 = vld [vmem:[%s8722_s6 + $0xfb] sm:$0xff] }
 0x292   : > { %7123 = vmatmul.mubr.msk.bf16.gmra.mrb[64].mxu1 %vm424_vm2, %v9497_v26  ;;  %7529 = vmatmul.mubr.msk.bf16.gmra.mrb[20].mxu0 %vm424_vm2, %v4124_v13  ;;  %v4893_v26 = vld [vmem:[%s9660_s10 + $0x78] sm:$0xff]  ;;  %v4918_v13 = vld [vmem:[%s9660_s10 + $0x140] sm:$0xff] }
 0x293   : > { %7126 = vmatprep.mubr.msk.bf16.mxu1 %vm8648_vm1, %v8647_v1  ;;  %7532 = vmatprep.mubr.msk.bf16.mxu0 %vm8648_vm1, %v8647_v1 }
 0x294   : > { %4990 = vrot.lane.b32.xlu1 %v4893_v26, %s8649_s11  ;;  %4992 = vrot.lane.b32.xlu0 %v4894_v29, %s8649_s11  ;;  %v4132_v26 = vpack.c.bf16 %v4105_v15, %v4104_v16  ;;  %v2221_v29 = vld [vmem:[%s8722_s6 + $0x110] sm:$0xff] }
 0x298   : > { %4994 = vrot.lane.b32.xlu1 %v4895_v18, %s8649_s11  ;;  %4996 = vrot.lane.b32.xlu0 %v4896_v27, %s8649_s11  ;;  %v4106_v18 = vld [vmem:[%s8722_s6 + $0x10b] sm:$0xff]  ;;  %v4107_v27 = vld [vmem:[%s8722_s6 + $0x113] sm:$0xff] }
 0x299   : > { %v4133_v31 = vpack.c.bf16 %v4107_v27, %v4106_v18 }
 0x29a   : > { %7127 = vmatmul.mubr.msk.bf16.gmra.mrb[68].mxu1 %vm424_vm2, %v9510_v55  ;;  %7533 = vmatmul.mubr.msk.bf16.gmra.mrb[24].mxu0 %vm424_vm2, %v4125_v17  ;;  %v4897_v55 = vld [vmem:[%s9660_s10 + $0x98] sm:$0xff]  ;;  %v2220_v17 = vld [vmem:[%s8722_s6 + $0x108] sm:$0xff] }
 0x29b   : > { %7130 = vmatprep.mubr.msk.bf16.mxu1 %vm8648_vm1, %v8647_v1  ;;  %7536 = vmatprep.mubr.msk.bf16.mxu0 %vm8648_vm1, %v8647_v1  ;;  %v2246_v8 = vpack.c.bf16 %v2221_v29, %v2220_v17 }
 0x29c   : > { %4998 = vrot.lane.b32.xlu1 %v4897_v55, %s8649_s11  ;;  %5000 = vrot.lane.b32.xlu0 %v4898_v34, %s8649_s11  ;;  %v2222_v55 = vld [vmem:[%s8722_s6 + $0x118] sm:$0xff] }
 0x29d   : > { %v4108_v34 = vld [vmem:[%s8722_s6 + $0x11b] sm:$0xff] }
 0x2a0   : > { %5002 = vrot.lane.b32.xlu1 %v4899_v37, %s8649_s11  ;;  %5004 = vrot.lane.b32.xlu0 %v4900_v24, %s8649_s11  ;;  %v4109_v37 = vld [vmem:[%s8722_s6 + $0x123] sm:$0xff] }
 0x2a2   : > { %7131 = vmatmul.mubr.msk.bf16.gmra.mrb[72].mxu1 %vm424_vm2, %v9523_v62  ;;  %7537 = vmatmul.mubr.msk.bf16.gmra.mrb[28].mxu0 %vm424_vm2, %v4126_v22  ;;  %v1778_v62 = vpack.c.bf16 %v1757_v39, %v9531_v54  ;;  %v1758_v54 = vld [vmem:[%s8722_s6 + $0x157] sm:$0xff]  ;;  %v2223_v22 = vld [vmem:[%s8722_s6 + $0x120] sm:$0xff]  ;;  %v4134_v39 = vpack.c.bf16 %v4109_v37, %v4108_v34 }
 0x2a3   : > { %7134 = vmatprep.mubr.msk.bf16.mxu1 %vm8648_vm1, %v8647_v1  ;;  %7540 = vmatprep.mubr.msk.bf16.mxu0 %vm8648_vm1, %v8647_v1  ;;  %v1779_v36 = vpack.c.bf16 %v1758_v54, %v1758_v54  ;;  %v2247_v24 = vpack.c.bf16 %v2223_v22, %v2222_v55 }
 0x2a4   : > { %5006 = vrot.lane.b32.xlu1 %v4901_v41, %s8649_s11  ;;  %5008 = vrot.lane.b32.xlu0 %v4902_v52, %s8649_s11  ;;  %v4111_v41 = vld [vmem:[%s8722_s6 + $0x133] sm:$0xff] }
 0x2a8   : > { %5010 = vrot.lane.b32.xlu1 %v4903_v44, %s8649_s11  ;;  %5012 = vrot.lane.b32.xlu0 %v4904_v32, %s8649_s11  ;;  %v2248_v44 = vpack.c.bf16 %v2225_v28, %v2224_v25 }
 0x2aa   : > { %7135 = vmatmul.mubr.msk.bf16.gmra.mrb[76].mxu1 %vm424_vm2, %v1778_v62  ;;  %7541 = vmatmul.mubr.msk.bf16.gmra.mrb[32].mxu0 %vm424_vm2, %v4127_v30  ;;  %v4110_v62 = vld [vmem:[%s8722_s6 + $0x12b] sm:$0xff] }
 0x2ab   : > { %7138 = vmatprep.mubr.msk.bf16.mxu1 %vm8648_vm1, %v8647_v1  ;;  %7544 = vmatprep.mubr.msk.bf16.mxu0 %vm8648_vm1, %v8647_v1  ;;  %v4135_v54 = vpack.c.bf16 %v4111_v41, %v4110_v62 }
 0x2ac   : > { %5014 = vrot.lane.b32.xlu1 %v4905_v40, %s8649_s11  ;;  %5016 = vrot.lane.b32.xlu0 %v4906_v12, %s8649_s11  ;;  %v4112_v40 = vld [vmem:[%s8722_s6 + $0x13b] sm:$0xff] }
 0x2b0   : > { %5018 = vrot.lane.b32.xlu1 %v4907_v56, %s8649_s11  ;;  %5020 = vrot.lane.b32.xlu0 %v4908_v43, %s8649_s11 }
 0x2b2   : > { %7139 = vmatmul.mubr.msk.bf16.gmra.mrb[80].mxu1 %vm424_vm2, %v1779_v36  ;;  %7545 = vmatmul.mubr.msk.bf16.gmra.mrb[36].mxu0 %vm424_vm2, %v4128_v35  ;;  %v2227_v36 = vld [vmem:[%s8722_s6 + $0x140] sm:$0xff] }
 0x2b3   : > { %7192 = vmatprep.mubr.msk.bf16.mxu1 %vm8648_vm1, %v8647_v1  ;;  %7548 = vmatprep.mubr.msk.bf16.mxu0 %vm8648_vm1, %v8647_v1  ;;  %v4113_v35 = vld [vmem:[%s8722_s6 + $0x143] sm:$0xff]  ;;  %v2249_v43 = vpack.c.bf16 %v2227_v36, %v2226_v47 }
 0x2b4   : > { %5022 = vrot.lane.b32.xlu1 %v4909_v51, %s8649_s11  ;;  %5024 = vrot.lane.b32.xlu0 %v4910_v33, %s8649_s11  ;;  %v4136_v19 = vpack.c.bf16 %v4113_v35, %v4112_v40  ;;  %v4114_v51 = vld [vmem:[%s8722_s6 + $0x14b] sm:$0xff] }
 0x2b8   : > { %5026 = vrot.lane.b32.xlu1 %v4911_v53, %s8649_s11  ;;  %5028 = vrot.lane.b32.xlu0 %v4912_v38, %s8649_s11 }
 0x2ba   : > { %7193 = vmatmul.mubr.msk.bf16.vlgmr.msra.gmra.mrb[44].mxu1 %vm424_vm2, %v2242_v50  ;;  %7549 = vmatmul.mubr.msk.bf16.gmra.mrb[40].mxu0 %vm424_vm2, %v4129_v3  ;;  %v2229_v50 = vld [vmem:[%s8722_s6 + $0x150] sm:$0xff] }
 0x2bb   : > { %7196 = vmatprep.mubr.msk.bf16.mxu1 %vm8648_vm1, %v8647_v1  ;;  %7552 = vmatprep.mubr.msk.bf16.mxu0 %vm8648_vm1, %v8647_v1  ;;  %v4115_v3 = vld [vmem:[%s8722_s6 + $0x153] sm:$0xff]  ;;  %v2250_v38 = vpack.c.bf16 %v2229_v50, %v2228_v49  ;;  %v9991_v49 = vpop.permute.xlu1 %4964 }
 0x2bc   : > { %5030 = vrot.lane.b32.xlu1 %v4913_v0, %s8649_s11  ;;  %5032 = vrot.lane.b32.xlu0 %v4914_v2, %s8649_s11  ;;  %v4137_v42 = vpack.c.bf16 %v4115_v3, %v4114_v51 }
 0x2c0   : > { %5034 = vrot.lane.b32.xlu1 %v4915_v45, %s8649_s11  ;;  %5036 = vrot.lane.b32.xlu0 %v4916_v9, %s8649_s11  ;;  %v4118_v45 = vld [vmem:[%s8722_s6 + $0x16b] sm:$0xff] }
 0x2c2   : > { %7197 = vmatmul.mubr.msk.bf16.gmra.mrb[48].mxu1 %vm424_vm2, %v2243_v61  ;;  %7553 = vmatmul.mubr.msk.bf16.gmra.mrb[44].mxu0 %vm424_vm2, %v4130_v63  ;;  %v4116_v61 = vld [vmem:[%s8722_s6 + $0x15b] sm:$0xff]  ;;  %v4117_v63 = vld [vmem:[%s8722_s6 + $0x163] sm:$0xff] }
 0x2c3   : > { %7200 = vmatprep.mubr.msk.bf16.mxu1 %vm8648_vm1, %v8647_v1  ;;  %7556 = vmatprep.mubr.msk.bf16.mxu0 %vm8648_vm1, %v8647_v1  ;;  %v4138_v5 = vpack.c.bf16 %v4117_v63, %v4116_v61 }
 0x2c4   : > { %5038 = vrot.lane.b32.xlu1 %v4917_v11, %s8649_s11  ;;  %5040 = vrot.lane.b32.xlu0 %v4918_v13, %s8649_s11  ;;  %v4139_v11 = vpack.c.bf16 %v4118_v45, %v4118_v45 }
 0x2ca   : > { %7201 = vmatmul.mubr.msk.bf16.gmra.mrb[52].mxu1 %vm424_vm2, %v2244_v7  ;;  %7557 = vmatmul.mubr.msk.bf16.gmra.mrb[48].mxu0 %vm424_vm2, %v4131_v10 }
 0x2cb   : > { %7204 = vmatprep.mubr.msk.bf16.mxu1 %vm8648_vm1, %v8647_v1  ;;  %7560 = vmatprep.mubr.msk.bf16.mxu0 %vm8648_vm1, %v8647_v1 }
 0x2d2   : > { %7205 = vmatmul.mubr.msk.bf16.gmra.mrb[56].mxu1 %vm424_vm2, %v2245_v21  ;;  %7561 = vmatmul.mubr.msk.bf16.gmra.mrb[52].mxu0 %vm424_vm2, %v4132_v26 }
 0x2d3   : > { %7208 = vmatprep.mubr.msk.bf16.mxu1 %vm8648_vm1, %v8647_v1  ;;  %7564 = vmatprep.mubr.msk.bf16.mxu0 %vm8648_vm1, %v8647_v1 }
 0x2da   : > { %7209 = vmatmul.mubr.msk.bf16.gmra.mrb[60].mxu1 %vm424_vm2, %v2246_v8  ;;  %7565 = vmatmul.mubr.msk.bf16.gmra.mrb[56].mxu0 %vm424_vm2, %v4133_v31 }
 0x2db   : > { %7212 = vmatprep.mubr.msk.bf16.mxu1 %vm8648_vm1, %v8647_v1  ;;  %7568 = vmatprep.mubr.msk.bf16.mxu0 %vm8648_vm1, %v8647_v1 }
 0x2e2   : > { %7213 = vmatmul.mubr.msk.bf16.gmra.mrb[64].mxu1 %vm424_vm2, %v2247_v24  ;;  %7569 = vmatmul.mubr.msk.bf16.gmra.mrb[60].mxu0 %vm424_vm2, %v4134_v39 }
 0x2e3   : > { %7216 = vmatprep.mubr.msk.bf16.mxu1 %vm8648_vm1, %v8647_v1  ;;  %7572 = vmatprep.mubr.msk.bf16.mxu0 %vm8648_vm1, %v8647_v1 }
 0x2e5   : > { %v9897_v30 = vpop.f32.mrb[0].mxu1 }
 0x2e6   : > { %v7060_v52 = vpop.f32.mrb[1].mxu1 }
 0x2e7   : > { %v9899_v32 = vpop.f32.mrb[2].mxu1 }
 0x2e8   : > { %v7061_v59 = vpop.f32.mrb[3].mxu1 }
 0x2ea   : > { %7217 = vmatmul.mubr.msk.bf16.gmra.mrb[68].mxu1 %vm424_vm2, %v2248_v44  ;;  %7573 = vmatmul.mubr.msk.bf16.gmra.mrb[64].mxu0 %vm424_vm2, %v4135_v54  ;;  %v219_v44 = vld [vmem:[%s10994_s2] sm:$0xff]  ;;  %v220_v54 = vld [vmem:[%s10994_s2 + $0x8] sm:$0xff] }
 0x2eb   : > { %7220 = vmatprep.mubr.msk.bf16.mxu1 %vm8648_vm1, %v8647_v1  ;;  %7576 = vmatprep.mubr.msk.bf16.mxu0 %vm8648_vm1, %v8647_v1  ;;  %v7598_v59 = vadd.f32 %v9897_v30, %v219_v44  ;;  %v7600_v36 = vadd.f32 %v9899_v32, %v220_v54  ;;  %v221_v30 = vld [vmem:[%s10994_s2 + $0x10] sm:$0xff]  ;;  %v222_v32 = vld [vmem:[%s10994_s2 + $0x18] sm:$0xff] }
 0x2ed   : > { %v9911_v12 = vpop.f32.mrb[4].mxu1 }
 0x2ee   : > { %v7064_v56 = vpop.f32.mrb[5].mxu1  ;;  %v7602_v50 = vadd.f32 %v9911_v12, %v221_v30  ;;  %v223_v12 = vld [vmem:[%s10994_s2 + $0x20] sm:$0xff] }
 0x2ef   : > { %v9913_v48 = vpop.f32.mrb[6].mxu1 }
 0x2f0   : > { %v7065_v46 = vpop.f32.mrb[7].mxu1 }
 0x2f2   : > { %7221 = vmatmul.mubr.msk.bf16.gmra.mrb[72].mxu1 %vm424_vm2, %v2249_v43  ;;  %7577 = vmatmul.mubr.msk.bf16.gmra.mrb[68].mxu0 %vm424_vm2, %v4136_v19  ;;  %v9986_v43 = vpop.permute.xlu0 %4960 }
 0x2f3   : > { %7224 = vmatprep.mubr.msk.bf16.mxu1 %vm8648_vm1, %v8647_v1  ;;  %7580 = vmatprep.mubr.msk.bf16.mxu0 %vm8648_vm1, %v8647_v1 }
 0x2f5   : > { %v9925_v33 = vpop.f32.mrb[8].mxu1 }
 0x2f6   : > { %v7068_v53 = vpop.f32.mrb[9].mxu1  ;;  %v10001_v3 = vpop.permute.xlu0 %4962 }
 0x2f7   : > { %v9927_v57 = vpop.f32.mrb[10].mxu1  ;;  %v7604_v53 = vadd.f32 %v9913_v48, %v222_v32  ;;  %v224_v48 = vld [vmem:[%s10994_s2 + $0x28] sm:$0xff] }
 0x2f8   : > { %v7069_v58 = vpop.f32.mrb[11].mxu1 }
 0x2f9   : > { %v10006_v58 = vpop.permute.xlu1 %4966 }
 0x2fa   : > { %7225 = vmatmul.mubr.msk.bf16.gmra.mrb[76].mxu1 %vm424_vm2, %v2250_v38  ;;  %7581 = vmatmul.mubr.msk.bf16.gmra.mrb[72].mxu0 %vm424_vm2, %v4137_v42 }
 0x2fb   : > { %7228 = vmatprep.mubr.msk.bf16.mxu1 %vm8648_vm1, %v8647_v1  ;;  %7584 = vmatprep.mubr.msk.bf16.mxu0 %vm8648_vm1, %v8647_v1 }
 0x2fd   : > { %v9938_v0 = vpop.f32.mrb[12].mxu1 }
 0x2fe   : > { %v7072_v2 = vpop.f32.mrb[13].mxu1 }
 0x2ff   : > { %v9940_v60 = vpop.f32.mrb[14].mxu1  ;;  %v10014_v2 = vpop.permute.xlu0 %4968 }
 0x300   : > { %v7073_v6 = vpop.f32.mrb[15].mxu1 }
 0x301   : > { %v7606_v6 = vadd.f32 %v9925_v33, %v223_v12  ;;  %v225_v33 = vld [vmem:[%s10994_s2 + $0x30] sm:$0xff] }
 0x302   : > { %7229 = vmatmul.mubr.msk.bf16.gmra.mrb[80].mxu1 %vm424_vm2, %v2251_v20  ;;  %7585 = vmatmul.mubr.msk.bf16.gmra.mrb[76].mxu0 %vm424_vm2, %v4138_v5  ;;  %v10016_v5 = vpop.permute.xlu1 %4970 }
 0x303   : > { %7588 = vmatprep.mubr.msk.bf16.mxu0 %vm8648_vm1, %v8647_v1 }
 0x305   : > { %v9947_v7 = vpop.f32.mrb[16].mxu1 }
 0x306   : > { %v7076_v9 = vpop.f32.mrb[17].mxu1 }
 0x307   : > { %v9949_v10 = vpop.f32.mrb[18].mxu1 }
 0x308   : > { %v7077_v13 = vpop.f32.mrb[19].mxu1 }
 0x309   : > { %v7608_v13 = vadd.f32 %v9927_v57, %v224_v48 }
 0x30a   : > { %7589 = vmatmul.mubr.msk.bf16.gmra.mrb[80].mxu0 %vm424_vm2, %v4139_v11  ;;  %v10024_v11 = vpop.permute.xlu0 %4972 }
 0x30d   : > { %v9952_v4 = vpop.f32.mrb[20].mxu1 }
 0x30e   : > { %v7080_v23 = vpop.f32.mrb[21].mxu1 }
 0x30f   : > { %v9954_v16 = vpop.f32.mrb[22].mxu1 }
 0x310   : > { %v7081_v15 = vpop.f32.mrb[23].mxu1 }
 0x315   : > { %v9956_v21 = vpop.f32.mrb[24].mxu1 }
 0x316   : > { %v7084_v26 = vpop.f32.mrb[25].mxu1 }
 0x317   : > { %v9958_v1 = vpop.f32.mrb[26].mxu1  ;;  %v10030_v26 = vpop.permute.xlu1 %4974 }
 0x318   : > { %v7085_v17 = vpop.f32.mrb[27].mxu1 }
 0x31d   : > { %v9960_v29 = vpop.f32.mrb[28].mxu1 }
 0x31e   : > { %v7088_v18 = vpop.f32.mrb[29].mxu1 }
 0x31f   : > { %v9962_v27 = vpop.f32.mrb[30].mxu1 }
 0x320   : > { %v7089_v8 = vpop.f32.mrb[31].mxu1 }
 0x325   : > { %v9964_v31 = vpop.f32.mrb[32].mxu1 }
 0x326   : > { %v7092_v55 = vpop.f32.mrb[33].mxu1 }
 0x327   : > { %v9966_v22 = vpop.f32.mrb[34].mxu1  ;;  %v10038_v55 = vpop.permute.xlu0 %4976 }
 0x328   : > { %v7093_v34 = vpop.f32.mrb[35].mxu1 }
 0x329   : > { %v10040_v34 = vpop.permute.xlu1 %4978 }
 0x32b   : > { %v10048_v44 = vpop.permute.xlu0 %4980 }
 0x32d   : > { %v9968_v37 = vpop.f32.mrb[36].mxu1 }
 0x32e   : > { %v7096_v24 = vpop.f32.mrb[37].mxu1 }
 0x32f   : > { %v9970_v39 = vpop.f32.mrb[38].mxu1  ;;  %v226_v24 = vld [vmem:[%s10994_s2 + $0x38] sm:$0xff]  ;;  %v10067_v32 = vpop.permute.xlu0 %4984 }
 0x330   : > { %v7097_v25 = vpop.f32.mrb[39].mxu1  ;;  %v7612_v54 = vadd.f32 %v9940_v60, %v226_v24  ;;  %v228_v60 = vld [vmem:[%s10994_s2 + $0x48] sm:$0xff]  ;;  %10998 = vst [vmem:[#allocation4_spill] sm:$0xff] %v10067_v32 }
 0x331   : > { %v7610_v25 = vadd.f32 %v9938_v0, %v225_v33  ;;  %v227_v0 = vld [vmem:[%s10994_s2 + $0x40] sm:$0xff] }
 0x335   : > { %v9972_v28 = vpop.f32.mrb[40].mxu1 }
 0x336   : > { %v7100_v62 = vpop.f32.mrb[41].mxu1 }
 0x337   : > { %v9974_v41 = vpop.f32.mrb[42].mxu1 }
 0x338   : > { %v7101_v52 = vpop.f32.mrb[43].mxu1 }
 0x33d   : > { %v4302_v47 = vpop.f32.mrb[0].mxu0 }
 0x33e   : > { %v9984_v40 = vadd.f32 %v7598_v59, %v4302_v47  ;;  %v7510_v35 = vpop.f32.mrb[1].mxu0 }
 0x33f   : > { %v4305_v56 = vpop.f32.mrb[2].mxu0 }
 0x340   : > { %8309 = vtanh.f32 %v9984_v40  ;;  %v9989_v19 = vadd.f32 %v7600_v36, %v4305_v56  ;;  %v7511_v46 = vpop.f32.mrb[3].mxu0  ;;  %v10054_v36 = vpop.permute.xlu1 %4982 }
 0x341   : > { %10997 = vst [vmem:[#allocation3_spill] sm:$0xff] %v10054_v36 }
 0x342   : > { %8311 = vtanh.f32 %v9989_v19 }
 0x345   : > { %v4310_v51 = vpop.f32.mrb[4].mxu0 }
 0x346   : > { %v10004_v38 = vadd.f32 %v7602_v50, %v4310_v51  ;;  %v7514_v42 = vpop.f32.mrb[5].mxu0  ;;  %v7614_v50 = vadd.f32 %v9947_v7, %v227_v0  ;;  %v10070_v51 = vpop.permute.xlu1 %4986  ;;  %v229_v7 = vld [vmem:[%s10994_s2 + $0x50] sm:$0xff] }
 0x347   : > { %v4313_v14 = vpop.f32.mrb[6].mxu0  ;;  %10999 = vst [vmem:[#allocation5_spill] sm:$0xff] %v10070_v51 }
 0x348   : > { %8313 = vtanh.f32 %v10004_v38  ;;  %v10009_v61 = vadd.f32 %v7604_v53, %v4313_v14  ;;  %v7515_v63 = vpop.f32.mrb[7].mxu0  ;;  %v7616_v14 = vadd.f32 %v9949_v10, %v228_v60  ;;  %v230_v10 = vld [vmem:[%s10994_s2 + $0x58] sm:$0xff] }
 0x349   : > { %v7620_v33 = vadd.f32 %v9954_v16, %v230_v10 }
 0x34a   : > { %v8310_v20 = vpop.eup %8309  ;;  %8315 = vtanh.f32 %v10009_v61 }
 0x34b   : > { %5165 = vrot.lane.b32.xlu1 %v8310_v20, %s8649_s11 }
 0x34c   : > { %v8312_v45 = vpop.eup %8311 }
 0x34d   : > { %v4318_v9 = vpop.f32.mrb[8].mxu0  ;;  %5167 = vrot.lane.b32.xlu0 %v8312_v45, %s8649_s11  ;;  %v10082_v45 = vpop.permute.xlu0 %4988 }
 0x34e   : > { %v10027_v23 = vadd.f32 %v7606_v6, %v4318_v9  ;;  %v7518_v15 = vpop.f32.mrb[9].mxu0  ;;  %11000 = vst [vmem:[#allocation6_spill] sm:$0xff] %v10082_v45 }
 0x34f   : > { %v4321_v17 = vpop.f32.mrb[10].mxu0  ;;  %v7618_v15 = vadd.f32 %v9952_v4, %v229_v7  ;;  %v231_v4 = vld [vmem:[%s10994_s2 + $0x60] sm:$0xff] }
 0x350   : > { %8317 = vtanh.f32 %v10027_v23  ;;  %v10033_v18 = vadd.f32 %v7608_v13, %v4321_v17  ;;  %v7519_v8 = vpop.f32.mrb[11].mxu0  ;;  %v10084_v13 = vpop.permute.xlu1 %4990 }
 0x351   : > { %11001 = vst [vmem:[#allocation7_spill] sm:$0xff] %v10084_v13 }
 0x352   : > { %v8314_v57 = vpop.eup %8313  ;;  %8319 = vtanh.f32 %v10033_v18 }
 0x353   : > { %5169 = vrot.lane.b32.xlu1 %v8314_v57, %s8649_s11 }
 0x354   : > { %v8316_v62 = vpop.eup %8315 }
 0x355   : > { %v4326_v52 = vpop.f32.mrb[12].mxu0  ;;  %5171 = vrot.lane.b32.xlu0 %v8316_v62, %s8649_s11  ;;  %v10096_v62 = vpop.permute.xlu0 %4992 }
 0x356   : > { %v10051_v59 = vadd.f32 %v7610_v25, %v4326_v52  ;;  %v7522_v47 = vpop.f32.mrb[13].mxu0  ;;  %11002 = vst [vmem:[#allocation8_spill] sm:$0xff] %v10096_v62 }
 0x357   : > { %v4329_v35 = vpop.f32.mrb[14].mxu0  ;;  %v10101_v47 = vpop.permute.xlu1 %4994 }
 0x358   : > { %8321 = vtanh.f32 %v10051_v59  ;;  %v10057_v56 = vadd.f32 %v7612_v54, %v4329_v35  ;;  %v7523_v46 = vpop.f32.mrb[15].mxu0  ;;  %11003 = vst [vmem:[#allocation9_spill] sm:$0xff] %v10101_v47  ;;  %v232_v35 = vld [vmem:[%s10994_s2 + $0x68] sm:$0xff] }
 0x359   : > { %v7622_v46 = vadd.f32 %v9956_v21, %v231_v4  ;;  %v10112_v60 = vpop.permute.xlu0 %4996  ;;  %v233_v21 = vld [vmem:[%s10994_s2 + $0x70] sm:$0xff] }
 0x35a   : > { %v8318_v30 = vpop.eup %8317  ;;  %8323 = vtanh.f32 %v10057_v56  ;;  %11004 = vst [vmem:[#allocation10_spill] sm:$0xff] %v10112_v60  ;;  %v7626_v10 = vadd.f32 %v9960_v29, %v233_v21  ;;  %v235_v29 = vld [vmem:[%s10994_s2 + $0x80] sm:$0xff] }
 0x35b   : > { %5173 = vrot.lane.b32.xlu1 %v8318_v30, %s8649_s11 }
 0x35c   : > { %v8320_v53 = vpop.eup %8319 }
 0x35d   : > { %v4334_v42 = vpop.f32.mrb[16].mxu0  ;;  %5175 = vrot.lane.b32.xlu0 %v8320_v53, %s8649_s11 }
 0x35e   : > { %v10073_v63 = vadd.f32 %v7614_v50, %v4334_v42  ;;  %v7526_v12 = vpop.f32.mrb[17].mxu0  ;;  %v7624_v50 = vadd.f32 %v9958_v1, %v232_v35  ;;  %v234_v1 = vld [vmem:[%s10994_s2 + $0x78] sm:$0xff] }
 0x35f   : > { %v4337_v20 = vpop.f32.mrb[18].mxu0 }
 0x360   : > { %8325 = vtanh.f32 %v10073_v63  ;;  %v10077_v48 = vadd.f32 %v7616_v14, %v4337_v20  ;;  %v7527_v6 = vpop.f32.mrb[19].mxu0  ;;  %v10118_v14 = vpop.permute.xlu1 %4998 }
 0x361   : > { %11005 = vst [vmem:[#allocation11_spill] sm:$0xff] %v10118_v14 }
 0x362   : > { %v8322_v9 = vpop.eup %8321  ;;  %8327 = vtanh.f32 %v10077_v48 }
 0x363   : > { %5177 = vrot.lane.b32.xlu1 %v8322_v9, %s8649_s11  ;;  %v10131_v9 = vpop.permute.xlu0 %5000 }
 0x364   : > { %v8324_v17 = vpop.eup %8323  ;;  %11006 = vst [vmem:[#allocation12_spill] sm:$0xff] %v10131_v9 }
 0x365   : > { %v4342_v8 = vpop.f32.mrb[20].mxu0  ;;  %5179 = vrot.lane.b32.xlu0 %v8324_v17, %s8649_s11 }
 0x366   : > { %v10093_v57 = vadd.f32 %v7618_v15, %v4342_v8  ;;  %v7530_v24 = vpop.f32.mrb[21].mxu0  ;;  %v10134_v15 = vpop.permute.xlu1 %5002 }
 0x367   : > { %v4345_v25 = vpop.f32.mrb[22].mxu0  ;;  %11007 = vst [vmem:[#allocation13_spill] sm:$0xff] %v10134_v15  ;;  %v10146_v35 = vpop.permute.xlu0 %5004 }
 0x368   : > { %8329 = vtanh.f32 %v10093_v57  ;;  %v10099_v52 = vadd.f32 %v7620_v33, %v4345_v25  ;;  %v7531_v54 = vpop.f32.mrb[23].mxu0  ;;  %v7628_v33 = vadd.f32 %v9962_v27, %v234_v1  ;;  %11008 = vst [vmem:[#allocation14_spill] sm:$0xff] %v10146_v35  ;;  %v236_v27 = vld [vmem:[%s10994_s2 + $0x88] sm:$0xff] }
 0x36a   : > { %v8326_v16 = vpop.eup %8325  ;;  %8331 = vtanh.f32 %v10099_v52 }
 0x36b   : > { %5181 = vrot.lane.b32.xlu1 %v8326_v16, %s8649_s11  ;;  %v10160_v1 = vpop.permute.xlu0 %5008 }
 0x36c   : > { %v8328_v0 = vpop.eup %8327  ;;  %11010 = vst [vmem:[#allocation16_spill] sm:$0xff] %v10160_v1 }
 0x36d   : > { %v4350_v30 = vpop.f32.mrb[24].mxu0  ;;  %5183 = vrot.lane.b32.xlu0 %v8328_v0, %s8649_s11  ;;  %v10148_v0 = vpop.permute.xlu1 %5006 }
 0x36e   : > { %v10115_v53 = vadd.f32 %v7622_v46, %v4350_v30  ;;  %v7534_v42 = vpop.f32.mrb[25].mxu0  ;;  %11009 = vst [vmem:[#allocation15_spill] sm:$0xff] %v10148_v0  ;;  %v7630_v30 = vadd.f32 %v9964_v31, %v235_v29  ;;  %v237_v31 = vld [vmem:[%s10994_s2 + $0x90] sm:$0xff] }
 0x36f   : > { %v4353_v12 = vpop.f32.mrb[26].mxu0  ;;  %v10176_v29 = vpop.permute.xlu0 %5012 }
 0x370   : > { %8333 = vtanh.f32 %v10115_v53  ;;  %v10121_v20 = vadd.f32 %v7624_v50, %v4353_v12  ;;  %v7535_v6 = vpop.f32.mrb[27].mxu0  ;;  %v7632_v12 = vadd.f32 %v9966_v22, %v236_v27  ;;  %11012 = vst [vmem:[#allocation18_spill] sm:$0xff] %v10176_v29 }
 0x372   : > { %v8330_v7 = vpop.eup %8329  ;;  %8335 = vtanh.f32 %v10121_v20 }
 0x373   : > { %5185 = vrot.lane.b32.xlu1 %v8330_v7, %s8649_s11 }
 0x374   : > { %v8332_v17 = vpop.eup %8331 }
 0x375   : > { %v4358_v8 = vpop.f32.mrb[28].mxu0  ;;  %5187 = vrot.lane.b32.xlu0 %v8332_v17, %s8649_s11 }
 0x376   : > { %v10137_v24 = vadd.f32 %v7626_v10, %v4358_v8  ;;  %v7538_v25 = vpop.f32.mrb[29].mxu0  ;;  %v10165_v8 = vpop.permute.xlu1 %5010 }
 0x377   : > { %v4361_v54 = vpop.f32.mrb[30].mxu0  ;;  %11011 = vst [vmem:[#allocation17_spill] sm:$0xff] %v10165_v8  ;;  %v7634_v25 = vadd.f32 %v9968_v37, %v237_v31  ;;  %v239_v37 = vld [vmem:[%s10994_s2 + $0xa0] sm:$0xff] }
 0x378   : > { %8337 = vtanh.f32 %v10137_v24  ;;  %v10141_v4 = vadd.f32 %v7628_v33, %v4361_v54  ;;  %v7539_v16 = vpop.f32.mrb[31].mxu0  ;;  %v238_v33 = vld [vmem:[%s10994_s2 + $0x98] sm:$0xff]  ;;  %v7638_v31 = vadd.f32 %v9972_v28, %v239_v37  ;;  %v241_v37 = vld [vmem:[%s10994_s2 + $0xb0] sm:$0xff] }
 0x37a   : > { %v8334_v46 = vpop.eup %8333  ;;  %8339 = vtanh.f32 %v10141_v4 }
 0x37b   : > { %5189 = vrot.lane.b32.xlu1 %v8334_v46, %s8649_s11  ;;  %v7636_v46 = vadd.f32 %v9970_v39, %v238_v33  ;;  %v240_v39 = vld [vmem:[%s10994_s2 + $0xa8] sm:$0xff] }
 0x37c   : > { %v8336_v50 = vpop.eup %8335 }
 0x37d   : > { %v4366_v42 = vpop.f32.mrb[32].mxu0  ;;  %5191 = vrot.lane.b32.xlu0 %v8336_v50, %s8649_s11  ;;  %v10182_v50 = vpop.permute.xlu1 %5014 }
 0x37e   : > { %v10157_v6 = vadd.f32 %v7630_v30, %v4366_v42  ;;  %v7542_v21 = vpop.f32.mrb[33].mxu0  ;;  %11013 = vst [vmem:[#allocation19_spill] sm:$0xff] %v10182_v50 }
 0x37f   : > { %v4369_v7 = vpop.f32.mrb[34].mxu0 }
 0x380   : > { %8341 = vtanh.f32 %v10157_v6  ;;  %v10163_v10 = vadd.f32 %v7632_v12, %v4369_v7  ;;  %v7543_v17 = vpop.f32.mrb[35].mxu0 }
 0x381   : > { %v10195_v17 = vpop.permute.xlu0 %5016  ;;  %v10198_v33 = vpop.permute.xlu1 %5018 }
 0x382   : > { %v8338_v22 = vpop.eup %8337  ;;  %8343 = vtanh.f32 %v10163_v10  ;;  %11014 = vst [vmem:[#allocation20_spill] sm:$0xff] %v10195_v17  ;;  %11015 = vst [vmem:[#allocation21_spill] sm:$0xff] %v10198_v33 }
 0x383   : > { %5193 = vrot.lane.b32.xlu1 %v8338_v22, %s8649_s11 }
 0x384   : > { %v8340_v54 = vpop.eup %8339 }
 0x385   : > { %v4374_v16 = vpop.f32.mrb[36].mxu0  ;;  %5195 = vrot.lane.b32.xlu0 %v8340_v54, %s8649_s11 }
 0x386   : > { %v10179_v27 = vadd.f32 %v7634_v25, %v4374_v16  ;;  %v7546_v30 = vpop.f32.mrb[37].mxu0 }
 0x387   : > { %v4377_v42 = vpop.f32.mrb[38].mxu0 }
 0x388   : > { %8345 = vtanh.f32 %v10179_v27  ;;  %v10185_v12 = vadd.f32 %v7636_v46, %v4377_v42  ;;  %v7547_v21 = vpop.f32.mrb[39].mxu0  ;;  %v7640_v46 = vadd.f32 %v9974_v41, %v240_v39  ;;  %v242_v41 = vld [vmem:[%s10994_s2 + $0xb8] sm:$0xff]  ;;  %v10215_v39 = vpop.permute.xlu0 %5020 }
 0x389   : > { %11016 = vst [vmem:[#allocation22_spill] sm:$0xff] %v10215_v39 }
 0x38a   : > { %v8342_v7 = vpop.eup %8341  ;;  %8347 = vtanh.f32 %v10185_v12 }
 0x38b   : > { %5197 = vrot.lane.b32.xlu1 %v8342_v7, %s8649_s11 }
 0x38c   : > { %v8344_v25 = vpop.eup %8343 }
 0x38d   : > { %v2502_v22 = vpop.f32.mrb[44].mxu1  ;;  %v4382_v54 = vpop.f32.mrb[40].mxu0  ;;  %5199 = vrot.lane.b32.xlu0 %v8344_v25, %s8649_s11 }
 0x38e   : > { %v7194_v16 = vpop.f32.mrb[45].mxu1  ;;  %v10201_v30 = vadd.f32 %v7638_v31, %v4382_v54  ;;  %v7550_v42 = vpop.f32.mrb[41].mxu0  ;;  %v7642_v31 = vadd.f32 %v2502_v22, %v241_v37  ;;  %v243_v37 = vld [vmem:[%s10994_s2 + $0xc0] sm:$0xff] }
 0x38f   : > { %v2505_v21 = vpop.f32.mrb[46].mxu1  ;;  %v4385_v50 = vpop.f32.mrb[42].mxu0 }
 0x390   : > { %v7195_v7 = vpop.f32.mrb[47].mxu1  ;;  %8349 = vtanh.f32 %v10201_v30  ;;  %v10205_v17 = vadd.f32 %v7640_v46, %v4385_v50  ;;  %v7551_v28 = vpop.f32.mrb[43].mxu0 }
 0x391   : > { %v10217_v50 = vpop.permute.xlu1 %5022  ;;  %v7644_v7 = vadd.f32 %v2505_v21, %v242_v41  ;;  %v244_v21 = vld [vmem:[%s10994_s2 + $0xc8] sm:$0xff] }
 0x392   : > { %v8346_v16 = vpop.eup %8345  ;;  %8351 = vtanh.f32 %v10205_v17  ;;  %11017 = vst [vmem:[#allocation23_spill] sm:$0xff] %v10217_v50 }
 0x393   : > { %5201 = vrot.lane.b32.xlu1 %v8346_v16, %s8649_s11 }
 0x394   : > { %v8348_v54 = vpop.eup %8347 }
 0x395   : > { %v2510_v25 = vpop.f32.mrb[48].mxu1  ;;  %v4390_v46 = vpop.f32.mrb[44].mxu0  ;;  %5203 = vrot.lane.b32.xlu0 %v8348_v54, %s8649_s11  ;;  %v6523_v54 = vmul.f32 -1.442695, %v9984_v40  ;;  %v245_v40 = vld [vmem:[%s10994_s2 + $0xd0] sm:$0xff] }
 0x396   : > { %v7198_v42 = vpop.f32.mrb[49].mxu1  ;;  %v10219_v28 = vadd.f32 %v7642_v31, %v4390_v46  ;;  %v7554_v33 = vpop.f32.mrb[45].mxu0 }
 0x397   : > { %v2513_v29 = vpop.f32.mrb[50].mxu1  ;;  %v4393_v8 = vpop.f32.mrb[46].mxu0 }
 0x398   : > { %v7199_v1 = vpop.f32.mrb[51].mxu1  ;;  %8353 = vtanh.f32 %v10219_v28  ;;  %v10223_v16 = vadd.f32 %v7644_v7, %v4393_v8  ;;  %v7555_v22 = vpop.f32.mrb[47].mxu0  ;;  %v7648_v7 = vadd.f32 %v2513_v29, %v244_v21 }
 0x399   : > { %v10233_v33 = vpop.permute.xlu0 %5024  ;;  %v7646_v1 = vadd.f32 %v2510_v25, %v243_v37  ;;  %v10235_v8 = vpop.permute.xlu1 %5026 }
 0x39a   : > { %v8350_v39 = vpop.eup %8349  ;;  %8355 = vtanh.f32 %v10223_v16  ;;  %11018 = vst [vmem:[#allocation24_spill] sm:$0xff] %v10233_v33  ;;  %11019 = vst [vmem:[#allocation25_spill] sm:$0xff] %v10235_v8  ;;  %v6524_v8 = vmul.f32 -1.442695, %v9989_v19 }
 0x39b   : > { %5205 = vrot.lane.b32.xlu1 %v8350_v39, %s8649_s11 }
 0x39c   : > { %v8352_v31 = vpop.eup %8351 }
 0x39d   : > { %v2518_v41 = vpop.f32.mrb[52].mxu1  ;;  %v4398_v46 = vpop.f32.mrb[48].mxu0  ;;  %5207 = vrot.lane.b32.xlu0 %v8352_v31, %s8649_s11 }
 0x39e   : > { %v7202_v42 = vpop.f32.mrb[53].mxu1  ;;  %v10238_v22 = vadd.f32 %v7646_v1, %v4398_v46  ;;  %v7558_v50 = vpop.f32.mrb[49].mxu0 }
 0x39f   : > { %v2521_v0 = vpop.f32.mrb[54].mxu1  ;;  %v4401_v35 = vpop.f32.mrb[50].mxu0  ;;  %v246_v50 = vld [vmem:[%s10994_s2 + $0xd8] sm:$0xff] }
 0x3a0   : > { %v7203_v39 = vpop.f32.mrb[55].mxu1  ;;  %8357 = vtanh.f32 %v10238_v22  ;;  %v10242_v25 = vadd.f32 %v7648_v7, %v4401_v35  ;;  %v7559_v37 = vpop.f32.mrb[51].mxu0  ;;  %v7650_v35 = vadd.f32 %v2518_v41, %v245_v40  ;;  %v7652_v7 = vadd.f32 %v2521_v0, %v246_v50 }
 0x3a1   : > { %8359 = vpow2.f32 %v6523_v54  ;;  %v10253_v21 = vpop.permute.xlu0 %5028  ;;  %v10255_v31 = vpop.permute.xlu1 %5030  ;;  %v6525_v54 = vmul.f32 -1.442695, %v10004_v38  ;;  %v6526_v41 = vmul.f32 -1.442695, %v10009_v61  ;;  %v247_v38 = vld [vmem:[%s10994_s2 + $0xe0] sm:$0xff] }
 0x3a2   : > { %v8354_v29 = vpop.eup %8353  ;;  %8361 = vtanh.f32 %v10242_v25  ;;  %11020 = vst [vmem:[#allocation26_spill] sm:$0xff] %v10253_v21  ;;  %11021 = vst [vmem:[#allocation27_spill] sm:$0xff] %v10255_v31 }
 0x3a3   : > { %5209 = vrot.lane.b32.xlu1 %v8354_v29, %s8649_s11  ;;  %8363 = vpow2.f32 %v6524_v8 }
 0x3a4   : > { %v8356_v19 = vpop.eup %8355 }
 0x3a5   : > { %v2526_v1 = vpop.f32.mrb[56].mxu1  ;;  %v4406_v46 = vpop.f32.mrb[52].mxu0  ;;  %5211 = vrot.lane.b32.xlu0 %v8356_v19, %s8649_s11 }
 0x3a6   : > { %v7206_v42 = vpop.f32.mrb[57].mxu1  ;;  %v10258_v39 = vadd.f32 %v7650_v35, %v4406_v46  ;;  %v7562_v37 = vpop.f32.mrb[53].mxu0  ;;  %v248_v35 = vld [vmem:[%s10994_s2 + $0xe8] sm:$0xff] }
 0x3a7   : > { %v2529_v33 = vpop.f32.mrb[58].mxu1  ;;  %v4409_v29 = vpop.f32.mrb[54].mxu0  ;;  %v6527_v42 = vmul.f32 -1.442695, %v10027_v23 }
 0x3a8   : > { %v7207_v15 = vpop.f32.mrb[59].mxu1  ;;  %8365 = vtanh.f32 %v10258_v39  ;;  %v10263_v40 = vadd.f32 %v7652_v7, %v4409_v29  ;;  %v7563_v8 = vpop.f32.mrb[55].mxu0 }
 0x3a9   : > { %8367 = vpow2.f32 %v6525_v54  ;;  %v10273_v61 = vpop.permute.xlu0 %5032  ;;  %v7654_v15 = vadd.f32 %v2526_v1, %v247_v38  ;;  %v10275_v54 = vpop.permute.xlu1 %5034  ;;  %v7656_v8 = vadd.f32 %v2529_v33, %v248_v35  ;;  %v6528_v1 = vmul.f32 -1.442695, %v10033_v18  ;;  %v249_v33 = vld [vmem:[%s10994_s2 + $0xf0] sm:$0xff] }
 0x3aa   : > { %v8358_v0 = vpop.eup %8357  ;;  %8369 = vtanh.f32 %v10263_v40  ;;  %11022 = vst [vmem:[#allocation28_spill] sm:$0xff] %v10273_v61  ;;  %11023 = vst [vmem:[#allocation29_spill] sm:$0xff] %v10275_v54 }
 0x3ab   : > { %v8360_v50 = vpop.eup %8359  ;;  %5213 = vrot.lane.b32.xlu1 %v8358_v0, %s8649_s11  ;;  %8371 = vpow2.f32 %v6526_v41 }
 0x3ac   : > { %v8362_v46 = vpop.eup %8361  ;;  %v4714_v29 = vadd.f32 1.0, %v8360_v50 }
 0x3ad   : > { %v2534_v19 = vpop.f32.mrb[60].mxu1  ;;  %v4414_v7 = vpop.f32.mrb[56].mxu0  ;;  %5215 = vrot.lane.b32.xlu0 %v8362_v46, %s8649_s11 }
 0x3ae   : > { %v7210_v37 = vpop.f32.mrb[61].mxu1  ;;  %v10278_v31 = vadd.f32 %v7654_v15, %v4414_v7  ;;  %v7566_v21 = vpop.f32.mrb[57].mxu0  ;;  %v250_v15 = vld [vmem:[%s10994_s2 + $0xf8] sm:$0xff]  ;;  %v7658_v46 = vadd.f32 %v2534_v19, %v249_v33 }
 0x3af   : > { %v2537_v0 = vpop.f32.mrb[62].mxu1  ;;  %v8364_v9 = vpop.eup %8363 }
 0x3b0   : > { %v4417_v61 = vpop.f32.mrb[58].mxu0  ;;  %v7211_v41 = vpop.f32.mrb[63].mxu1  ;;  %8373 = vtanh.f32 %v10278_v31  ;;  %v4715_v35 = vadd.f32 1.0, %v8364_v9  ;;  %v6530_v9 = vmul.f32 -1.442695, %v10057_v56  ;;  %v7660_v54 = vadd.f32 %v2537_v0, %v250_v15  ;;  %v251_v56 = vld [vmem:[%s10994_s2 + $0x100] sm:$0xff] }
 0x3b1   : > { %v10283_v38 = vadd.f32 %v7656_v8, %v4417_v61  ;;  %v7567_v23 = vpop.f32.mrb[59].mxu0  ;;  %8375 = vpow2.f32 %v6527_v42  ;;  %v10293_v18 = vpop.permute.xlu0 %5036  ;;  %v6529_v61 = vmul.f32 -1.442695, %v10051_v59  ;;  %v6531_v15 = vmul.f32 -1.442695, %v10073_v63 }
 0x3b2   : > { %v8366_v50 = vpop.eup %8365  ;;  %8377 = vrcp.f32 %v4714_v29  ;;  %11024 = vst [vmem:[#allocation30_spill] sm:$0xff] %v10293_v18  ;;  %v10296_v7 = vpop.permute.xlu1 %5038 }
 0x3b3   : > { %v8368_v21 = vpop.eup %8367  ;;  %8379 = vtanh.f32 %v10283_v38  ;;  %5217 = vrot.lane.b32.xlu1 %v8366_v50, %s8649_s11  ;;  %11025 = vst [vmem:[#allocation31_spill] sm:$0xff] %v10296_v7 }
 0x3b4   : > { %8381 = vpow2.f32 %v6528_v1  ;;  %v8370_v37 = vpop.eup %8369  ;;  %v4716_v23 = vadd.f32 1.0, %v8368_v21 }
 0x3b5   : > { %v2542_v42 = vpop.f32.mrb[64].mxu1  ;;  %v4422_v29 = vpop.f32.mrb[60].mxu0  ;;  %8383 = vrcp.f32 %v4715_v35  ;;  %5219 = vrot.lane.b32.xlu0 %v8370_v37, %s8649_s11 }
 0x3b6   : > { %v7214_v8 = vpop.f32.mrb[65].mxu1  ;;  %v8372_v41 = vpop.eup %8371  ;;  %v10299_v14 = vadd.f32 %v7658_v46, %v4422_v29  ;;  %8385 = vpow2.f32 %v6529_v61  ;;  %v252_v61 = vld [vmem:[%s10994_s2 + $0x108] sm:$0xff]  ;;  %v6532_v46 = vmul.f32 -1.442695, %v10077_v48 }
 0x3b7   : > { %v7570_v1 = vpop.f32.mrb[61].mxu0  ;;  %v2545_v50 = vpop.f32.mrb[66].mxu1  ;;  %v4717_v18 = vadd.f32 1.0, %v8372_v41  ;;  %8387 = vpow2.f32 %v6530_v9 }
 0x3b8   : > { %v4425_v59 = vpop.f32.mrb[62].mxu0  ;;  %v7215_v19 = vpop.f32.mrb[67].mxu1  ;;  %8389 = vrcp.f32 %v4716_v23  ;;  %v7664_v23 = vadd.f32 %v2545_v50, %v252_v61  ;;  %v253_v50 = vld [vmem:[%s10994_s2 + $0x110] sm:$0xff] }
 0x3b9   : > { %v10302_v33 = vadd.f32 %v7660_v54, %v4425_v59  ;;  %v7571_v7 = vpop.f32.mrb[63].mxu0  ;;  %v10307_v0 = vpop.permute.xlu0 %5040 }
 0x3ba   : > { %v8374_v35 = vpop.eup %8373  ;;  %11026 = vst [vmem:[#allocation32_spill] sm:$0xff] %v10307_v0  ;;  %v7662_v7 = vadd.f32 %v2542_v42, %v251_v56 }
 0x3bb   : > { %v8376_v21 = vpop.eup %8375  ;;  %8391 = vtanh.f32 %v10302_v33  ;;  %5221 = vrot.lane.b32.xlu1 %v8374_v35, %s8649_s11 }
 0x3bc   : > { %v10315_v54 = vpop.eup %8377  ;;  %8393 = vtanh.f32 %v10299_v14  ;;  %v4718_v41 = vadd.f32 1.0, %v8376_v21 }
 0x3bd   : > { %v2550_v37 = vpop.f32.mrb[68].mxu1  ;;  %v8380_v9 = vpop.eup %8379  ;;  %8395 = vrcp.f32 %v4717_v18 }
 0x3be   : > { %v4430_v29 = vpop.f32.mrb[64].mxu0  ;;  %v5166_v63 = vpop.permute.xlu1 %5165  ;;  %5223 = vrot.lane.b32.xlu0 %v8380_v9, %s8649_s11  ;;  %8397 = vpow2.f32 %v6531_v15 }
 0x3bf   : > { %v8382_v8 = vpop.eup %8381  ;;  %v10319_v1 = vadd.f32 %v7662_v7, %v4430_v29  ;;  %v5288_v59 = vmul.f32 %v10315_v54, %v5166_v63  ;;  %v7218_v19 = vpop.f32.mrb[69].mxu1  ;;  %8399 = vpow2.f32 %v6532_v46  ;;  %v254_v46 = vld [vmem:[%s10994_s2 + $0x118] sm:$0xff]  ;;  %v6533_v29 = vmul.f32 -1.442695, %v10093_v57 }
 0x3c0   : > { %v7574_v35 = vpop.f32.mrb[65].mxu0  ;;  %v2553_v0 = vpop.f32.mrb[70].mxu1  ;;  %v4719_v21 = vadd.f32 1.0, %v8382_v8  ;;  %8401 = vrcp.f32 %v4718_v41  ;;  %v7666_v63 = vadd.f32 %v2550_v37, %v253_v50 }
 0x3c1   : > { %v4433_v48 = vpop.f32.mrb[66].mxu0  ;;  %v10323_v42 = vpop.eup %8383 }
 0x3c2   : > { %v10325_v18 = vadd.f32 %v7664_v23, %v4433_v48  ;;  %v5168_v56 = vpop.permute.xlu0 %5167  ;;  %v7219_v60 = vpop.f32.mrb[71].mxu1  ;;  %5370 = vrot.lane.b32.xlu0 %v5288_v59, %s8649_s11 }
 0x3c3   : > { %v5289_v61 = vmul.f32 %v10323_v42, %v5168_v56  ;;  %v7575_v7 = vpop.f32.mrb[67].mxu0  ;;  %v8386_v9 = vpop.eup %8385  ;;  %v7668_v56 = vadd.f32 %v2553_v0, %v254_v46  ;;  %v6534_v46 = vmul.f32 -1.442695, %v10099_v52 }
 0x3c4   : > { %v8388_v15 = vpop.eup %8387  ;;  %8403 = vtanh.f32 %v10325_v18  ;;  %v4720_v23 = vadd.f32 1.0, %v8386_v9 }
 0x3c5   : > { %5372 = vrot.lane.b32.xlu1 %v5289_v61, %s8649_s11  ;;  %v10337_v60 = vpop.eup %8389  ;;  %8405 = vtanh.f32 %v10319_v1  ;;  %v2558_v8 = vpop.f32.mrb[72].mxu1  ;;  %v4721_v48 = vadd.f32 1.0, %v8388_v15 }
 0x3c6   : > { %v8392_v41 = vpop.eup %8391  ;;  %8407 = vrcp.f32 %v4719_v21  ;;  %v4438_v59 = vpop.f32.mrb[68].mxu0 }
 0x3c7   : > { %v5170_v19 = vpop.permute.xlu1 %5169  ;;  %v8394_v35 = vpop.eup %8393  ;;  %v10341_v7 = vadd.f32 %v7666_v63, %v4438_v59  ;;  %5227 = vrot.lane.b32.xlu0 %v8392_v41, %s8649_s11  ;;  %8409 = vpow2.f32 %v6533_v29  ;;  %v256_v29 = vld [vmem:[%s10994_s2 + $0x128] sm:$0xff] }
 0x3c8   : > { %v5290_v61 = vmul.f32 %v10337_v60, %v5170_v19  ;;  %v7578_v47 = vpop.f32.mrb[69].mxu0  ;;  %v7222_v57 = vpop.f32.mrb[73].mxu1  ;;  %8411 = vrcp.f32 %v4720_v23 }
 0x3c9   : > { %v10345_v62 = vpop.eup %8395  ;;  %5225 = vrot.lane.b32.xlu1 %v8394_v35, %s8649_s11  ;;  %v4441_v37 = vpop.f32.mrb[70].mxu0  ;;  %v255_v47 = vld [vmem:[%s10994_s2 + $0x120] sm:$0xff]  ;;  %8413 = vrcp.f32 %v4721_v48 }
 0x3ca   : > { %v2561_v21 = vpop.f32.mrb[74].mxu1  ;;  %v10348_v50 = vadd.f32 %v7668_v56, %v4441_v37  ;;  %v5172_v9 = vpop.permute.xlu0 %5171  ;;  %v7670_v19 = vadd.f32 %v2558_v8, %v255_v47 }
 0x3cb   : > { %v7223_v15 = vpop.f32.mrb[75].mxu1  ;;  %v8398_v0 = vpop.eup %8397  ;;  %v5291_v63 = vmul.f32 %v10345_v62, %v5172_v9  ;;  %5374 = vrot.lane.b32.xlu0 %v5290_v61, %s8649_s11  ;;  %v6535_v9 = vmul.f32 -1.442695, %v10115_v53 }
 0x3cc   : > { %v7579_v41 = vpop.f32.mrb[71].mxu0  ;;  %v8400_v59 = vpop.eup %8399  ;;  %8415 = vtanh.f32 %v10348_v50  ;;  %v4722_v23 = vadd.f32 1.0, %v8398_v0  ;;  %v7672_v15 = vadd.f32 %v2561_v21, %v256_v29  ;;  %v6536_v21 = vmul.f32 -1.442695, %v10121_v20  ;;  %v257_v29 = vld [vmem:[%s10994_s2 + $0x130] sm:$0xff] }
 0x3cd   : > { %5376 = vrot.lane.b32.xlu1 %v5291_v63, %s8649_s11  ;;  %v10361_v52 = vpop.eup %8401  ;;  %8417 = vtanh.f32 %v10341_v7  ;;  %v2566_v35 = vpop.f32.mrb[76].mxu1  ;;  %v4723_v57 = vadd.f32 1.0, %v8400_v59 }
 0x3ce   : > { %v8404_v56 = vpop.eup %8403  ;;  %8419 = vpow2.f32 %v6534_v46  ;;  %v4446_v48 = vpop.f32.mrb[72].mxu0 }
 0x3cf   : > { %v5174_v61 = vpop.permute.xlu1 %5173  ;;  %v8406_v37 = vpop.eup %8405  ;;  %v10365_v41 = vadd.f32 %v7670_v19, %v4446_v48  ;;  %5231 = vrot.lane.b32.xlu0 %v8404_v56, %s8649_s11  ;;  %8421 = vrcp.f32 %v4722_v23  ;;  %v258_v23 = vld [vmem:[%s10994_s2 + $0x138] sm:$0xff] }
 0x3d0   : > { %v5292_v63 = vmul.f32 %v10361_v52, %v5174_v61  ;;  %v7582_v0 = vpop.f32.mrb[73].mxu0  ;;  %v7226_v13 = vpop.f32.mrb[77].mxu1  ;;  %8423 = vrcp.f32 %v4723_v57  ;;  %v7674_v57 = vadd.f32 %v2566_v35, %v257_v29 }
 0x3d1   : > { %v10369_v45 = vpop.eup %8407  ;;  %5229 = vrot.lane.b32.xlu1 %v8406_v37, %s8649_s11  ;;  %v4449_v8 = vpop.f32.mrb[74].mxu0  ;;  %8425 = vpow2.f32 %v6535_v9 }
 0x3d2   : > { %v2569_v46 = vpop.f32.mrb[78].mxu1  ;;  %v10372_v47 = vadd.f32 %v7672_v15, %v4449_v8  ;;  %v5176_v59 = vpop.permute.xlu0 %5175  ;;  %v6537_v8 = vmul.f32 -1.442695, %v10137_v24  ;;  %v6538_v24 = vmul.f32 -1.442695, %v10141_v4 }
 0x3d3   : > { %v7227_v53 = vpop.f32.mrb[79].mxu1  ;;  %v5293_v13 = vmul.f32 %v10369_v45, %v5176_v59  ;;  %v7583_v19 = vpop.f32.mrb[75].mxu0  ;;  %5378 = vrot.lane.b32.xlu0 %v5292_v63, %s8649_s11  ;;  %v7676_v59 = vadd.f32 %v2569_v46, %v258_v23  ;;  %v259_v46 = vld [vmem:[%s10994_s2 + $0x140] sm:$0xff] }
 0x3d4   : > { %v8410_v56 = vpop.eup %8409  ;;  %8427 = vtanh.f32 %v10372_v47 }
 0x3d5   : > { %v10380_v48 = vpop.eup %8411  ;;  %5380 = vrot.lane.b32.xlu1 %v5293_v13, %s8649_s11  ;;  %8429 = vtanh.f32 %v10365_v41  ;;  %v2574_v61 = vpop.f32.mrb[80].mxu1  ;;  %v4724_v9 = vadd.f32 1.0, %v8410_v56 }
 0x3d6   : > { %v10387_v20 = vpop.eup %8413  ;;  %8431 = vpow2.f32 %v6536_v21  ;;  %v4454_v15 = vpop.f32.mrb[76].mxu0  ;;  %v7678_v4 = vadd.f32 %v2574_v61, %v259_v46  ;;  %v6540_v46 = vmul.f32 -1.442695, %v10163_v10  ;;  %v6541_v10 = vmul.f32 -1.442695, %v10179_v27 }
 0x3d7   : > { %v8416_v37 = vpop.eup %8415  ;;  %v5178_v63 = vpop.permute.xlu1 %5177  ;;  %v10391_v53 = vadd.f32 %v7674_v57, %v4454_v15  ;;  %8433 = vrcp.f32 %v4724_v9 }
 0x3d8   : > { %v8418_v0 = vpop.eup %8417  ;;  %v5294_v19 = vmul.f32 %v10380_v48, %v5178_v63  ;;  %5235 = vrot.lane.b32.xlu0 %v8416_v37, %s8649_s11  ;;  %v7586_v13 = vpop.f32.mrb[77].mxu0  ;;  %8435 = vpow2.f32 %v6537_v8 }
 0x3d9   : > { %v7230_v51 = vpop.f32.mrb[81].mxu1  ;;  %v8420_v32 = vpop.eup %8419  ;;  %5233 = vrot.lane.b32.xlu1 %v8418_v0, %s8649_s11 }
 0x3da   : > { %v4457_v35 = vpop.f32.mrb[78].mxu0  ;;  %v2577_v29 = vpop.f32.mrb[82].mxu1  ;;  %v4725_v37 = vadd.f32 1.0, %v8420_v32  ;;  %v6539_v32 = vmul.f32 -1.442695, %v10157_v6 }
 0x3db   : > { %v10396_v21 = vadd.f32 %v7676_v59, %v4457_v35  ;;  %v5180_v56 = vpop.permute.xlu0 %5179  ;;  %v7231_v36 = vpop.f32.mrb[83].mxu1 }
 0x3dc   : > { %v5295_v23 = vmul.f32 %v10387_v20, %v5180_v56  ;;  %v7587_v57 = vpop.f32.mrb[79].mxu0  ;;  %v10403_v51 = vpop.eup %8421  ;;  %5382 = vrot.lane.b32.xlu0 %v5294_v19, %s8649_s11 }
 0x3dd   : > { %v10406_v15 = vpop.eup %8423  ;;  %8437 = vtanh.f32 %v10396_v21  ;;  %v4462_v63 = vpop.f32.mrb[80].mxu0 }
 0x3de   : > { %5384 = vrot.lane.b32.xlu1 %v5295_v23, %s8649_s11  ;;  %v8426_v36 = vpop.eup %8425  ;;  %8439 = vtanh.f32 %v10391_v53  ;;  %v5182_v0 = vpop.permute.xlu1 %5181  ;;  %v10412_v8 = vadd.f32 %v7678_v4, %v4462_v63 }
 0x3df   : > { %v8428_v9 = vpop.eup %8427  ;;  %8441 = vpow2.f32 %v6538_v24  ;;  %v5296_v19 = vmul.f32 %v10403_v51, %v5182_v0  ;;  %v7590_v13 = vpop.f32.mrb[81].mxu0  ;;  %v4726_v29 = vadd.f32 1.0, %v8426_v36 }
 0x3e0   : > { %v8430_v59 = vpop.eup %8429  ;;  %8443 = vrcp.f32 %v4725_v37  ;;  %5239 = vrot.lane.b32.xlu0 %v8428_v9, %s8649_s11  ;;  %v4465_v61 = vpop.f32.mrb[82].mxu0  ;;  %v6542_v13 = vmul.f32 -1.442695, %v10185_v12 }
 0x3e1   : > { %v8432_v35 = vpop.eup %8431  ;;  %v5184_v56 = vpop.permute.xlu0 %5183  ;;  %8445 = vpow2.f32 %v6539_v32 }
 0x3e2   : > { %5237 = vrot.lane.b32.xlu1 %v8430_v59, %s8649_s11  ;;  %v7591_v24 = vpop.f32.mrb[83].mxu0  ;;  %v5297_v23 = vmul.f32 %v10406_v15, %v5184_v56  ;;  %v4727_v57 = vadd.f32 1.0, %v8432_v35  ;;  %v10420_v6 = vpop.eup %8433  ;;  %8447 = vrcp.f32 %v4726_v29 }
 0x3e3   : > { %v8436_v37 = vpop.eup %8435  ;;  %8449 = vtanh.f32 %v10412_v8 }
 0x3e4   : > { %5386 = vrot.lane.b32.xlu0 %v5296_v19, %s8649_s11  ;;  %8451 = vpow2.f32 %v6540_v46  ;;  %v4728_v59 = vadd.f32 1.0, %v8436_v37  ;;  %v6543_v46 = vmul.f32 -1.442695, %v10201_v30 }
 0x3e5   : > { %v5186_v4 = vpop.permute.xlu1 %5185  ;;  %8453 = vrcp.f32 %v4727_v57 }
 0x3e6   : > { %5388 = vrot.lane.b32.xlu1 %v5297_v23, %s8649_s11  ;;  %v5298_v63 = vmul.f32 %v10420_v6, %v5186_v4  ;;  %8455 = vpow2.f32 %v6541_v10  ;;  %v6544_v4 = vmul.f32 -1.442695, %v10205_v17 }
 0x3e7   : > { %v8438_v36 = vpop.eup %8437  ;;  %v5188_v19 = vpop.permute.xlu0 %5187  ;;  %8457 = vrcp.f32 %v4728_v59 }
 0x3e8   : > { %v8440_v9 = vpop.eup %8439  ;;  %5243 = vrot.lane.b32.xlu0 %v8438_v36, %s8649_s11  ;;  %8459 = vpow2.f32 %v6542_v13 }
 0x3e9   : > { %v8442_v0 = vpop.eup %8441 }
 0x3ea   : > { %5241 = vrot.lane.b32.xlu1 %v8440_v9, %s8649_s11  ;;  %v10428_v32 = vpop.eup %8443  ;;  %v4729_v29 = vadd.f32 1.0, %v8442_v0 }
 0x3eb   : > { %v5299_v35 = vmul.f32 %v10428_v32, %v5188_v19  ;;  %v8446_v27 = vpop.eup %8445 }
 0x3ec   : > { %5390 = vrot.lane.b32.xlu0 %v5298_v63, %s8649_s11  ;;  %v10434_v61 = vpop.eup %8447  ;;  %8461 = vrcp.f32 %v4729_v29  ;;  %v4730_v57 = vadd.f32 1.0, %v8446_v27  ;;  %v6545_v63 = vmul.f32 -1.442695, %v10219_v28  ;;  %v6546_v27 = vmul.f32 -1.442695, %v10223_v16 }
 0x3ed   : > { %v5190_v56 = vpop.permute.xlu1 %5189  ;;  %v8450_v24 = vpop.eup %8449  ;;  %8463 = vpow2.f32 %v6543_v46 }
 0x3ee   : > { %5392 = vrot.lane.b32.xlu1 %v5299_v35, %s8649_s11  ;;  %v5300_v12 = vmul.f32 %v10434_v61, %v5190_v56  ;;  %v8452_v23 = vpop.eup %8451  ;;  %8465 = vrcp.f32 %v4730_v57 }
 0x3ef   : > { %v10439_v37 = vpop.eup %8453  ;;  %v5192_v36 = vpop.permute.xlu0 %5191  ;;  %v4731_v10 = vadd.f32 1.0, %v8452_v23  ;;  %8467 = vpow2.f32 %v6544_v4  ;;  %v6547_v23 = vmul.f32 -1.442695, %v10238_v22 }
 0x3f0   : > { %5394 = vrot.lane.b32.xlu0 %v5300_v12, %s8649_s11  ;;  %v5301_v9 = vmul.f32 %v10439_v37, %v5192_v36  ;;  %v8456_v30 = vpop.eup %8455 }
 0x3f1   : > { %v10446_v0 = vpop.eup %8457  ;;  %8469 = vrcp.f32 %v4731_v10  ;;  %v4732_v35 = vadd.f32 1.0, %v8456_v30  ;;  %v6548_v10 = vmul.f32 -1.442695, %v10242_v25  ;;  %v6550_v25 = vmul.f32 -1.442695, %v10263_v40 }
 0x3f2   : > { %5245 = vrot.lane.b32.xlu1 %v8450_v24, %s8649_s11  ;;  %v8460_v13 = vpop.eup %8459  ;;  %8471 = vpow2.f32 %v6545_v63  ;;  %v6551_v40 = vmul.f32 -1.442695, %v10278_v31 }
 0x3f3   : > { %v4733_v28 = vadd.f32 1.0, %v8460_v13  ;;  %8473 = vrcp.f32 %v4732_v35  ;;  %v6549_v35 = vmul.f32 -1.442695, %v10258_v39 }
 0x3f4   : > { %8475 = vpow2.f32 %v6546_v27 }
 0x3f5   : > { %v5194_v59 = vpop.permute.xlu1 %5193  ;;  %8477 = vrcp.f32 %v4733_v28 }
 0x3f6   : > { %5396 = vrot.lane.b32.xlu1 %v5301_v9, %s8649_s11  ;;  %v5302_v19 = vmul.f32 %v10446_v0, %v5194_v59  ;;  %v10449_v17 = vpop.eup %8461  ;;  %8479 = vpow2.f32 %v6547_v23 }
 0x3f7   : > { %v5196_v29 = vpop.permute.xlu0 %5195  ;;  %v8464_v24 = vpop.eup %8463 }
 0x3f8   : > { %5398 = vrot.lane.b32.xlu0 %v5302_v19, %s8649_s11  ;;  %v5303_v56 = vmul.f32 %v10449_v17, %v5196_v29  ;;  %v10455_v46 = vpop.eup %8465  ;;  %v4734_v4 = vadd.f32 1.0, %v8464_v24 }
 0x3f9   : > { %v8468_v36 = vpop.eup %8467 }
 0x3fa   : > { %5400 = vrot.lane.b32.xlu1 %v5303_v56, %s8649_s11  ;;  %v4735_v59 = vadd.f32 1.0, %v8468_v36  ;;  %8481 = vrcp.f32 %v4734_v4 }
 0x3fb   : > { %v10459_v9 = vpop.eup %8469  ;;  %8483 = vpow2.f32 %v6548_v10 }
 0x3fc   : > { %v8472_v63 = vpop.eup %8471  ;;  %8485 = vrcp.f32 %v4735_v59 }
 0x3fd   : > { %v5198_v12 = vpop.permute.xlu1 %5197  ;;  %v10465_v22 = vpop.eup %8473  ;;  %v4736_v19 = vadd.f32 1.0, %v8472_v63 }
 0x3fe   : > { %v5304_v57 = vmul.f32 %v10455_v46, %v5198_v12  ;;  %v8476_v27 = vpop.eup %8475 }
 0x3ff   : > { %v5200_v16 = vpop.permute.xlu0 %5199  ;;  %v10470_v56 = vpop.eup %8477  ;;  %8487 = vrcp.f32 %v4736_v19  ;;  %v4737_v12 = vadd.f32 1.0, %v8476_v27 }
 0x400   : > { %5402 = vrot.lane.b32.xlu0 %v5304_v57, %s8649_s11  ;;  %v5305_v30 = vmul.f32 %v10459_v9, %v5200_v16  ;;  %8489 = vpow2.f32 %v6549_v35  ;;  %v8480_v23 = vpop.eup %8479 }
 0x401   : > { %8491 = vpow2.f32 %v6550_v25  ;;  %v4738_v16 = vadd.f32 1.0, %v8480_v23 }
 0x402   : > { %5404 = vrot.lane.b32.xlu1 %v5305_v30, %s8649_s11  ;;  %8493 = vrcp.f32 %v4737_v12  ;;  %v6552_v30 = vmul.f32 -1.442695, %v10283_v38  ;;  %v6554_v12 = vmul.f32 -1.442695, %v10302_v33 }
 0x403   : > { %8495 = vpow2.f32 %v6551_v40 }
 0x404   : > { %v10475_v39 = vpop.eup %8481  ;;  %8497 = vrcp.f32 %v4738_v16 }
 0x405   : > { %v5202_v13 = vpop.permute.xlu1 %5201  ;;  %v8484_v4 = vpop.eup %8483  ;;  %8499 = vpow2.f32 %v6552_v30 }
 0x406   : > { %v5306_v29 = vmul.f32 %v10465_v22, %v5202_v13  ;;  %v10479_v10 = vpop.eup %8485  ;;  %v4739_v19 = vadd.f32 1.0, %v8484_v4 }
 0x407   : > { %v5204_v28 = vpop.permute.xlu0 %5203 }
 0x408   : > { %5406 = vrot.lane.b32.xlu0 %v5306_v29, %s8649_s11  ;;  %v5307_v24 = vmul.f32 %v10470_v56, %v5204_v28  ;;  %8501 = vrcp.f32 %v4739_v19 }
 0x409   : > { %v10484_v13 = vpop.eup %8487 }
 0x40a   : > { %5408 = vrot.lane.b32.xlu1 %v5307_v24, %s8649_s11  ;;  %v8490_v31 = vpop.eup %8489 }
 0x40b   : > { %v8492_v35 = vpop.eup %8491  ;;  %v4740_v38 = vadd.f32 1.0, %v8490_v31  ;;  %v6555_v31 = vmul.f32 -1.442695, %v10319_v1 }
 0x40c   : > { %v10488_v25 = vpop.eup %8493  ;;  %v4741_v28 = vadd.f32 1.0, %v8492_v35 }
 0x40d   : > { %v5206_v57 = vpop.permute.xlu1 %5205  ;;  %8503 = vrcp.f32 %v4740_v38  ;;  %v8496_v40 = vpop.eup %8495  ;;  %v6556_v38 = vmul.f32 -1.442695, %v10325_v18  ;;  %v6557_v18 = vmul.f32 -1.442695, %v10341_v7 }
 0x40e   : > { %v5308_v36 = vmul.f32 %v10475_v39, %v5206_v57  ;;  %v6553_v57 = vmul.f32 -1.442695, %v10299_v14  ;;  %8505 = vrcp.f32 %v4741_v28 }
 0x40f   : > { %v5208_v63 = vpop.permute.xlu0 %5207  ;;  %8507 = vpow2.f32 %v6554_v12 }
 0x410   : > { %5410 = vrot.lane.b32.xlu0 %v5308_v36, %s8649_s11  ;;  %v5309_v59 = vmul.f32 %v10479_v10, %v5208_v63  ;;  %v10495_v36 = vpop.eup %8497  ;;  %8509 = vpow2.f32 %v6553_v57  ;;  %v4742_v63 = vadd.f32 1.0, %v8496_v40 }
 0x411   : > { %v8500_v16 = vpop.eup %8499 }
 0x412   : > { %5412 = vrot.lane.b32.xlu1 %v5309_v59, %s8649_s11  ;;  %v10498_v59 = vpop.eup %8501  ;;  %v4743_v14 = vadd.f32 1.0, %v8500_v16  ;;  %8511 = vrcp.f32 %v4742_v63 }
 0x414   : > { %8513 = vrcp.f32 %v4743_v14 }
 0x415   : > { %v5210_v29 = vpop.permute.xlu1 %5209  ;;  %8515 = vpow2.f32 %v6555_v31  ;;  %v6558_v31 = vmul.f32 -1.442695, %v10348_v50 }
 0x416   : > { %v5310_v27 = vmul.f32 %v10484_v13, %v5210_v29  ;;  %8517 = vpow2.f32 %v6556_v38 }
 0x417   : > { %v5212_v24 = vpop.permute.xlu0 %5211  ;;  %v10504_v35 = vpop.eup %8503 }
 0x418   : > { %5414 = vrot.lane.b32.xlu0 %v5310_v27, %s8649_s11  ;;  %v5311_v23 = vmul.f32 %v10488_v25, %v5212_v24  ;;  %v10506_v27 = vpop.eup %8505 }
 0x419   : > { %v8508_v24 = vpop.eup %8507 }
 0x41a   : > { %5416 = vrot.lane.b32.xlu1 %v5311_v23, %s8649_s11  ;;  %v8510_v12 = vpop.eup %8509  ;;  %v4745_v57 = vadd.f32 1.0, %v8508_v24 }
 0x41b   : > { %v4744_v40 = vadd.f32 1.0, %v8510_v12 }
 0x41c   : > { %8519 = vrcp.f32 %v4745_v57 }
 0x41d   : > { %v5214_v4 = vpop.permute.xlu1 %5213  ;;  %8521 = vrcp.f32 %v4744_v40 }
 0x41e   : > { %v5312_v30 = vmul.f32 %v10495_v36, %v5214_v4  ;;  %v10513_v4 = vpop.eup %8511  ;;  %8523 = vpow2.f32 %v6557_v18  ;;  %v6559_v18 = vmul.f32 -1.442695, %v10365_v41  ;;  %v6560_v41 = vmul.f32 -1.442695, %v10372_v47 }
 0x41f   : > { %v5216_v33 = vpop.permute.xlu0 %5215  ;;  %v10517_v63 = vpop.eup %8513  ;;  %8525 = vpow2.f32 %v6558_v31 }
 0x420   : > { %5418 = vrot.lane.b32.xlu0 %v5312_v30, %s8649_s11  ;;  %v5313_v19 = vmul.f32 %v10498_v59, %v5216_v33  ;;  %v8516_v33 = vpop.eup %8515 }
 0x421   : > { %v4746_v38 = vadd.f32 1.0, %v8516_v33  ;;  %v8518_v7 = vpop.eup %8517  ;;  %v5085_v33 = vmul.f32 %v10337_v60, %v9991_v49 }
 0x422   : > { %5420 = vrot.lane.b32.xlu1 %v5313_v19, %s8649_s11  ;;  %v4747_v57 = vadd.f32 1.0, %v8518_v7 }
 0x423   : > { %8527 = vrcp.f32 %v4746_v38 }
 0x425   : > { %v5218_v29 = vpop.permute.xlu1 %5217 }
 0x426   : > { %v5314_v28 = vmul.f32 %v10504_v35, %v5218_v29  ;;  %v5083_v29 = vmul.f32 %v10315_v54, %v9986_v43  ;;  %v10528_v50 = vpop.eup %8519 }
 0x427   : > { %v5220_v23 = vpop.permute.xlu0 %5219  ;;  %v10531_v40 = vpop.eup %8521 }
 0x428   : > { %5422 = vrot.lane.b32.xlu0 %v5314_v28, %s8649_s11  ;;  %v5315_v1 = vmul.f32 %v10506_v27, %v5220_v23  ;;  %v5084_v28 = vmul.f32 %v10323_v42, %v10001_v3 }
 0x42a   : > { %5424 = vrot.lane.b32.xlu1 %v5315_v1, %s8649_s11 }
 0x42d   : > { %v5222_v16 = vpop.permute.xlu1 %5221 }
 0x42e   : > { %v5316_v30 = vmul.f32 %v10513_v4, %v5222_v16 }
 0x430   : > { %v5224_v14 = vpop.permute.xlu0 %5223  ;;  %5426 = vrot.lane.b32.xlu0 %v5316_v30, %s8649_s11 }
 0x431   : > { %v5317_v19 = vmul.f32 %v10517_v63, %v5224_v14  ;;  %v8524_v14 = vpop.eup %8523 }
 0x433   : > { %5428 = vrot.lane.b32.xlu1 %v5317_v19, %s8649_s11  ;;  %v5086_v19 = vmul.f32 %v10345_v62, %v10006_v58 }
 0x434   : > { %v5371_v24 = vpop.permute.xlu0 %5370 }
 0x435   : > { %v5493_v12 = vadd.f32 %v5371_v24, %v5083_v29  ;;  %v8526_v24 = vpop.eup %8525 }
 0x436   : > { %v10545_v58 = vpop.eup %8527 }
 0x437   : > { %v5373_v23 = vpop.permute.xlu1 %5372  ;;  %5821 = vrot.lane.b32.xlu0 %v5493_v12, %s8650_s29  ;;  %8529 = vtanh.f32 %v5493_v12 }
 0x438   : > { %v5494_v1 = vadd.f32 %v5373_v23, %v5084_v28  ;;  %8531 = vrcp.f32 %v4747_v57  ;;  %v4748_v28 = vadd.f32 1.0, %v8524_v14  ;;  %v4749_v57 = vadd.f32 1.0, %v8526_v24 }
 0x439   : > { %v5228_v43 = vpop.permute.xlu0 %5227  ;;  %v5087_v14 = vmul.f32 %v10361_v52, %v10014_v2 }
 0x43a   : > { %5823 = vrot.lane.b32.xlu1 %v5494_v1, %s8650_s29  ;;  %v5319_v3 = vmul.f32 %v10528_v50, %v5228_v43  ;;  %8533 = vtanh.f32 %v5494_v1 }
 0x43b   : > { %v5226_v16 = vpop.permute.xlu1 %5225  ;;  %8535 = vpow2.f32 %v6559_v18 }
 0x43c   : > { %v5318_v30 = vmul.f32 %v10531_v40, %v5226_v16  ;;  %8537 = vpow2.f32 %v6560_v41 }
 0x43d   : > { %v5375_v31 = vpop.permute.xlu0 %5374  ;;  %8539 = vrcp.f32 %v4748_v28 }
 0x43e   : > { %5430 = vrot.lane.b32.xlu0 %v5318_v30, %s8649_s11  ;;  %5432 = vrot.lane.b32.xlu1 %v5319_v3, %s8649_s11  ;;  %v5495_v29 = vadd.f32 %v5375_v31, %v5085_v33  ;;  %v6561_v3 = vmul.f32 -1.442695, %v10391_v53  ;;  %v6562_v53 = vmul.f32 -1.442695, %v10396_v21 }
 0x43f   : > { %v5377_v38 = vpop.permute.xlu1 %5376 }
 0x440   : > { %v5496_v7 = vadd.f32 %v5377_v38, %v5086_v19  ;;  %8541 = vtanh.f32 %v5495_v29  ;;  %v5088_v19 = vmul.f32 %v10369_v45, %v10016_v5 }
 0x441   : > { %v5232_v49 = vpop.permute.xlu0 %5231  ;;  %v8530_v1 = vpop.eup %8529  ;;  %8543 = vrcp.f32 %v4749_v57 }
 0x442   : > { %5825 = vrot.lane.b32.xlu0 %v5495_v29, %s8650_s29  ;;  %5827 = vrot.lane.b32.xlu1 %v5496_v7, %s8650_s29  ;;  %v10550_v47 = vpop.eup %8531  ;;  %8545 = vtanh.f32 %v5496_v7 }
 0x443   : > { %v5230_v12 = vpop.permute.xlu1 %5229  ;;  %v5321_v16 = vmul.f32 %v10550_v47, %v5232_v49  ;;  %8547 = vpow2.f32 %v6561_v3 }
 0x444   : > { %v5320_v23 = vmul.f32 %v10545_v58, %v5230_v12  ;;  %v8534_v30 = vpop.eup %8533  ;;  %8549 = vpow2.f32 %v6562_v53 }
 0x445   : > { %v5379_v18 = vpop.permute.xlu0 %5378  ;;  %v8536_v33 = vpop.eup %8535 }
 0x446   : > { %5434 = vrot.lane.b32.xlu0 %v5320_v23, %s8649_s11  ;;  %5616 = vrot.lane.b32.xlu1 %v8530_v1, %s8649_s11  ;;  %v5497_v29 = vadd.f32 %v5379_v18, %v5087_v14  ;;  %v4750_v41 = vadd.f32 1.0, %v8536_v33  ;;  %v8538_v28 = vpop.eup %8537  ;;  %v6563_v23 = vmul.f32 -1.442695, %v10412_v8  ;;  %v5090_v18 = vmul.f32 %v10387_v20, %v10030_v26 }
 0x447   : > { %v5381_v43 = vpop.permute.xlu1 %5380  ;;  %v10563_v2 = vpop.eup %8539  ;;  %v4751_v7 = vadd.f32 1.0, %v8538_v28 }
 0x448   : > { %v5498_v38 = vadd.f32 %v5381_v43, %v5088_v19  ;;  %8551 = vrcp.f32 %v4750_v41 }
 0x449   : > { %8553 = vtanh.f32 %v5497_v29 }
 0x44a   : > { %5618 = vrot.lane.b32.xlu0 %v8534_v30, %s8649_s11  ;;  %5436 = vrot.lane.b32.xlu1 %v5321_v16, %s8649_s11  ;;  %v5236_v24 = vpop.permute.xlu0 %5235  ;;  %v8542_v49 = vpop.eup %8541  ;;  %8555 = vrcp.f32 %v4751_v7  ;;  %v5089_v16 = vmul.f32 %v10380_v48, %v10024_v11  ;;  %v5091_v7 = vmul.f32 %v10403_v51, %v10038_v55 }
 0x44b   : > { %v5234_v31 = vpop.permute.xlu1 %5233  ;;  %v10568_v21 = vpop.eup %8543  ;;  %8557 = vtanh.f32 %v5498_v38 }
 0x44c   : > { %v5322_v5 = vmul.f32 %v10563_v2, %v5234_v31  ;;  %v5323_v1 = vmul.f32 %v10568_v21, %v5236_v24  ;;  %v8546_v43 = vpop.eup %8545  ;;  %8559 = vpow2.f32 %v6563_v23 }
 0x44d   : > { %v8548_v3 = vpop.eup %8547 }
 0x44e   : > { %5829 = vrot.lane.b32.xlu0 %v5497_v29, %s8650_s29  ;;  %5831 = vrot.lane.b32.xlu1 %v5498_v38, %s8650_s29  ;;  %v5383_v57 = vpop.permute.xlu0 %5382  ;;  %v4752_v14 = vadd.f32 1.0, %v8548_v3  ;;  %v8550_v19 = vpop.eup %8549 }
 0x44f   : > { %v5499_v8 = vadd.f32 %v5383_v57, %v5089_v16  ;;  %v4753_v29 = vadd.f32 1.0, %v8550_v19  ;;  %v5093_v19 = vmul.f32 %v10420_v6, %v10048_v44 }
 0x450   : > { %v5385_v12 = vpop.permute.xlu1 %5384  ;;  %8561 = vrcp.f32 %v4752_v14 }
 0x451   : > { %v5500_v33 = vadd.f32 %v5385_v12, %v5090_v18  ;;  %8563 = vtanh.f32 %v5499_v8  ;;  %v5092_v12 = vmul.f32 %v10406_v15, %v10040_v34 }
 0x452   : > { %5438 = vrot.lane.b32.xlu0 %v5322_v5, %s8649_s11  ;;  %5620 = vrot.lane.b32.xlu1 %v8542_v49, %s8649_s11  ;;  %v5240_v31 = vpop.permute.xlu0 %5239  ;;  %v10580_v11 = vpop.eup %8551  ;;  %8565 = vrcp.f32 %v4753_v29 }
 0x453   : > { %v8554_v53 = vpop.eup %8553  ;;  %8567 = vtanh.f32 %v5500_v33 }
 0x454   : > { %v5238_v30 = vpop.permute.xlu1 %5237  ;;  %v10585_v38 = vpop.eup %8555 }
 0x455   : > { %v5324_v26 = vmul.f32 %v10580_v11, %v5238_v30  ;;  %v5325_v28 = vmul.f32 %v10585_v38, %v5240_v31  ;;  %v8558_v5 = vpop.eup %8557  ;;  %v11027_v31 = vld [vmem:[#allocation3_spill] sm:$0xff] }
 0x456   : > { %5622 = vrot.lane.b32.xlu0 %v8546_v43, %s8649_s11  ;;  %5440 = vrot.lane.b32.xlu1 %v5323_v1, %s8649_s11  ;;  %v5387_v24 = vpop.permute.xlu0 %5386  ;;  %v8560_v49 = vpop.eup %8559 }
 0x457   : > { %v5501_v1 = vadd.f32 %v5387_v24, %v5091_v7  ;;  %v4754_v43 = vadd.f32 1.0, %v8560_v49  ;;  %v11028_v49 = vld [vmem:[#allocation4_spill] sm:$0xff] }
 0x458   : > { %v5389_v41 = vpop.permute.xlu1 %5388  ;;  %v5095_v7 = vmul.f32 %v10434_v61, %v11028_v49  ;;  %v11033_v49 = vld [vmem:[#allocation9_spill] sm:$0xff] }
 0x459   : > { %v5502_v57 = vadd.f32 %v5389_v41, %v5092_v12  ;;  %8569 = vrcp.f32 %v4754_v43 }
 0x45a   : > { %5833 = vrot.lane.b32.xlu0 %v5499_v8, %s8650_s29  ;;  %5835 = vrot.lane.b32.xlu1 %v5500_v33, %s8650_s29  ;;  %v5244_v3 = vpop.permute.xlu0 %5243  ;;  %v10596_v16 = vpop.eup %8561  ;;  %8571 = vtanh.f32 %v5501_v1 }
 0x45b   : > { %v8564_v18 = vpop.eup %8563  ;;  %8573 = vtanh.f32 %v5502_v57 }
 0x45c   : > { %v5242_v23 = vpop.permute.xlu1 %5241  ;;  %v10601_v30 = vpop.eup %8565 }
 0x45d   : > { %v5326_v55 = vmul.f32 %v10596_v16, %v5242_v23  ;;  %v5327_v8 = vmul.f32 %v10601_v30, %v5244_v3  ;;  %v8568_v14 = vpop.eup %8567  ;;  %v11029_v23 = vld [vmem:[#allocation5_spill] sm:$0xff] }
 0x45e   : > { %5442 = vrot.lane.b32.xlu0 %v5324_v26, %s8649_s11  ;;  %5624 = vrot.lane.b32.xlu1 %v8554_v53, %s8649_s11  ;;  %v5391_v33 = vpop.permute.xlu0 %5390  ;;  %v5094_v26 = vmul.f32 %v10428_v32, %v11027_v31 }
 0x45f   : > { %v5503_v53 = vadd.f32 %v5391_v33, %v5093_v19 }
 0x460   : > { %v5393_v34 = vpop.permute.xlu1 %5392 }
 0x461   : > { %v5504_v41 = vadd.f32 %v5393_v34, %v5094_v26  ;;  %8575 = vtanh.f32 %v5503_v53  ;;  %v11030_v34 = vld [vmem:[#allocation6_spill] sm:$0xff] }
 0x462   : > { %5626 = vrot.lane.b32.xlu0 %v8558_v5, %s8649_s11  ;;  %5444 = vrot.lane.b32.xlu1 %v5325_v28, %s8649_s11  ;;  %v5395_v24 = vpop.permute.xlu0 %5394 }
 0x463   : > { %v10612_v28 = vpop.eup %8569  ;;  %8577 = vtanh.f32 %v5504_v41 }
 0x464   : > { %v5246_v29 = vpop.permute.xlu1 %5245  ;;  %v8572_v5 = vpop.eup %8571 }
 0x465   : > { %v5328_v44 = vmul.f32 %v10612_v28, %v5246_v29  ;;  %v8574_v3 = vpop.eup %8573 }
 0x466   : > { %5837 = vrot.lane.b32.xlu0 %v5501_v1, %s8650_s29  ;;  %5839 = vrot.lane.b32.xlu1 %v5502_v57, %s8650_s29  ;;  %v5096_v1 = vmul.f32 %v10439_v37, %v11029_v23  ;;  %v5505_v57 = vadd.f32 %v5395_v24, %v5095_v7  ;;  %v5100_v7 = vmul.f32 %v10459_v9, %v11033_v49 }
 0x468   : > { %v5397_v12 = vpop.permute.xlu1 %5396  ;;  %8579 = vtanh.f32 %v5505_v57 }
 0x469   : > { %v5506_v43 = vadd.f32 %v5397_v12, %v5096_v1 }
 0x46a   : > { %5446 = vrot.lane.b32.xlu0 %v5326_v55, %s8649_s11  ;;  %5628 = vrot.lane.b32.xlu1 %v8564_v18, %s8649_s11  ;;  %v5399_v55 = vpop.permute.xlu0 %5398 }
 0x46b   : > { %v8576_v18 = vpop.eup %8575  ;;  %8581 = vtanh.f32 %v5506_v43 }
 0x46c   : > { %v5401_v33 = vpop.permute.xlu1 %5400 }
 0x46e   : > { %5630 = vrot.lane.b32.xlu0 %v8568_v14, %s8649_s11  ;;  %5448 = vrot.lane.b32.xlu1 %v5327_v8, %s8649_s11  ;;  %v5097_v8 = vmul.f32 %v10446_v0, %v11030_v34  ;;  %v11031_v14 = vld [vmem:[#allocation7_spill] sm:$0xff] }
 0x46f   : > { %v5098_v19 = vmul.f32 %v10449_v17, %v11031_v14  ;;  %v11035_v34 = vld [vmem:[#allocation11_spill] sm:$0xff] }
 0x470   : > { %v5507_v31 = vadd.f32 %v5399_v55, %v5097_v8  ;;  %v5102_v8 = vmul.f32 %v10470_v56, %v11035_v34 }
 0x471   : > { %v5508_v26 = vadd.f32 %v5401_v33, %v5098_v19 }
 0x472   : > { %5841 = vrot.lane.b32.xlu0 %v5503_v53, %s8650_s29  ;;  %5843 = vrot.lane.b32.xlu1 %v5504_v41, %s8650_s29  ;;  %v8578_v53 = vpop.eup %8577  ;;  %8583 = vtanh.f32 %v5507_v31  ;;  %v5403_v29 = vpop.permute.xlu0 %5402 }
 0x473   : > { %v8580_v41 = vpop.eup %8579  ;;  %8585 = vtanh.f32 %v5508_v26 }
 0x475   : > { %v8582_v1 = vpop.eup %8581 }
 0x476   : > { %5632 = vrot.lane.b32.xlu1 %v8572_v5, %s8649_s11  ;;  %5450 = vrot.lane.b32.xlu0 %v5328_v44, %s8649_s11  ;;  %v11032_v44 = vld [vmem:[#allocation8_spill] sm:$0xff]  ;;  %v5405_v5 = vpop.permute.xlu1 %5404 }
 0x477   : > { %v5099_v24 = vmul.f32 %v10455_v46, %v11032_v44  ;;  %v5510_v23 = vadd.f32 %v5405_v5, %v5100_v7  ;;  %v11037_v44 = vld [vmem:[#allocation13_spill] sm:$0xff] }
 0x479   : > { %v5509_v12 = vadd.f32 %v5403_v29, %v5099_v24  ;;  %v5104_v24 = vmul.f32 %v10479_v10, %v11037_v44 }
 0x47a   : > { %5847 = vrot.lane.b32.xlu1 %v5506_v43, %s8650_s29  ;;  %5634 = vrot.lane.b32.xlu0 %v8574_v3, %s8649_s11  ;;  %v11034_v3 = vld [vmem:[#allocation10_spill] sm:$0xff] }
 0x47b   : > { %8587 = vtanh.f32 %v5509_v12  ;;  %v5101_v55 = vmul.f32 %v10465_v22, %v11034_v3  ;;  %v11039_v3 = vld [vmem:[#allocation15_spill] sm:$0xff] }
 0x47c   : > { %v8584_v43 = vpop.eup %8583  ;;  %8589 = vtanh.f32 %v5510_v23 }
 0x47d   : > { %v8586_v19 = vpop.eup %8585 }
 0x47e   : > { %5636 = vrot.lane.b32.xlu1 %v8576_v18, %s8649_s11  ;;  %5845 = vrot.lane.b32.xlu0 %v5505_v57, %s8650_s29  ;;  %v5407_v57 = vpop.permute.xlu0 %5406  ;;  %v5409_v18 = vpop.permute.xlu1 %5408 }
 0x47f   : > { %v5511_v33 = vadd.f32 %v5407_v57, %v5101_v55  ;;  %v5512_v14 = vadd.f32 %v5409_v18, %v5102_v8  ;;  %v11038_v57 = vld [vmem:[#allocation14_spill] sm:$0xff]  ;;  %v5106_v55 = vmul.f32 %v10488_v25, %v11039_v3 }
 0x481   : > { %8591 = vtanh.f32 %v5511_v33 }
 0x482   : > { %5851 = vrot.lane.b32.xlu1 %v5508_v26, %s8650_s29  ;;  %5638 = vrot.lane.b32.xlu0 %v8578_v53, %s8649_s11  ;;  %v11036_v53 = vld [vmem:[#allocation12_spill] sm:$0xff]  ;;  %8593 = vtanh.f32 %v5512_v14 }
 0x483   : > { %v5103_v29 = vmul.f32 %v10475_v39, %v11036_v53  ;;  %v11040_v53 = vld [vmem:[#allocation16_spill] sm:$0xff] }
 0x485   : > { %v8588_v26 = vpop.eup %8587 }
 0x486   : > { %5640 = vrot.lane.b32.xlu1 %v8580_v41, %s8649_s11  ;;  %5849 = vrot.lane.b32.xlu0 %v5507_v31, %s8650_s29  ;;  %v5411_v31 = vpop.permute.xlu0 %5410  ;;  %v5413_v41 = vpop.permute.xlu1 %5412 }
 0x487   : > { %v5513_v5 = vadd.f32 %v5411_v31, %v5103_v29  ;;  %v5514_v49 = vadd.f32 %v5413_v41, %v5104_v24  ;;  %v8590_v7 = vpop.eup %8589  ;;  %v5107_v29 = vmul.f32 %v10495_v36, %v11040_v53  ;;  %v11041_v41 = vld [vmem:[#allocation17_spill] sm:$0xff] }
 0x488   : > { %v5108_v44 = vmul.f32 %v10498_v59, %v11041_v41 }
 0x489   : > { %8595 = vtanh.f32 %v5513_v5 }
 0x48a   : > { %5855 = vrot.lane.b32.xlu1 %v5510_v23, %s8650_s29  ;;  %5642 = vrot.lane.b32.xlu0 %v8582_v1, %s8649_s11  ;;  %8597 = vtanh.f32 %v5514_v49 }
 0x48b   : > { %v8592_v1 = vpop.eup %8591 }
 0x48c   : > { %v5417_v23 = vpop.permute.xlu1 %5416 }
 0x48e   : > { %5644 = vrot.lane.b32.xlu1 %v8584_v43, %s8649_s11  ;;  %5853 = vrot.lane.b32.xlu0 %v5509_v12, %s8650_s29  ;;  %v5415_v12 = vpop.permute.xlu0 %5414  ;;  %v5105_v43 = vmul.f32 %v10484_v13, %v11038_v57 }
 0x490   : > { %v5515_v18 = vadd.f32 %v5415_v12, %v5105_v43  ;;  %v11042_v43 = vld [vmem:[#allocation18_spill] sm:$0xff] }
 0x491   : > { %v5109_v3 = vmul.f32 %v10504_v35, %v11042_v43 }
 0x492   : > { %5859 = vrot.lane.b32.xlu1 %v5512_v14, %s8650_s29  ;;  %5646 = vrot.lane.b32.xlu0 %v8586_v19, %s8649_s11  ;;  %v5419_v34 = vpop.permute.xlu0 %5418  ;;  %v8594_v14 = vpop.eup %8593  ;;  %8599 = vtanh.f32 %v5515_v18 }
 0x493   : > { %v5517_v24 = vadd.f32 %v5419_v34, %v5107_v29 }
 0x494   : > { %v5421_v8 = vpop.permute.xlu1 %5420 }
 0x496   : > { %5648 = vrot.lane.b32.xlu1 %v8588_v26, %s8649_s11  ;;  %5857 = vrot.lane.b32.xlu0 %v5511_v33, %s8650_s29  ;;  %v5516_v33 = vadd.f32 %v5417_v23, %v5106_v55  ;;  %v8596_v26 = vpop.eup %8595  ;;  %v11043_v55 = vld [vmem:[#allocation19_spill] sm:$0xff] }
 0x497   : > { %v8598_v12 = vpop.eup %8597 }
 0x498   : > { %8601 = vtanh.f32 %v5516_v33 }
 0x499   : > { %8603 = vtanh.f32 %v5517_v24 }
 0x49a   : > { %5863 = vrot.lane.b32.xlu1 %v5514_v49, %s8650_s29  ;;  %5650 = vrot.lane.b32.xlu0 %v8590_v7, %s8649_s11  ;;  %v5423_v19 = vpop.permute.xlu0 %5422  ;;  %v5518_v7 = vadd.f32 %v5421_v8, %v5108_v44  ;;  %v11044_v44 = vld [vmem:[#allocation20_spill] sm:$0xff] }
 0x49b   : > { %v5519_v34 = vadd.f32 %v5423_v19, %v5109_v3  ;;  %v11045_v19 = vld [vmem:[#allocation21_spill] sm:$0xff] }
 0x49c   : > { %v5425_v31 = vpop.permute.xlu1 %5424  ;;  %v8600_v57 = vpop.eup %8599  ;;  %8605 = vtanh.f32 %v5518_v7 }
 0x49d   : > { %8607 = vtanh.f32 %v5519_v34 }
 0x49e   : > { %5652 = vrot.lane.b32.xlu1 %v8592_v1, %s8649_s11  ;;  %5861 = vrot.lane.b32.xlu0 %v5513_v5, %s8650_s29 }
 0x4a2   : > { %5867 = vrot.lane.b32.xlu1 %v5516_v33, %s8650_s29  ;;  %5654 = vrot.lane.b32.xlu0 %v8594_v14, %s8649_s11  ;;  %v5427_v5 = vpop.permute.xlu0 %5426 }
 0x4a5   : > { %v5429_v49 = vpop.permute.xlu1 %5428 }
 0x4a6   : > { %5656 = vrot.lane.b32.xlu1 %v8596_v26, %s8649_s11  ;;  %5865 = vrot.lane.b32.xlu0 %v5515_v18, %s8650_s29  ;;  %v5110_v18 = vmul.f32 %v10506_v27, %v11043_v55  ;;  %v8602_v26 = vpop.eup %8601 }
 0x4a7   : > { %v8604_v41 = vpop.eup %8603 }
 0x4a8   : > { %v5520_v8 = vadd.f32 %v5425_v31, %v5110_v18  ;;  %v5112_v31 = vmul.f32 %v10517_v63, %v11045_v19  ;;  %v11046_v18 = vld [vmem:[#allocation23_spill] sm:$0xff] }
 0x4a9   : > { %v5822_v23 = vpop.permute.xlu0 %5821 }
 0x4aa   : > { %5871 = vrot.lane.b32.xlu1 %v5518_v7, %s8650_s29  ;;  %5658 = vrot.lane.b32.xlu0 %v8598_v12, %s8649_s11  ;;  %5945 = vst.msk [vmem:[%s10674_s8] sm:$0xff] %vm5944_vm3, %v5822_v23  ;;  %v5111_v12 = vmul.f32 %v10513_v4, %v11044_v44  ;;  %8609 = vtanh.f32 %v5520_v8  ;;  %v5522_v7 = vadd.f32 %v5429_v49, %v5112_v31 }
 0x4ac   : > { %v5824_v1 = vpop.permute.xlu1 %5823 }
 0x4ad   : > { %5946 = vst.msk [vmem:[%s10674_s8 + $0x8] sm:$0xff] %vm5944_vm3, %v5824_v1 }
 0x4ae   : > { %5660 = vrot.lane.b32.xlu1 %v8600_v57, %s8649_s11  ;;  %5869 = vrot.lane.b32.xlu0 %v5517_v24, %s8650_s29  ;;  %v5521_v24 = vadd.f32 %v5427_v5, %v5111_v12  ;;  %v8606_v57 = vpop.eup %8605 }
 0x4af   : > { %v8608_v55 = vpop.eup %8607 }
 0x4b0   : > { %v5431_v33 = vpop.permute.xlu0 %5430  ;;  %v5433_v14 = vpop.permute.xlu1 %5432  ;;  %8611 = vtanh.f32 %v5521_v24 }
 0x4b1   : > { %8613 = vtanh.f32 %v5522_v7 }
 0x4b2   : > { %5875 = vrot.lane.b32.xlu1 %v5520_v8, %s8650_s29  ;;  %5662 = vrot.lane.b32.xlu0 %v8602_v26, %s8649_s11  ;;  %v5114_v26 = vmul.f32 %v10528_v50, %v11046_v18  ;;  %v11049_v18 = vld [vmem:[#allocation25_spill] sm:$0xff] }
 0x4b4   : > { %v5826_v53 = vpop.permute.xlu0 %5825  ;;  %v5828_v29 = vpop.permute.xlu1 %5827  ;;  %v5524_v5 = vadd.f32 %v5433_v14, %v5114_v26 }
 0x4b5   : > { %5947 = vst.msk [vmem:[%s10674_s8 + $0x10] sm:$0xff] %vm5944_vm3, %v5826_v53  ;;  %5948 = vst.msk [vmem:[%s10674_s8 + $0x18] sm:$0xff] %vm5944_vm3, %v5828_v29  ;;  %v8610_v8 = vpop.eup %8609  ;;  %v11047_v53 = vld [vmem:[#allocation22_spill] sm:$0xff] }
 0x4b6   : > { %5664 = vrot.lane.b32.xlu1 %v8604_v41, %s8649_s11  ;;  %5873 = vrot.lane.b32.xlu0 %v5519_v34, %s8650_s29  ;;  %v5113_v29 = vmul.f32 %v10531_v40, %v11047_v53 }
 0x4b8   : > { %v5435_v23 = vpop.permute.xlu0 %5434  ;;  %v5617_v1 = vpop.permute.xlu1 %5616  ;;  %v5523_v41 = vadd.f32 %v5431_v33, %v5113_v29  ;;  %v5116_v33 = vmul.f32 %v10550_v47, %v11049_v18 }
 0x4b9   : > { %v5739_v14 = vmul.f32 %v10315_v54, %v5617_v1 }
 0x4ba   : > { %5879 = vrot.lane.b32.xlu1 %v5522_v7, %s8650_s29  ;;  %5666 = vrot.lane.b32.xlu0 %v8606_v57, %s8649_s11  ;;  %v8612_v19 = vpop.eup %8611  ;;  %8615 = vtanh.f32 %v5523_v41  ;;  %v11048_v57 = vld [vmem:[#allocation24_spill] sm:$0xff] }
 0x4bb   : > { %v8614_v7 = vpop.eup %8613  ;;  %8617 = vtanh.f32 %v5524_v5 }
 0x4bc   : > { %v5619_v43 = vpop.permute.xlu0 %5618  ;;  %v5437_v3 = vpop.permute.xlu1 %5436 }
 0x4bd   : > { %v5740_v54 = vmul.f32 %v10323_v42, %v5619_v43 }
 0x4be   : > { %5668 = vrot.lane.b32.xlu1 %v8608_v55, %s8649_s11  ;;  %5877 = vrot.lane.b32.xlu0 %v5521_v24, %s8650_s29  ;;  %v5115_v55 = vmul.f32 %v10545_v58, %v11048_v57 }
 0x4c0   : > { %v5830_v49 = vpop.permute.xlu0 %5829  ;;  %v5832_v34 = vpop.permute.xlu1 %5831  ;;  %v5525_v26 = vadd.f32 %v5435_v23, %v5115_v55 }
 0x4c1   : > { %5949 = vst.msk [vmem:[%s10674_s8 + $0x20] sm:$0xff] %vm5944_vm3, %v5830_v49  ;;  %5950 = vst.msk [vmem:[%s10674_s8 + $0x28] sm:$0xff] %vm5944_vm3, %v5832_v34  ;;  %v5526_v49 = vadd.f32 %v5437_v3, %v5116_v33 }
 0x4c2   : > { %5883 = vrot.lane.b32.xlu1 %v5524_v5, %s8650_s29  ;;  %5670 = vrot.lane.b32.xlu0 %v8610_v8, %s8649_s11  ;;  %8619 = vtanh.f32 %v5525_v26 }
 0x4c3   : > { %8621 = vtanh.f32 %v5526_v49 }
 0x4c4   : > { %v5439_v44 = vpop.permute.xlu0 %5438  ;;  %v5621_v12 = vpop.permute.xlu1 %5620 }
 0x4c5   : > { %v8616_v29 = vpop.eup %8615  ;;  %v5741_v23 = vmul.f32 %v10337_v60, %v5621_v12 }
 0x4c6   : > { %5672 = vrot.lane.b32.xlu1 %v8612_v19, %s8649_s11  ;;  %5881 = vrot.lane.b32.xlu0 %v5523_v41, %s8650_s29  ;;  %v8618_v41 = vpop.eup %8617  ;;  %v11050_v19 = vld [vmem:[#allocation26_spill] sm:$0xff] }
 0x4c8   : > { %v5623_v31 = vpop.permute.xlu0 %5622  ;;  %v5441_v24 = vpop.permute.xlu1 %5440 }
 0x4c9   : > { %v5742_v60 = vmul.f32 %v10345_v62, %v5623_v31 }
 0x4ca   : > { %6027 = vrot.lane.b32.xlu1 %v5739_v14, %s8650_s29  ;;  %5674 = vrot.lane.b32.xlu0 %v8614_v7, %s8649_s11  ;;  %v5117_v14 = vmul.f32 %v10563_v2, %v11050_v19  ;;  %v11051_v7 = vld [vmem:[#allocation27_spill] sm:$0xff] }
 0x4cb   : > { %v5118_v42 = vmul.f32 %v10568_v21, %v11051_v7 }
 0x4cc   : > { %v5834_v34 = vpop.permute.xlu0 %5833  ;;  %v5836_v8 = vpop.permute.xlu1 %5835  ;;  %v5527_v43 = vadd.f32 %v5439_v44, %v5117_v14 }
 0x4cd   : > { %5951 = vst.msk [vmem:[%s10674_s8 + $0x30] sm:$0xff] %vm5944_vm3, %v5834_v34  ;;  %5952 = vst.msk [vmem:[%s10674_s8 + $0x38] sm:$0xff] %vm5944_vm3, %v5836_v8  ;;  %v5528_v57 = vadd.f32 %v5441_v24, %v5118_v42  ;;  %v11052_v8 = vld [vmem:[#allocation28_spill] sm:$0xff] }
 0x4ce   : > { %5887 = vrot.lane.b32.xlu1 %v5526_v49, %s8650_s29  ;;  %5885 = vrot.lane.b32.xlu0 %v5525_v26, %s8650_s29  ;;  %v8620_v26 = vpop.eup %8619  ;;  %8623 = vtanh.f32 %v5527_v43 }
 0x4cf   : > { %v8622_v34 = vpop.eup %8621  ;;  %8625 = vtanh.f32 %v5528_v57 }
 0x4d0   : > { %v5443_v1 = vpop.permute.xlu0 %5442  ;;  %v5625_v53 = vpop.permute.xlu1 %5624 }
 0x4d1   : > { %v5743_v44 = vmul.f32 %v10361_v52, %v5625_v53 }
 0x4d2   : > { %5676 = vrot.lane.b32.xlu1 %v8616_v29, %s8649_s11  ;;  %6029 = vrot.lane.b32.xlu0 %v5740_v54, %s8650_s29  ;;  %v5119_v54 = vmul.f32 %v10580_v11, %v11052_v8  ;;  %v11053_v29 = vld [vmem:[#allocation29_spill] sm:$0xff] }
 0x4d3   : > { %v5120_v62 = vmul.f32 %v10585_v38, %v11053_v29 }
 0x4d4   : > { %v5627_v3 = vpop.permute.xlu0 %5626  ;;  %v5445_v5 = vpop.permute.xlu1 %5444  ;;  %v5529_v31 = vadd.f32 %v5443_v1, %v5119_v54  ;;  %v11056_v54 = vld [vmem:[#allocation32_spill] sm:$0xff] }
 0x4d5   : > { %v5744_v52 = vmul.f32 %v10369_v45, %v5627_v3  ;;  %v11055_v45 = vld [vmem:[#allocation31_spill] sm:$0xff]  ;;  %v5123_v29 = vmul.f32 %v10612_v28, %v11056_v54 }
 0x4d6   : > { %6031 = vrot.lane.b32.xlu1 %v5741_v23, %s8650_s29  ;;  %5678 = vrot.lane.b32.xlu0 %v8618_v41, %s8649_s11  ;;  %v5530_v23 = vadd.f32 %v5445_v5, %v5120_v62  ;;  %8627 = vtanh.f32 %v5529_v31  ;;  %v5122_v3 = vmul.f32 %v10601_v30, %v11055_v45 }
 0x4d8   : > { %v5838_v55 = vpop.permute.xlu0 %5837  ;;  %v5840_v18 = vpop.permute.xlu1 %5839  ;;  %8629 = vtanh.f32 %v5530_v23 }
 0x4d9   : > { %5953 = vst.msk [vmem:[%s10674_s8 + $0x40] sm:$0xff] %vm5944_vm3, %v5838_v55  ;;  %5954 = vst.msk [vmem:[%s10674_s8 + $0x48] sm:$0xff] %vm5944_vm3, %v5840_v18  ;;  %v8624_v7 = vpop.eup %8623 }
 0x4da   : > { %5891 = vrot.lane.b32.xlu1 %v5528_v57, %s8650_s29  ;;  %5889 = vrot.lane.b32.xlu0 %v5527_v43, %s8650_s29  ;;  %v8626_v43 = vpop.eup %8625  ;;  %v11054_v57 = vld [vmem:[#allocation30_spill] sm:$0xff] }
 0x4db   : > { %v5121_v55 = vmul.f32 %v10596_v16, %v11054_v57 }
 0x4dc   : > { %v5447_v12 = vpop.permute.xlu0 %5446  ;;  %v5629_v33 = vpop.permute.xlu1 %5628 }
 0x4dd   : > { %v5745_v1 = vmul.f32 %v10380_v48, %v5629_v33  ;;  %v5531_v18 = vadd.f32 %v5447_v12, %v5121_v55 }
 0x4de   : > { %5680 = vrot.lane.b32.xlu1 %v8620_v26, %s8649_s11  ;;  %6033 = vrot.lane.b32.xlu0 %v5742_v60, %s8650_s29 }
 0x4df   : > { %8631 = vtanh.f32 %v5531_v18 }
 0x4e0   : > { %v5631_v24 = vpop.permute.xlu0 %5630  ;;  %v5449_v49 = vpop.permute.xlu1 %5448 }
 0x4e1   : > { %v5532_v60 = vadd.f32 %v5449_v49, %v5122_v3  ;;  %v5746_v26 = vmul.f32 %v10387_v20, %v5631_v24  ;;  %v8628_v8 = vpop.eup %8627 }
 0x4e2   : > { %6035 = vrot.lane.b32.xlu1 %v5743_v44, %s8650_s29  ;;  %5682 = vrot.lane.b32.xlu0 %v8622_v34, %s8649_s11 }
 0x4e3   : > { %8633 = vtanh.f32 %v5532_v60 }
 0x4e4   : > { %v5842_v41 = vpop.permute.xlu0 %5841  ;;  %v5844_v19 = vpop.permute.xlu1 %5843 }
 0x4e5   : > { %5955 = vst.msk [vmem:[%s10674_s8 + $0x50] sm:$0xff] %vm5944_vm3, %v5842_v41  ;;  %5956 = vst.msk [vmem:[%s10674_s8 + $0x58] sm:$0xff] %vm5944_vm3, %v5844_v19 }
 0x4e6   : > { %5895 = vrot.lane.b32.xlu1 %v5530_v23, %s8650_s29  ;;  %5893 = vrot.lane.b32.xlu0 %v5529_v31, %s8650_s29  ;;  %v8630_v23 = vpop.eup %8629 }
 0x4e8   : > { %v5633_v53 = vpop.permute.xlu1 %5632  ;;  %v5451_v14 = vpop.permute.xlu0 %5450 }
 0x4e9   : > { %v5533_v12 = vadd.f32 %v5451_v14, %v5123_v29  ;;  %v5747_v49 = vmul.f32 %v10403_v51, %v5633_v53  ;;  %v8632_v41 = vpop.eup %8631 }
 0x4ea   : > { %5684 = vrot.lane.b32.xlu1 %v8624_v7, %s8649_s11  ;;  %6037 = vrot.lane.b32.xlu0 %v5744_v52, %s8650_s29 }
 0x4eb   : > { %8635 = vtanh.f32 %v5533_v12 }
 0x4ec   : > { %v5848_v5 = vpop.permute.xlu1 %5847  ;;  %v5635_v42 = vpop.permute.xlu0 %5634 }
 0x4ed   : > { %5958 = vst.msk [vmem:[%s10674_s8 + $0x68] sm:$0xff] %vm5944_vm3, %v5848_v5  ;;  %v5748_v51 = vmul.f32 %v10406_v15, %v5635_v42  ;;  %v8634_v14 = vpop.eup %8633 }
 0x4ee   : > { %6039 = vrot.lane.b32.xlu1 %v5745_v1, %s8650_s29  ;;  %5686 = vrot.lane.b32.xlu0 %v8626_v43, %s8649_s11 }
 0x4f0   : > { %v5637_v48 = vpop.permute.xlu1 %5636  ;;  %v5846_v33 = vpop.permute.xlu0 %5845 }
 0x4f1   : > { %5957 = vst.msk [vmem:[%s10674_s8 + $0x60] sm:$0xff] %vm5944_vm3, %v5846_v33  ;;  %v5749_v19 = vmul.f32 %v10420_v6, %v5637_v48 }
 0x4f2   : > { %5899 = vrot.lane.b32.xlu1 %v5532_v60, %s8650_s29  ;;  %5897 = vrot.lane.b32.xlu0 %v5531_v18, %s8650_s29 }
 0x4f4   : > { %v5852_v44 = vpop.permute.xlu1 %5851  ;;  %v5639_v34 = vpop.permute.xlu0 %5638 }
 0x4f5   : > { %5960 = vst.msk [vmem:[%s10674_s8 + $0x78] sm:$0xff] %vm5944_vm3, %v5852_v44  ;;  %v8636_v5 = vpop.eup %8635  ;;  %v5750_v15 = vmul.f32 %v10428_v32, %v5639_v34 }
 0x4f6   : > { %5688 = vrot.lane.b32.xlu1 %v8628_v8, %s8649_s11  ;;  %6041 = vrot.lane.b32.xlu0 %v5746_v26, %s8650_s29 }
 0x4f8   : > { %v5641_v62 = vpop.permute.xlu1 %5640  ;;  %v5850_v31 = vpop.permute.xlu0 %5849 }
 0x4f9   : > { %5959 = vst.msk [vmem:[%s10674_s8 + $0x70] sm:$0xff] %vm5944_vm3, %v5850_v31  ;;  %v5751_v6 = vmul.f32 %v10434_v61, %v5641_v62 }
 0x4fa   : > { %6043 = vrot.lane.b32.xlu1 %v5747_v49, %s8650_s29  ;;  %5690 = vrot.lane.b32.xlu0 %v8630_v23, %s8649_s11 }
 0x4fc   : > { %v5856_v20 = vpop.permute.xlu1 %5855  ;;  %v5643_v24 = vpop.permute.xlu0 %5642 }
 0x4fd   : > { %5962 = vst.msk [vmem:[%s10674_s8 + $0x88] sm:$0xff] %vm5944_vm3, %v5856_v20  ;;  %v5752_v57 = vmul.f32 %v10439_v37, %v5643_v24 }
 0x4fe   : > { %5692 = vrot.lane.b32.xlu1 %v8632_v41, %s8649_s11  ;;  %5901 = vrot.lane.b32.xlu0 %v5533_v12, %s8650_s29 }
 0x500   : > { %v5645_v52 = vpop.permute.xlu1 %5644  ;;  %v5854_v53 = vpop.permute.xlu0 %5853 }
 0x501   : > { %5961 = vst.msk [vmem:[%s10674_s8 + $0x80] sm:$0xff] %vm5944_vm3, %v5854_v53  ;;  %v5753_v55 = vmul.f32 %v10446_v0, %v5645_v52 }
 0x502   : > { %6047 = vrot.lane.b32.xlu1 %v5749_v19, %s8650_s29  ;;  %6045 = vrot.lane.b32.xlu0 %v5748_v51, %s8650_s29 }
 0x504   : > { %v5860_v7 = vpop.permute.xlu1 %5859  ;;  %v5647_v1 = vpop.permute.xlu0 %5646 }
 0x505   : > { %5964 = vst.msk [vmem:[%s10674_s8 + $0x98] sm:$0xff] %vm5944_vm3, %v5860_v7  ;;  %v5754_v32 = vmul.f32 %v10449_v17, %v5647_v1 }
 0x506   : > { %5694 = vrot.lane.b32.xlu0 %v8634_v14, %s8649_s11  ;;  %5696 = vrot.lane.b32.xlu1 %v8636_v5, %s8649_s11 }
 0x508   : > { %v5649_v42 = vpop.permute.xlu1 %5648  ;;  %v5858_v43 = vpop.permute.xlu0 %5857 }
 0x509   : > { %5963 = vst.msk [vmem:[%s10674_s8 + $0x90] sm:$0xff] %vm5944_vm3, %v5858_v43  ;;  %v5755_v61 = vmul.f32 %v10455_v46, %v5649_v42 }
 0x50a   : > { %6049 = vrot.lane.b32.xlu0 %v5750_v15, %s8650_s29  ;;  %6051 = vrot.lane.b32.xlu1 %v5751_v6, %s8650_s29 }
 0x50c   : > { %v5864_v45 = vpop.permute.xlu1 %5863  ;;  %v5651_v3 = vpop.permute.xlu0 %5650 }
 0x50d   : > { %5966 = vst.msk [vmem:[%s10674_s8 + $0xa8] sm:$0xff] %vm5944_vm3, %v5864_v45  ;;  %v5756_v37 = vmul.f32 %v10459_v9, %v5651_v3 }
 0x50e   : > { %6053 = vrot.lane.b32.xlu0 %v5752_v57, %s8650_s29  ;;  %6055 = vrot.lane.b32.xlu1 %v5753_v55, %s8650_s29 }
 0x510   : > { %v5653_v18 = vpop.permute.xlu1 %5652  ;;  %v5862_v60 = vpop.permute.xlu0 %5861 }
 0x511   : > { %5965 = vst.msk [vmem:[%s10674_s8 + $0xa0] sm:$0xff] %vm5944_vm3, %v5862_v60  ;;  %v5757_v0 = vmul.f32 %v10465_v22, %v5653_v18 }
 0x512   : > { %6057 = vrot.lane.b32.xlu0 %v5754_v32, %s8650_s29  ;;  %6059 = vrot.lane.b32.xlu1 %v5755_v61, %s8650_s29 }
 0x514   : > { %v5868_v48 = vpop.permute.xlu1 %5867  ;;  %v5655_v33 = vpop.permute.xlu0 %5654 }
 0x515   : > { %5968 = vst.msk [vmem:[%s10674_s8 + $0xb8] sm:$0xff] %vm5944_vm3, %v5868_v48  ;;  %v5758_v17 = vmul.f32 %v10470_v56, %v5655_v33 }
 0x516   : > { %6061 = vrot.lane.b32.xlu0 %v5756_v37, %s8650_s29  ;;  %6063 = vrot.lane.b32.xlu1 %v5757_v0, %s8650_s29 }
 0x518   : > { %v5657_v46 = vpop.permute.xlu1 %5656  ;;  %v5866_v26 = vpop.permute.xlu0 %5865 }
 0x519   : > { %v5759_v44 = vmul.f32 %v10475_v39, %v5657_v46  ;;  %5967 = vst.msk [vmem:[%s10674_s8 + $0xb0] sm:$0xff] %vm5944_vm3, %v5866_v26 }
 0x51a   : > { %6065 = vrot.lane.b32.xlu0 %v5758_v17, %s8650_s29 }
 0x51b   : > { %6067 = vrot.lane.b32.xlu1 %v5759_v44, %s8650_s29 }
 0x51c   : > { %v5872_v9 = vpop.permute.xlu1 %5871  ;;  %v5659_v22 = vpop.permute.xlu0 %5658 }
 0x51d   : > { %5970 = vst.msk [vmem:[%s10674_s8 + $0xc8] sm:$0xff] %vm5944_vm3, %v5872_v9  ;;  %v5760_v34 = vmul.f32 %v10479_v10, %v5659_v22 }
 0x51f   : > { %6069 = vrot.lane.b32.xlu0 %v5760_v34, %s8650_s29 }
 0x520   : > { %v5661_v56 = vpop.permute.xlu1 %5660  ;;  %v5870_v8 = vpop.permute.xlu0 %5869 }
 0x521   : > { %v5761_v39 = vmul.f32 %v10484_v13, %v5661_v56  ;;  %5969 = vst.msk [vmem:[%s10674_s8 + $0xc0] sm:$0xff] %vm5944_vm3, %v5870_v8 }
 0x523   : > { %6071 = vrot.lane.b32.xlu1 %v5761_v39, %s8650_s29 }
 0x524   : > { %v5876_v54 = vpop.permute.xlu1 %5875  ;;  %v5663_v29 = vpop.permute.xlu0 %5662 }
 0x525   : > { %5972 = vst.msk [vmem:[%s10674_s8 + $0xd8] sm:$0xff] %vm5944_vm3, %v5876_v54  ;;  %v5762_v12 = vmul.f32 %v10488_v25, %v5663_v29 }
 0x527   : > { %6073 = vrot.lane.b32.xlu0 %v5762_v12, %s8650_s29 }
 0x528   : > { %v5665_v10 = vpop.permute.xlu1 %5664  ;;  %v5874_v49 = vpop.permute.xlu0 %5873 }
 0x529   : > { %v5763_v62 = vmul.f32 %v10495_v36, %v5665_v10  ;;  %5971 = vst.msk [vmem:[%s10674_s8 + $0xd0] sm:$0xff] %vm5944_vm3, %v5874_v49 }
 0x52b   : > { %6075 = vrot.lane.b32.xlu1 %v5763_v62, %s8650_s29 }
 0x52c   : > { %v5880_v13 = vpop.permute.xlu1 %5879  ;;  %v5667_v31 = vpop.permute.xlu0 %5666 }
 0x52d   : > { %5974 = vst.msk [vmem:[%s10674_s8 + $0xe8] sm:$0xff] %vm5944_vm3, %v5880_v13  ;;  %v5764_v23 = vmul.f32 %v10498_v59, %v5667_v31 }
 0x52f   : > { %6077 = vrot.lane.b32.xlu0 %v5764_v23, %s8650_s29 }
 0x530   : > { %v5669_v25 = vpop.permute.xlu1 %5668  ;;  %v5878_v20 = vpop.permute.xlu0 %5877 }
 0x531   : > { %v5765_v24 = vmul.f32 %v10504_v35, %v5669_v25  ;;  %5973 = vst.msk [vmem:[%s10674_s8 + $0xe0] sm:$0xff] %vm5944_vm3, %v5878_v20 }
 0x533   : > { %6079 = vrot.lane.b32.xlu1 %v5765_v24, %s8650_s29 }
 0x534   : > { %v5884_v36 = vpop.permute.xlu1 %5883  ;;  %v5671_v41 = vpop.permute.xlu0 %5670 }
 0x535   : > { %5976 = vst.msk [vmem:[%s10674_s8 + $0xf8] sm:$0xff] %vm5944_vm3, %v5884_v36  ;;  %v5766_v51 = vmul.f32 %v10506_v27, %v5671_v41 }
 0x537   : > { %6081 = vrot.lane.b32.xlu0 %v5766_v51, %s8650_s29 }
 0x538   : > { %v5673_v59 = vpop.permute.xlu1 %5672  ;;  %v5882_v19 = vpop.permute.xlu0 %5881 }
 0x539   : > { %v5767_v52 = vmul.f32 %v10513_v4, %v5673_v59  ;;  %5975 = vst.msk [vmem:[%s10674_s8 + $0xf0] sm:$0xff] %vm5944_vm3, %v5882_v19 }
 0x53b   : > { %6083 = vrot.lane.b32.xlu1 %v5767_v52, %s8650_s29 }
 0x53c   : > { %v6028_v35 = vpop.permute.xlu1 %6027  ;;  %v5675_v53 = vpop.permute.xlu0 %5674 }
 0x53d   : > { %6151 = vst.msk [vmem:[%s10674_s8] sm:$0xff] %vm6150_vm4, %v6028_v35  ;;  %v5768_v27 = vmul.f32 %v10517_v63, %v5675_v53 }
 0x53f   : > { %6085 = vrot.lane.b32.xlu0 %v5768_v27, %s8650_s29 }
 0x540   : > { %v5888_v14 = vpop.permute.xlu1 %5887  ;;  %v5886_v7 = vpop.permute.xlu0 %5885 }
 0x541   : > { %5978 = vst.msk [vmem:[%s10674_s8 + $0x108] sm:$0xff] %vm5944_vm3, %v5888_v14  ;;  %5977 = vst.msk [vmem:[%s10674_s8 + $0x100] sm:$0xff] %vm5944_vm3, %v5886_v7 }
 0x544   : > { %v5677_v4 = vpop.permute.xlu1 %5676  ;;  %v6030_v1 = vpop.permute.xlu0 %6029 }
 0x545   : > { %v5769_v5 = vmul.f32 %v10531_v40, %v5677_v4  ;;  %6152 = vst.msk [vmem:[%s10674_s8 + $0x8] sm:$0xff] %vm6150_vm4, %v6030_v1 }
 0x547   : > { %6087 = vrot.lane.b32.xlu1 %v5769_v5, %s8650_s29 }
 0x548   : > { %v6032_v63 = vpop.permute.xlu1 %6031  ;;  %v5679_v15 = vpop.permute.xlu0 %5678 }
 0x549   : > { %6153 = vst.msk [vmem:[%s10674_s8 + $0x10] sm:$0xff] %vm6150_vm4, %v6032_v63  ;;  %v5770_v6 = vmul.f32 %v10528_v50, %v5679_v15 }
 0x54b   : > { %6089 = vrot.lane.b32.xlu0 %v5770_v6, %s8650_s29 }
 0x54c   : > { %v5892_v42 = vpop.permute.xlu1 %5891  ;;  %v5890_v43 = vpop.permute.xlu0 %5889 }
 0x54d   : > { %5980 = vst.msk [vmem:[%s10674_s8 + $0x118] sm:$0xff] %vm5944_vm3, %v5892_v42  ;;  %5979 = vst.msk [vmem:[%s10674_s8 + $0x110] sm:$0xff] %vm5944_vm3, %v5890_v43 }
 0x550   : > { %v5681_v40 = vpop.permute.xlu1 %5680  ;;  %v6034_v57 = vpop.permute.xlu0 %6033 }
 0x551   : > { %v5771_v55 = vmul.f32 %v10545_v58, %v5681_v40  ;;  %6154 = vst.msk [vmem:[%s10674_s8 + $0x18] sm:$0xff] %vm6150_vm4, %v6034_v57 }
 0x553   : > { %6091 = vrot.lane.b32.xlu1 %v5771_v55, %s8650_s29 }
 0x554   : > { %v6036_v50 = vpop.permute.xlu1 %6035  ;;  %v5683_v45 = vpop.permute.xlu0 %5682 }
 0x555   : > { %6155 = vst.msk [vmem:[%s10674_s8 + $0x20] sm:$0xff] %vm6150_vm4, %v6036_v50  ;;  %v5772_v3 = vmul.f32 %v10550_v47, %v5683_v45 }
 0x557   : > { %6093 = vrot.lane.b32.xlu0 %v5772_v3, %s8650_s29 }
 0x558   : > { %v5896_v32 = vpop.permute.xlu1 %5895  ;;  %v5894_v61 = vpop.permute.xlu0 %5893 }
 0x559   : > { %5982 = vst.msk [vmem:[%s10674_s8 + $0x128] sm:$0xff] %vm5944_vm3, %v5896_v32  ;;  %5981 = vst.msk [vmem:[%s10674_s8 + $0x120] sm:$0xff] %vm5944_vm3, %v5894_v61 }
 0x55c   : > { %v5685_v58 = vpop.permute.xlu1 %5684  ;;  %v6038_v18 = vpop.permute.xlu0 %6037 }
 0x55d   : > { %v5773_v60 = vmul.f32 %v10563_v2, %v5685_v58  ;;  %6156 = vst.msk [vmem:[%s10674_s8 + $0x28] sm:$0xff] %vm6150_vm4, %v6038_v18 }
 0x55f   : > { %6095 = vrot.lane.b32.xlu1 %v5773_v60, %s8650_s29 }
 0x560   : > { %v6040_v47 = vpop.permute.xlu1 %6039  ;;  %v5687_v37 = vpop.permute.xlu0 %5686 }
 0x561   : > { %6157 = vst.msk [vmem:[%s10674_s8 + $0x30] sm:$0xff] %vm6150_vm4, %v6040_v47  ;;  %v5774_v0 = vmul.f32 %v10568_v21, %v5687_v37 }
 0x563   : > { %6097 = vrot.lane.b32.xlu0 %v5774_v0, %s8650_s29 }
 0x564   : > { %v5900_v48 = vpop.permute.xlu1 %5899  ;;  %v5898_v33 = vpop.permute.xlu0 %5897 }
 0x565   : > { %5984 = vst.msk [vmem:[%s10674_s8 + $0x138] sm:$0xff] %vm5944_vm3, %v5900_v48  ;;  %5983 = vst.msk [vmem:[%s10674_s8 + $0x130] sm:$0xff] %vm5944_vm3, %v5898_v33 }
 0x568   : > { %v5689_v2 = vpop.permute.xlu1 %5688  ;;  %v6042_v17 = vpop.permute.xlu0 %6041 }
 0x569   : > { %v5775_v46 = vmul.f32 %v10580_v11, %v5689_v2  ;;  %6158 = vst.msk [vmem:[%s10674_s8 + $0x38] sm:$0xff] %vm6150_vm4, %v6042_v17 }
 0x56b   : > { %6099 = vrot.lane.b32.xlu1 %v5775_v46, %s8650_s29 }
 0x56c   : > { %v6044_v21 = vpop.permute.xlu1 %6043  ;;  %v5691_v26 = vpop.permute.xlu0 %5690 }
 0x56d   : > { %6159 = vst.msk [vmem:[%s10674_s8 + $0x40] sm:$0xff] %vm6150_vm4, %v6044_v21  ;;  %v5776_v44 = vmul.f32 %v10585_v38, %v5691_v26 }
 0x56f   : > { %6101 = vrot.lane.b32.xlu0 %v5776_v44, %s8650_s29 }
 0x570   : > { %v5693_v9 = vpop.permute.xlu1 %5692  ;;  %v5902_v22 = vpop.permute.xlu0 %5901 }
 0x571   : > { %v5777_v34 = vmul.f32 %v10596_v16, %v5693_v9  ;;  %5985 = vst.msk [vmem:[%s10674_s8 + $0x140] sm:$0xff] %vm5944_vm3, %v5902_v22 }
 0x573   : > { %6103 = vrot.lane.b32.xlu1 %v5777_v34, %s8650_s29 }
 0x574   : > { %v6048_v11 = vpop.permute.xlu1 %6047  ;;  %v6046_v56 = vpop.permute.xlu0 %6045 }
 0x575   : > { %6161 = vst.msk [vmem:[%s10674_s8 + $0x50] sm:$0xff] %vm6150_vm4, %v6048_v11  ;;  %6160 = vst.msk [vmem:[%s10674_s8 + $0x48] sm:$0xff] %vm6150_vm4, %v6046_v56 }
 0x578   : > { %v5695_v38 = vpop.permute.xlu0 %5694  ;;  %v5697_v8 = vpop.permute.xlu1 %5696 }
 0x579   : > { %v5778_v39 = vmul.f32 %v10601_v30, %v5695_v38  ;;  %v5779_v16 = vmul.f32 %v10612_v28, %v5697_v8 }
 0x57b   : > { %6105 = vrot.lane.b32.xlu0 %v5778_v39, %s8650_s29  ;;  %6107 = vrot.lane.b32.xlu1 %v5779_v16, %s8650_s29 }
 0x57c   : > { %v6050_v54 = vpop.permute.xlu0 %6049  ;;  %v6052_v29 = vpop.permute.xlu1 %6051 }
 0x57d   : > { %6162 = vst.msk [vmem:[%s10674_s8 + $0x58] sm:$0xff] %vm6150_vm4, %v6050_v54  ;;  %6163 = vst.msk [vmem:[%s10674_s8 + $0x60] sm:$0xff] %vm6150_vm4, %v6052_v29 }
 0x580   : > { %v6054_v12 = vpop.permute.xlu0 %6053  ;;  %v6056_v10 = vpop.permute.xlu1 %6055 }
 0x581   : > { %6164 = vst.msk [vmem:[%s10674_s8 + $0x68] sm:$0xff] %vm6150_vm4, %v6054_v12  ;;  %6165 = vst.msk [vmem:[%s10674_s8 + $0x70] sm:$0xff] %vm6150_vm4, %v6056_v10 }
 0x584   : > { %v6058_v30 = vpop.permute.xlu0 %6057  ;;  %v6060_v28 = vpop.permute.xlu1 %6059 }
 0x585   : > { %6166 = vst.msk [vmem:[%s10674_s8 + $0x78] sm:$0xff] %vm6150_vm4, %v6058_v30  ;;  %6167 = vst.msk [vmem:[%s10674_s8 + $0x80] sm:$0xff] %vm6150_vm4, %v6060_v28 }
 0x588   : > { %v6062_v49 = vpop.permute.xlu0 %6061  ;;  %v6064_v62 = vpop.permute.xlu1 %6063 }
 0x589   : > { %6168 = vst.msk [vmem:[%s10674_s8 + $0x88] sm:$0xff] %vm6150_vm4, %v6062_v49  ;;  %6169 = vst.msk [vmem:[%s10674_s8 + $0x90] sm:$0xff] %vm6150_vm4, %v6064_v62 }
 0x58c   : > { %v6066_v13 = vpop.permute.xlu0 %6065 }
 0x58d   : > { %6170 = vst.msk [vmem:[%s10674_s8 + $0x98] sm:$0xff] %vm6150_vm4, %v6066_v13  ;;  %v6068_v31 = vpop.permute.xlu1 %6067 }
 0x58e   : > { %6171 = vst.msk [vmem:[%s10674_s8 + $0xa0] sm:$0xff] %vm6150_vm4, %v6068_v31 }
 0x591   : > { %v6070_v23 = vpop.permute.xlu0 %6069 }
 0x592   : > { %6172 = vst.msk [vmem:[%s10674_s8 + $0xa8] sm:$0xff] %vm6150_vm4, %v6070_v23 }
 0x595   : > { %v6072_v25 = vpop.permute.xlu1 %6071 }
 0x596   : > { %6173 = vst.msk [vmem:[%s10674_s8 + $0xb0] sm:$0xff] %vm6150_vm4, %v6072_v25 }
 0x599   : > { %v6074_v20 = vpop.permute.xlu0 %6073 }
 0x59a   : > { %6174 = vst.msk [vmem:[%s10674_s8 + $0xb8] sm:$0xff] %vm6150_vm4, %v6074_v20 }
 0x59d   : > { %v6076_v24 = vpop.permute.xlu1 %6075 }
 0x59e   : > { %6175 = vst.msk [vmem:[%s10674_s8 + $0xc0] sm:$0xff] %vm6150_vm4, %v6076_v24 }
 0x5a1   : > { %v6078_v36 = vpop.permute.xlu0 %6077 }
 0x5a2   : > { %6176 = vst.msk [vmem:[%s10674_s8 + $0xc8] sm:$0xff] %vm6150_vm4, %v6078_v36 }
 0x5a5   : > { %v6080_v41 = vpop.permute.xlu1 %6079 }
 0x5a6   : > { %6177 = vst.msk [vmem:[%s10674_s8 + $0xd0] sm:$0xff] %vm6150_vm4, %v6080_v41 }
 0x5a9   : > { %v6082_v51 = vpop.permute.xlu0 %6081 }
 0x5aa   : > { %6178 = vst.msk [vmem:[%s10674_s8 + $0xd8] sm:$0xff] %vm6150_vm4, %v6082_v51 }
 0x5ad   : > { %v6084_v59 = vpop.permute.xlu1 %6083 }
 0x5ae   : > { %6179 = vst.msk [vmem:[%s10674_s8 + $0xe0] sm:$0xff] %vm6150_vm4, %v6084_v59 }
 0x5b1   : > { %v6086_v19 = vpop.permute.xlu0 %6085 }
 0x5b2   : > { %6180 = vst.msk [vmem:[%s10674_s8 + $0xe8] sm:$0xff] %vm6150_vm4, %v6086_v19 }
 0x5b9   : > { %v6088_v52 = vpop.permute.xlu1 %6087 }
 0x5ba   : > { %6181 = vst.msk [vmem:[%s10674_s8 + $0xf0] sm:$0xff] %vm6150_vm4, %v6088_v52 }
 0x5bd   : > { %v6090_v35 = vpop.permute.xlu0 %6089 }
 0x5be   : > { %6182 = vst.msk [vmem:[%s10674_s8 + $0xf8] sm:$0xff] %vm6150_vm4, %v6090_v35 }
 0x5c5   : > { %v6092_v53 = vpop.permute.xlu1 %6091 }
 0x5c6   : > { %6183 = vst.msk [vmem:[%s10674_s8 + $0x100] sm:$0xff] %vm6150_vm4, %v6092_v53 }
 0x5c9   : > { %v6094_v27 = vpop.permute.xlu0 %6093 }
 0x5ca   : > { %6184 = vst.msk [vmem:[%s10674_s8 + $0x108] sm:$0xff] %vm6150_vm4, %v6094_v27 }
 0x5d1   : > { %v6096_v14 = vpop.permute.xlu1 %6095 }
 0x5d2   : > { %6185 = vst.msk [vmem:[%s10674_s8 + $0x110] sm:$0xff] %vm6150_vm4, %v6096_v14 }
 0x5d5   : > { %v6098_v7 = vpop.permute.xlu0 %6097 }
 0x5d6   : > { %6186 = vst.msk [vmem:[%s10674_s8 + $0x118] sm:$0xff] %vm6150_vm4, %v6098_v7 }
 0x5dd   : > { %v6100_v4 = vpop.permute.xlu1 %6099 }
 0x5de   : > { %6187 = vst.msk [vmem:[%s10674_s8 + $0x120] sm:$0xff] %vm6150_vm4, %v6100_v4 }
 0x5e1   : > { %v6102_v1 = vpop.permute.xlu0 %6101 }
 0x5e2   : > { %6188 = vst.msk [vmem:[%s10674_s8 + $0x128] sm:$0xff] %vm6150_vm4, %v6102_v1 }
 0x5e5   : > { %v6104_v5 = vpop.permute.xlu1 %6103 }
 0x5e6   : > { %6189 = vst.msk [vmem:[%s10674_s8 + $0x130] sm:$0xff] %vm6150_vm4, %v6104_v5 }
 0x5ed   : > { %v6106_v63 = vpop.permute.xlu0 %6105  ;;  %v6108_v15 = vpop.permute.xlu1 %6107 }
 0x5ee   : > { %6190 = vst.msk [vmem:[%s10674_s8 + $0x138] sm:$0xff] %vm6150_vm4, %v6106_v63  ;;  %6191 = vst.msk [vmem:[%s10674_s8 + $0x140] sm:$0xff] %vm6150_vm4, %v6108_v15 }
 0x5ef PF: > { %s14_s15 = sadd.s32 1, %s8645_s15  }
 0x5f0   : > { %p11_p4 = scmp.ge.s32.totalorder %s14_s15, 4  }
 0x5f2   :  { %13 = sbr.rel (!%p11_p4) target bundleno = 1 (0x1), region = 77 }

</bundles_post_ra>
